<compile_context>
chip_gen: v5e
topology: v5e:2x2
jax: 0.10.0
libtpu: 0.0.40
codegen_flags: <defaults>
</compile_context>

<pallas_src>
import math
import functools
from functools import partial

import jax
import jax.numpy as jnp
from jax import lax
from jax.experimental import pallas as pl
from jax.experimental.pallas import tpu as pltpu


# ------------------------------ helpers --------------------------------------
@functools.lru_cache(maxsize=None)
def _vmem_limit_bytes():
    # v5e/v6e: 128 MiB physical -> allow ~100 MiB; v7x: 64 MiB -> ~54 MiB.
    try:
        cap = pltpu.get_tpu_info().vmem_capacity_bytes
    except Exception:
        cap = 64 * 1024 * 1024
    return int(min(cap * 0.85, 100 * 1024 * 1024))


def _cp(dims):
    return pltpu.CompilerParams(
        dimension_semantics=dims, vmem_limit_bytes=_vmem_limit_bytes()
    )


def _tile(n, target, mult):
    """Largest divisor of n that is <= target and a multiple of `mult` (else n)."""
    best = None
    for d in range(1, n + 1):
        if n % d == 0 and d <= target and (d % mult == 0 or d == n):
            best = d
    return n if best is None else best


def _layernorm(x, g, b):
    mu = jnp.mean(x, axis=-1, keepdims=True)
    var = jnp.mean(jnp.square(x - mu), axis=-1, keepdims=True)
    return (x - mu) * lax.rsqrt(var + 1e-5) * g + b


@functools.lru_cache(maxsize=None)
def _tn_matmul_supported():
    """Probe whether Mosaic lowers a transposed-LHS dot_general (TN matmul)."""
    def k(a_ref, w_ref, o_ref):
        o_ref[...] = lax.dot_general(
            a_ref[...], w_ref[...], (((0,), (0,)), ((), ())),
            preferred_element_type=jnp.float32,
        ).astype(o_ref.dtype)

    try:
        a = jnp.zeros((8, 8), jnp.bfloat16)
        w = jnp.zeros((8, 8), jnp.bfloat16)
        out = pl.pallas_call(
            k, out_shape=jax.ShapeDtypeStruct((8, 8), jnp.float32)
        )(a, w)
        jax.block_until_ready(out)
        return True
    except Exception:
        return False


# ----------------------- K1: fused LayerNorm + QKV proj ----------------------
def _ln_qkv_kernel(x_ref, g_ref, b_ref, w_ref, o_ref):
    y = _layernorm(x_ref[...].astype(jnp.float32), g_ref[...], b_ref[...])
    o_ref[...] = jnp.dot(
        y.astype(jnp.bfloat16), w_ref[...], preferred_element_type=jnp.float32
    ).astype(o_ref.dtype)


def ln_qkv(x2d, gamma, beta, w_qkv_bf16, tm):
    n, c = x2d.shape
    c3 = w_qkv_bf16.shape[1]
    return pl.pallas_call(
        _ln_qkv_kernel,
        out_shape=jax.ShapeDtypeStruct((n, c3), jnp.bfloat16),
        grid=(n // tm,),
        in_specs=[
            pl.BlockSpec((tm, c), lambda i: (i, 0)),
            pl.BlockSpec((1, c), lambda i: (0, 0)),
            pl.BlockSpec((1, c), lambda i: (0, 0)),
            pl.BlockSpec((c, c3), lambda i: (0, 0)),
        ],
        out_specs=pl.BlockSpec((tm, c3), lambda i: (i, 0)),
        compiler_params=_cp(("parallel",)),
    )(x2d, gamma.reshape(1, c), beta.reshape(1, c), w_qkv_bf16)


# ---------------- K2: flash-style causal attention (kv-tiled) ----------------
def _flash_attn_kernel(q_ref, k_ref, v_ref, o_ref, m_sc, l_sc, acc_sc,
                       *, scale, tq, tk, n_head):
    qi = pl.program_id(1)
    ki = pl.program_id(2)

    @pl.when(ki == 0)
    def _init():
        m_sc[...] = jnp.full_like(m_sc, -jnp.inf)
        l_sc[...] = jnp.zeros_like(l_sc)
        acc_sc[...] = jnp.zeros_like(acc_sc)

    # Skip kv tiles that are entirely in the causal future of this q tile.
    @pl.when(ki * tk <= qi * tq + (tq - 1))
    def _compute():
        # One (tq, tk) mask shared by all heads (no (H,T,T) iotas).
        qpos = qi * tq + lax.broadcasted_iota(jnp.int32, (tq, tk), 0)
        kpos = ki * tk + lax.broadcasted_iota(jnp.int32, (tq, tk), 1)
        mask = kpos <= qpos
        for h in range(n_head):                      # static unroll, H is small
            # Fold 1/sqrt(Dh) into q (scales (tq,Dh), not (tq,tk)).
            q = (q_ref[:, h, :].astype(jnp.float32) * scale).astype(jnp.bfloat16)
            k = k_ref[:, h, :].astype(jnp.bfloat16)
            v = v_ref[:, h, :].astype(jnp.bfloat16)
            s = lax.dot_general(q, k, (((1,), (1,)), ((), ())),
                                preferred_element_type=jnp.float32)   # (tq, tk)
            s = jnp.where(mask, s, -1e30)
            m_prev = m_sc[h]                                          # (tq, 1)
            m_new = jnp.maximum(m_prev, jnp.max(s, axis=-1, keepdims=True))
            alpha = jnp.exp(m_prev - m_new)
            p = jnp.exp(s - m_new)
            l_sc[h] = alpha * l_sc[h] + jnp.sum(p, axis=-1, keepdims=True)
            acc_sc[h] = alpha * acc_sc[h] + jnp.dot(
                p.astype(jnp.bfloat16), v, preferred_element_type=jnp.float32)
            m_sc[h] = m_new

    @pl.when(ki == pl.num_programs(2) - 1)
    def _store():
        o_ref[...] = (acc_sc[...] *
                      pl.reciprocal(l_sc[...], approx=True)).astype(o_ref.dtype)


def causal_flash_attention(qkv5):
    """qkv5: (B, T, 3, H, Dh) packed qkv (bf16). Returns (B, H, T, Dh) bf16."""
    b, t, _, h, dh = qkv5.shape
    tq = _tile(t, 256, 8)
    tk = _tile(t, 256, 8)
    kernel = partial(_flash_attn_kernel, scale=1.0 / math.sqrt(dh),
                     tq=tq, tk=tk, n_head=h)
    q_spec = pl.BlockSpec((None, tq, None, h, dh), lambda bi, qi, ki: (bi, qi, 0, 0, 0))
    k_spec = pl.BlockSpec((None, tk, None, h, dh), lambda bi, qi, ki: (bi, ki, 1, 0, 0))
    v_spec = pl.BlockSpec((None, tk, None, h, dh), lambda bi, qi, ki: (bi, ki, 2, 0, 0))
    return pl.pallas_call(
        kernel,
        out_shape=jax.ShapeDtypeStruct((b, h, t, dh), jnp.bfloat16),
        grid=(b, t // tq, t // tk),
        in_specs=[q_spec, k_spec, v_spec],
        out_specs=pl.BlockSpec((None, h, tq, dh), lambda bi, qi, ki: (bi, 0, qi, 0)),
        scratch_shapes=[
            pltpu.VMEM((h, tq, 1), jnp.float32),   # running max
            pltpu.VMEM((h, tq, 1), jnp.float32),   # running denom
            pltpu.VMEM((h, tq, dh), jnp.float32),  # running numerator
        ],
        compiler_params=_cp(("parallel", "parallel", "arbitrary")),
    )(qkv5, qkv5, qkv5)


# ------------------ K3: out-projection + residual (fused quirk) --------------
def _outproj_res_kernel(a_ref, x_ref, w_ref, o_ref, *, tn_ok):
    # a_ref is a (C, tt) slab of the reference's reshape(B,C,T) quirk layout.
    if tn_ok:
        # (a^T @ w) via transposed-LHS dot_general -> no explicit XLU transpose.
        y = lax.dot_general(a_ref[...], w_ref[...], (((0,), (0,)), ((), ())),
                            preferred_element_type=jnp.float32)        # (tt, C)
    else:
        y = jnp.dot(a_ref[...].T, w_ref[...],
                    preferred_element_type=jnp.float32)
    o_ref[...] = (x_ref[...].astype(jnp.float32) + y).astype(o_ref.dtype)


def outproj_residual(attn_ct, x, w_out_bf16):
    b, c, t = attn_ct.shape
    tt = _tile(t, 512, 128)
    kernel = partial(_outproj_res_kernel, tn_ok=_tn_matmul_supported())
    return pl.pallas_call(
        kernel,
        out_shape=jax.ShapeDtypeStruct((b, t, c), x.dtype),
        grid=(b, t // tt),
        in_specs=[
            pl.BlockSpec((None, c, tt), lambda i, j: (i, 0, j)),
            pl.BlockSpec((None, tt, c), lambda i, j: (i, j, 0)),
            pl.BlockSpec((c, c), lambda i, j: (0, 0)),
        ],
        out_specs=pl.BlockSpec((None, tt, c), lambda i, j: (i, j, 0)),
        compiler_params=_cp(("parallel", "parallel")),
    )(attn_ct, x, w_out_bf16)


# -------------- K4: fused LayerNorm + (route||noise) logits ------------------
def _ln_router_kernel(x_ref, g_ref, b_ref, w_ref, bias_ref, o_ref):
    y = _layernorm(x_ref[...].astype(jnp.float32), g_ref[...], b_ref[...])
    o_ref[...] = (
        jnp.dot(y.astype(jnp.bfloat16), w_ref[...],
                preferred_element_type=jnp.float32) + bias_ref[...]
    ).astype(o_ref.dtype)


def ln_router(x2d, gamma, beta, w_rn_bf16, b_rn, tm):
    n, c = x2d.shape
    e2 = w_rn_bf16.shape[1]
    return pl.pallas_call(
        _ln_router_kernel,
        out_shape=jax.ShapeDtypeStruct((n, e2), jnp.float32),
        grid=(n // tm,),
        in_specs=[
            pl.BlockSpec((tm, c), lambda i: (i, 0)),
            pl.BlockSpec((1, c), lambda i: (0, 0)),
            pl.BlockSpec((1, c), lambda i: (0, 0)),
            pl.BlockSpec((c, e2), lambda i: (0, 0)),
            pl.BlockSpec((1, e2), lambda i: (0, 0)),
        ],
        out_specs=pl.BlockSpec((tm, e2), lambda i: (i, 0)),
        compiler_params=_cp(("parallel",)),
    )(x2d, gamma.reshape(1, c), beta.reshape(1, c), w_rn_bf16, b_rn.reshape(1, e2))


# ---------- K5: MoE (in-kernel ln2) + gated combine + residual ---------------
def _moe_kernel(x_ref, g_ref, b_ref, gate_ref, w1_ref, b1_ref, w2_ref, b2_ref,
                o_ref, h_sc, acc_sc):
    e = pl.program_id(1)

    @pl.when(e == 0)
    def _init():
        x = x_ref[...].astype(jnp.float32)
        h_sc[...] = _layernorm(x, g_ref[...], b_ref[...]).astype(h_sc.dtype)
        acc_sc[...] = x                                   # residual, f32 accum

    a = jnp.dot(h_sc[...], w1_ref[0], preferred_element_type=jnp.float32) + b1_ref[0]
    a = jnp.maximum(a, 0.0).astype(jnp.bfloat16)
    y = jnp.dot(a, w2_ref[0], preferred_element_type=jnp.float32) + b2_ref[0]
    # Select this expert's (capacity-masked) gate column via a masked reduction
    # over the small E (minor) axis — no dynamic lane slicing.
    gts = gate_ref[...]                                   # (tm, E) f32
    eids = lax.broadcasted_iota(jnp.int32, gts.shape, 1)
    gate = jnp.sum(jnp.where(eids == e, gts, 0.0), axis=1, keepdims=True)
    acc_sc[...] = acc_sc[...] + y * gate

    @pl.when(e == pl.num_programs(1) - 1)
    def _store():
        o_ref[...] = acc_sc[...].astype(o_ref.dtype)


def moe_mlp_combine(x2d, gamma2, beta2, gates, w1, b1, w2, b2, tm):
    n, c = x2d.shape
    e, _, hid = w1.shape
    return pl.pallas_call(
        _moe_kernel,
        out_shape=jax.ShapeDtypeStruct((n, c), x2d.dtype),
        grid=(n // tm, e),
        in_specs=[
            pl.BlockSpec((tm, c), lambda i, j: (i, 0)),           # x (residual)
            pl.BlockSpec((1, c), lambda i, j: (0, 0)),            # ln2 gamma
            pl.BlockSpec((1, c), lambda i, j: (0, 0)),            # ln2 beta
            pl.BlockSpec((tm, e), lambda i, j: (i, 0)),           # gates (N, E)
            pl.BlockSpec((1, c, hid), lambda i, j: (j, 0, 0)),    # w1[j] bf16
            pl.BlockSpec((1, 1, hid), lambda i, j: (j, 0, 0)),    # b1[j]
            pl.BlockSpec((1, hid, c), lambda i, j: (j, 0, 0)),    # w2[j] bf16
            pl.BlockSpec((1, 1, c), lambda i, j: (j, 0, 0)),      # b2[j]
        ],
        out_specs=pl.BlockSpec((tm, c), lambda i, j: (i, 0)),
        scratch_shapes=[
            pltpu.VMEM((tm, c), jnp.bfloat16),   # ln2(x), held across experts
            pltpu.VMEM((tm, c), jnp.float32),    # residual + MoE accumulator
        ],
        compiler_params=_cp(("parallel", "arbitrary")),
    )(x2d, gamma2.reshape(1, c), beta2.reshape(1, c), gates, w1, b1, w2, b2)


# --------------------------------- Parameters ---------------------------------
def init_params(key, n_embed, num_experts):
    std = 0.02
    ks = jax.random.split(key, 6)
    hid = 4 * n_embed
    return {
        "ln1_g": jnp.ones((n_embed,), jnp.float32),
        "ln1_b": jnp.zeros((n_embed,), jnp.float32),
        "ln2_g": jnp.ones((n_embed,), jnp.float32),
        "ln2_b": jnp.zeros((n_embed,), jnp.float32),
        # dense weights stored as (in_features, out_features) == torch weight.T
        "w_qkv": jax.random.normal(ks[0], (n_embed, 3 * n_embed), jnp.float32) * std,
        "w_out": jax.random.normal(ks[1], (n_embed, n_embed), jnp.float32) * std,
        "w_route": jax.random.normal(ks[2], (n_embed, num_experts), jnp.float32) * std,
        "b_route": jnp.zeros((num_experts,), jnp.float32),
        "w_noise": jax.random.normal(ks[3], (n_embed, num_experts), jnp.float32) * std,
        "b_noise": jnp.zeros((num_experts,), jnp.float32),
        # experts stacked: (E, C, 4C), (E, 1, 4C), (E, 4C, C), (E, 1, C)
        "w1": jax.random.normal(ks[4], (num_experts, n_embed, hid), jnp.float32) * std,
        "b1": jnp.zeros((num_experts, 1, hid), jnp.float32),
        "w2": jax.random.normal(ks[5], (num_experts, hid, n_embed), jnp.float32) * std,
        "b2": jnp.zeros((num_experts, 1, n_embed), jnp.float32),
    }


# -------------------------------- Block forward --------------------------------
def block_forward(params, x, noise_key, n_head, num_experts, top_k,
                  capacity_factor=1.0):
    b, t, c = x.shape
    dh = c // n_head
    n = b * t
    tm = _tile(n, 512, 8)

    # bf16 copies of the large matmul weights (MXU-native on v5e/v6e/v7x,
    # halves weight HBM/VMEM traffic). LN/bias params stay f32.
    w_qkv = params["w_qkv"].astype(jnp.bfloat16)
    w_out = params["w_out"].astype(jnp.bfloat16)
    w_rn = jnp.concatenate([params["w_route"], params["w_noise"]],
                           axis=1).astype(jnp.bfloat16)             # (C, 2E)
    b_rn = jnp.concatenate([params["b_route"], params["b_noise"]], axis=0)
    w1 = params["w1"].astype(jnp.bfloat16)
    w2 = params["w2"].astype(jnp.bfloat16)

    # --- x = x + out_proj(attention(ln1(x))) ---
    qkv = ln_qkv(x.reshape(n, c), params["ln1_g"], params["ln1_b"], w_qkv, tm)
    qkv5 = qkv.reshape(b, t, 3, n_head, dh)       # free reinterpretation, no HBM transpose
    attn = causal_flash_attention(qkv5)            # (B, H, T, Dh) bf16
    # free reinterpretation == the reference's reshape(B, C, T) quirk
    attn_ct = attn.reshape(b, c, t)
    x = outproj_residual(attn_ct, x, w_out)        # (B, T, C) f32

    # --- x = x + smoe(ln2(x)) ---
    x2 = x.reshape(n, c)
    rl = ln_router(x2, params["ln2_g"], params["ln2_b"], w_rn, b_rn, tm)  # (N, 2E)
    logits, noise_logits = rl[:, :num_experts], rl[:, num_experts:]

    # Noisy top-k routing on small (N, E) tensors (plain JAX glue).
    # TODO(synk): torch.randn_like cannot be bit-matched; deterministic jax PRNG used.
    noise = jax.random.normal(noise_key, logits.shape, logits.dtype) * \
        jax.nn.softplus(noise_logits)
    noisy = logits + noise
    _, top_idx = lax.top_k(noisy, top_k)                               # (N, k)
    topk_mask = jnp.any(
        top_idx[..., None] == jnp.arange(num_experts)[None, None, :], axis=-2)
    sparse_logits = jnp.where(topk_mask, noisy, -jnp.inf)
    router_output = jax.nn.softmax(sparse_logits, axis=-1)             # (N, E)

    # first-in-flat-order capacity cut, matching torch.nonzero()[:capacity]
    expert_capacity = int(n * top_k / num_experts * capacity_factor)
    counts = jnp.cumsum(topk_mask.astype(jnp.int32), axis=0)
    keep = topk_mask & (counts <= expert_capacity)
    gates = router_output * keep.astype(router_output.dtype)           # (N, E)

    out2 = moe_mlp_combine(x2, params["ln2_g"], params["ln2_b"], gates,
                           w1, params["b1"], w2, params["b2"], tm)     # (N, C)
    x = out2.reshape(b, t, c)

    entropy_loss = None   # training-only in the reference; eval -> None
    return x, entropy_loss


if __name__ == "__main__":
    n_embed, n_head, num_experts, top_k = 32, 4, 4, 2
    B, T = 2, 8
    key = jax.random.PRNGKey(0)
    pk, xk, nk = jax.random.split(key, 3)

    params = init_params(pk, n_embed, num_experts)
    x = jax.random.normal(xk, (B, T, n_embed), jnp.float32)

    fwd = jax.jit(partial(block_forward, n_head=n_head, num_experts=num_experts,
                          top_k=top_k, capacity_factor=1.0))
    out, entropy_loss = fwd(params, x, nk)
    out = jax.block_until_ready(out)
    assert out.shape == (B, T, n_embed)
    assert bool(jnp.all(jnp.isfinite(out)))
    print("KERNEL_OK")
</pallas_src>

<mosaic_0001>
module attributes {stable_mosaic.version = 11 : i64} {
  func.func @_ln_qkv_kernel(%arg0: i32, %arg1: memref<16x32xf32, #tpu.memory_space<vmem>>, %arg2: memref<1x32xf32, #tpu.memory_space<vmem>>, %arg3: memref<1x32xf32, #tpu.memory_space<vmem>>, %arg4: memref<32x96xbf16, #tpu.memory_space<vmem>>, %arg5: memref<16x96xbf16, #tpu.memory_space<vmem>>) attributes {dimension_semantics = [#tpu.dimension_semantics<parallel>], iteration_bounds = array<i64: 1>, scalar_prefetch = 0 : i64, scratch_operands = 0 : i64, tpu.core_type = #tpu.core_type<tc>, window_params = [{transform_indices = @transform_0, window_bounds = array<i64: 16, 32>}, {pipeline_mode = #tpu.pipeline_mode<synchronous>, transform_indices = @transform_1, window_bounds = array<i64: 1, 32>}, {pipeline_mode = #tpu.pipeline_mode<synchronous>, transform_indices = @transform_2, window_bounds = array<i64: 1, 32>}, {pipeline_mode = #tpu.pipeline_mode<synchronous>, transform_indices = @transform_3, window_bounds = array<i64: 32, 96>}, {transform_indices = @transform_4, window_bounds = array<i64: 16, 96>}]} {
    %c0 = arith.constant 0 : index
    %c0_0 = arith.constant 0 : index
    %0 = vector.load %arg1[%c0, %c0_0] : memref<16x32xf32, #tpu.memory_space<vmem>>, vector<16x32xf32>
    %c0_1 = arith.constant 0 : index
    %c0_2 = arith.constant 0 : index
    %1 = vector.load %arg2[%c0_1, %c0_2] : memref<1x32xf32, #tpu.memory_space<vmem>>, vector<1x32xf32>
    %c0_3 = arith.constant 0 : index
    %c0_4 = arith.constant 0 : index
    %2 = vector.load %arg3[%c0_3, %c0_4] : memref<1x32xf32, #tpu.memory_space<vmem>>, vector<1x32xf32>
    %cst = arith.constant dense<0.000000e+00> : vector<16xf32>
    %3 = vector.multi_reduction <add>, %0, %cst [1] : vector<16x32xf32> to vector<16xf32>
    %4 = vector.shape_cast %3 : vector<16xf32> to vector<16x1xf32>
    %cst_5 = arith.constant 3.200000e+01 : f32
    %5 = vector.broadcast %cst_5 : f32 to vector<16x1xf32>
    %6 = arith.divf %4, %5 : vector<16x1xf32>
    %7 = vector.broadcast %6 : vector<16x1xf32> to vector<16x32xf32>
    %8 = arith.subf %0, %7 : vector<16x32xf32>
    %9 = arith.mulf %8, %8 : vector<16x32xf32>
    %cst_6 = arith.constant dense<0.000000e+00> : vector<16xf32>
    %10 = vector.multi_reduction <add>, %9, %cst_6 [1] : vector<16x32xf32> to vector<16xf32>
    %11 = vector.shape_cast %10 : vector<16xf32> to vector<16x1xf32>
    %cst_7 = arith.constant 3.200000e+01 : f32
    %12 = vector.broadcast %cst_7 : f32 to vector<16x1xf32>
    %13 = arith.divf %11, %12 : vector<16x1xf32>
    %14 = vector.broadcast %6 : vector<16x1xf32> to vector<16x32xf32>
    %15 = arith.subf %0, %14 : vector<16x32xf32>
    %cst_8 = arith.constant 9.99999974E-6 : f32
    %16 = vector.broadcast %cst_8 : f32 to vector<16x1xf32>
    %17 = arith.addf %13, %16 : vector<16x1xf32>
    %18 = math.rsqrt %17 : vector<16x1xf32>
    %19 = vector.broadcast %18 : vector<16x1xf32> to vector<16x32xf32>
    %20 = arith.mulf %15, %19 : vector<16x32xf32>
    %21 = vector.broadcast %1 : vector<1x32xf32> to vector<16x32xf32>
    %22 = arith.mulf %20, %21 : vector<16x32xf32>
    %23 = vector.broadcast %2 : vector<1x32xf32> to vector<16x32xf32>
    %24 = arith.addf %22, %23 : vector<16x32xf32>
    %25 = arith.truncf %24 : vector<16x32xf32> to vector<16x32xbf16>
    %c0_9 = arith.constant 0 : index
    %c0_10 = arith.constant 0 : index
    %26 = vector.load %arg4[%c0_9, %c0_10] : memref<32x96xbf16, #tpu.memory_space<vmem>>, vector<32x96xbf16>
    %cst_11 = arith.constant dense<0.000000e+00> : vector<16x96xf32>
    %27 = tpu.matmul %25, %26, %cst_11 {dimension_numbers = #tpu.dot_dimension_numbers<[1], [0], [0], [1], [0, 0, 1, 1], [], []>} : vector<16x32xbf16>, vector<32x96xbf16>, vector<16x96xf32> -> vector<16x96xf32>
    %28 = arith.truncf %27 : vector<16x96xf32> to vector<16x96xbf16>
    %c0_12 = arith.constant 0 : index
    %c0_13 = arith.constant 0 : index
    %29 = vector.load %arg5[%c0_12, %c0_13] : memref<16x96xbf16, #tpu.memory_space<vmem>>, vector<16x96xbf16>
    tpu.vector_store %arg5[%c0_12, %c0_13], %28 {strides = array<i32>} : memref<16x96xbf16, #tpu.memory_space<vmem>>, vector<16x96xbf16>,
    return
  }
  func.func @transform_0(%arg0: i32) -> (i32, i32) {
    %c0_i32 = arith.constant 0 : i32
    %c0_i32_0 = arith.constant 0 : i32
    return %arg0, %c0_i32 : i32, i32
  }
  func.func @transform_1(%arg0: i32) -> (i32, i32) {
    %c0_i32 = arith.constant 0 : i32
    %c0_i32_0 = arith.constant 0 : i32
    %c0_i32_1 = arith.constant 0 : i32
    return %c0_i32, %c0_i32_0 : i32, i32
  }
  func.func @transform_2(%arg0: i32) -> (i32, i32) {
    %c0_i32 = arith.constant 0 : i32
    %c0_i32_0 = arith.constant 0 : i32
    %c0_i32_1 = arith.constant 0 : i32
    return %c0_i32, %c0_i32_0 : i32, i32
  }
  func.func @transform_3(%arg0: i32) -> (i32, i32) {
    %c0_i32 = arith.constant 0 : i32
    %c0_i32_0 = arith.constant 0 : i32
    %c0_i32_1 = arith.constant 0 : i32
    return %c0_i32, %c0_i32_0 : i32, i32
  }
  func.func @transform_4(%arg0: i32) -> (i32, i32) {
    %c0_i32 = arith.constant 0 : i32
    %c0_i32_0 = arith.constant 0 : i32
    return %arg0, %c0_i32 : i32, i32
  }
}

module attributes {stable_mosaic.version = 11 : i64} {
  func.func @_outproj_res_kernel(%arg0: i32, %arg1: i32, %arg2: memref<1x32x8xbf16, #tpu.memory_space<vmem>>, %arg3: memref<1x8x32xf32, #tpu.memory_space<vmem>>, %arg4: memref<32x32xbf16, #tpu.memory_space<vmem>>, %arg5: memref<1x8x32xf32, #tpu.memory_space<vmem>>) attributes {dimension_semantics = [#tpu.dimension_semantics<parallel>, #tpu.dimension_semantics<parallel>], iteration_bounds = array<i64: 2, 1>, scalar_prefetch = 0 : i64, scratch_operands = 0 : i64, tpu.core_type = #tpu.core_type<tc>, window_params = [{transform_indices = @transform_0, window_bounds = array<i64: 1, 32, 8>}, {transform_indices = @transform_1, window_bounds = array<i64: 1, 8, 32>}, {pipeline_mode = #tpu.pipeline_mode<synchronous>, transform_indices = @transform_2, window_bounds = array<i64: 32, 32>}, {transform_indices = @transform_3, window_bounds = array<i64: 1, 8, 32>}]} {
    %c0 = arith.constant 0 : index
    %c0_0 = arith.constant 0 : index
    %c0_1 = arith.constant 0 : index
    %0 = vector.load %arg2[%c0, %c0_0, %c0_1] : memref<1x32x8xbf16, #tpu.memory_space<vmem>>, vector<1x32x8xbf16>
    %1 = vector.shape_cast %0 : vector<1x32x8xbf16> to vector<32x8xbf16>
    %c0_2 = arith.constant 0 : index
    %c0_3 = arith.constant 0 : index
    %2 = vector.load %arg4[%c0_2, %c0_3] : memref<32x32xbf16, #tpu.memory_space<vmem>>, vector<32x32xbf16>
    %cst = arith.constant dense<0.000000e+00> : vector<8x32xf32>
    %3 = tpu.matmul %1, %2, %cst {dimension_numbers = #tpu.dot_dimension_numbers<[0], [0], [1], [1], [0, 1, 1, 1], [], []>} : vector<32x8xbf16>, vector<32x32xbf16>, vector<8x32xf32> -> vector<8x32xf32>
    %c0_4 = arith.constant 0 : index
    %c0_5 = arith.constant 0 : index
    %c0_6 = arith.constant 0 : index
    %4 = vector.load %arg3[%c0_4, %c0_5, %c0_6] : memref<1x8x32xf32, #tpu.memory_space<vmem>>, vector<1x8x32xf32>
    %5 = vector.shape_cast %4 : vector<1x8x32xf32> to vector<8x32xf32>
    %6 = arith.addf %5, %3 : vector<8x32xf32>
    %c0_7 = arith.constant 0 : index
    %c0_8 = arith.constant 0 : index
    %c0_9 = arith.constant 0 : index
    %7 = vector.load %arg5[%c0_7, %c0_8, %c0_9] : memref<1x8x32xf32, #tpu.memory_space<vmem>>, vector<1x8x32xf32>
    %8 = vector.shape_cast %7 : vector<1x8x32xf32> to vector<8x32xf32>
    %9 = vector.shape_cast %6 : vector<8x32xf32> to vector<1x8x32xf32>
    tpu.vector_store %arg5[%c0_7, %c0_8, %c0_9], %9 {strides = array<i32>} : memref<1x8x32xf32, #tpu.memory_space<vmem>>, vector<1x8x32xf32>,
    return
  }
  func.func @transform_0(%arg0: i32, %arg1: i32) -> (i32, i32, i32) {
    %c0_i32 = arith.constant 0 : i32
    %c0_i32_0 = arith.constant 0 : i32
    return %arg0, %c0_i32, %arg1 : i32, i32, i32
  }
  func.func @transform_1(%arg0: i32, %arg1: i32) -> (i32, i32, i32) {
    %c0_i32 = arith.constant 0 : i32
    %c0_i32_0 = arith.constant 0 : i32
    return %arg0, %arg1, %c0_i32 : i32, i32, i32
  }
  func.func @transform_2(%arg0: i32, %arg1: i32) -> (i32, i32) {
    %c0_i32 = arith.constant 0 : i32
    %c0_i32_0 = arith.constant 0 : i32
    %c0_i32_1 = arith.constant 0 : i32
    return %c0_i32, %c0_i32_0 : i32, i32
  }
  func.func @transform_3(%arg0: i32, %arg1: i32) -> (i32, i32, i32) {
    %c0_i32 = arith.constant 0 : i32
    %c0_i32_0 = arith.constant 0 : i32
    return %arg0, %arg1, %c0_i32 : i32, i32, i32
  }
}

module attributes {stable_mosaic.version = 11 : i64} {
  func.func @_flash_attn_kernel(%arg0: i32, %arg1: i32, %arg2: i32, %arg3: memref<1x8x1x4x8xbf16, #tpu.memory_space<vmem>>, %arg4: memref<1x8x1x4x8xbf16, #tpu.memory_space<vmem>>, %arg5: memref<1x8x1x4x8xbf16, #tpu.memory_space<vmem>>, %arg6: memref<1x4x8x8xbf16, #tpu.memory_space<vmem>>, %arg7: memref<4x8x1xf32, #tpu.memory_space<vmem>>, %arg8: memref<4x8x1xf32, #tpu.memory_space<vmem>>, %arg9: memref<4x8x8xf32, #tpu.memory_space<vmem>>) attributes {dimension_semantics = [#tpu.dimension_semantics<parallel>, #tpu.dimension_semantics<parallel>, #tpu.dimension_semantics<arbitrary>], iteration_bounds = array<i64: 2, 1, 1>, scalar_prefetch = 0 : i64, scratch_operands = 3 : i64, tpu.core_type = #tpu.core_type<tc>, window_params = [{transform_indices = @transform_0, window_bounds = array<i64: 1, 8, 1, 4, 8>}, {transform_indices = @transform_1, window_bounds = array<i64: 1, 8, 1, 4, 8>}, {transform_indices = @transform_2, window_bounds = array<i64: 1, 8, 1, 4, 8>}, {transform_indices = @transform_3, window_bounds = array<i64: 1, 4, 8, 8>}]} {
    %c0_i32 = arith.constant 0 : i32
    %0 = arith.cmpi eq, %arg2, %c0_i32 : i32
    %1 = arith.extui %0 : i1 to i32
    %c0_i32_0 = arith.constant 0 : i32
    %2 = arith.cmpi ne, %1, %c0_i32_0 : i32
    scf.if %2 {
      %cst = arith.constant 0xFF800000 : f32
      %12 = vector.broadcast %cst : f32 to vector<4x8x1xf32>
      %c0 = arith.constant 0 : index
      %c0_5 = arith.constant 0 : index
      %c0_6 = arith.constant 0 : index
      %13 = vector.load %arg7[%c0, %c0_5, %c0_6] : memref<4x8x1xf32, #tpu.memory_space<vmem>>, vector<4x8x1xf32>
      tpu.vector_store %arg7[%c0, %c0_5, %c0_6], %12 {strides = array<i32>} : memref<4x8x1xf32, #tpu.memory_space<vmem>>, vector<4x8x1xf32>,
      %cst_7 = arith.constant 0.000000e+00 : f32
      %14 = vector.broadcast %cst_7 : f32 to vector<4x8x1xf32>
      %c0_8 = arith.constant 0 : index
      %c0_9 = arith.constant 0 : index
      %c0_10 = arith.constant 0 : index
      %15 = vector.load %arg8[%c0_8, %c0_9, %c0_10] : memref<4x8x1xf32, #tpu.memory_space<vmem>>, vector<4x8x1xf32>
      tpu.vector_store %arg8[%c0_8, %c0_9, %c0_10], %14 {strides = array<i32>} : memref<4x8x1xf32, #tpu.memory_space<vmem>>, vector<4x8x1xf32>,
      %cst_11 = arith.constant 0.000000e+00 : f32
      %16 = vector.broadcast %cst_11 : f32 to vector<4x8x8xf32>
      %c0_12 = arith.constant 0 : index
      %c0_13 = arith.constant 0 : index
      %c0_14 = arith.constant 0 : index
      %17 = vector.load %arg9[%c0_12, %c0_13, %c0_14] : memref<4x8x8xf32, #tpu.memory_space<vmem>>, vector<4x8x8xf32>
      tpu.vector_store %arg9[%c0_12, %c0_13, %c0_14], %16 {strides = array<i32>} : memref<4x8x8xf32, #tpu.memory_space<vmem>>, vector<4x8x8xf32>,
    } else {
    }
    %c8_i32 = arith.constant 8 : i32
    %3 = arith.muli %arg2, %c8_i32 : i32
    %c8_i32_1 = arith.constant 8 : i32
    %4 = arith.muli %arg1, %c8_i32_1 : i32
    %c7_i32 = arith.constant 7 : i32
    %5 = arith.addi %4, %c7_i32 : i32
    %6 = arith.cmpi sle, %3, %5 : i32
    %7 = arith.extui %6 : i1 to i32
    %c0_i32_2 = arith.constant 0 : i32
    %8 = arith.cmpi ne, %7, %c0_i32_2 : i32
    scf.if %8 {
      %c8_i32_5 = arith.constant 8 : i32
      %12 = arith.muli %arg1, %c8_i32_5 : i32
      %13 = tpu.iota {dimensions = array<i32: 0>} : vector<8x8xi32>
      %14 = vector.broadcast %12 : i32 to vector<8x8xi32>
      %15 = arith.addi %14, %13 : vector<8x8xi32>
      %c8_i32_6 = arith.constant 8 : i32
      %16 = arith.muli %arg2, %c8_i32_6 : i32
      %17 = tpu.iota {dimensions = array<i32: 1>} : vector<8x8xi32>
      %18 = vector.broadcast %16 : i32 to vector<8x8xi32>
      %19 = arith.addi %18, %17 : vector<8x8xi32>
      %20 = arith.cmpi sle, %19, %15 : vector<8x8xi32>
      %c0 = arith.constant 0 : index
      %c0_7 = arith.constant 0 : index
      %c0_8 = arith.constant 0 : index
      %c0_9 = arith.constant 0 : index
      %c0_10 = arith.constant 0 : index
      %21 = vector.load %arg3[%c0, %c0_7, %c0_8, %c0_9, %c0_10] : memref<1x8x1x4x8xbf16, #tpu.memory_space<vmem>>, vector<1x8x1x1x8xbf16>
      %22 = vector.shape_cast %21 : vector<1x8x1x1x8xbf16> to vector<8x8xbf16>
      %23 = arith.extf %22 : vector<8x8xbf16> to vector<8x8xf32>
      %cst = arith.constant 0.353553385 : f32
      %24 = vector.broadcast %cst : f32 to vector<8x8xf32>
      %25 = arith.mulf %23, %24 : vector<8x8xf32>
      %26 = arith.truncf %25 : vector<8x8xf32> to vector<8x8xbf16>
      %c0_11 = arith.constant 0 : index
      %c0_12 = arith.constant 0 : index
      %c0_13 = arith.constant 0 : index
      %c0_14 = arith.constant 0 : index
      %c0_15 = arith.constant 0 : index
      %27 = vector.load %arg4[%c0_11, %c0_12, %c0_13, %c0_14, %c0_15] : memref<1x8x1x4x8xbf16, #tpu.memory_space<vmem>>, vector<1x8x1x1x8xbf16>
      %28 = vector.shape_cast %27 : vector<1x8x1x1x8xbf16> to vector<8x8xbf16>
      %c0_16 = arith.constant 0 : index
      %c0_17 = arith.constant 0 : index
      %c0_18 = arith.constant 0 : index
      %c0_19 = arith.constant 0 : index
      %c0_20 = arith.constant 0 : index
      %29 = vector.load %arg5[%c0_16, %c0_17, %c0_18, %c0_19, %c0_20] : memref<1x8x1x4x8xbf16, #tpu.memory_space<vmem>>, vector<1x8x1x1x8xbf16>
      %30 = vector.shape_cast %29 : vector<1x8x1x1x8xbf16> to vector<8x8xbf16>
      %cst_21 = arith.constant dense<0.000000e+00> : vector<8x8xf32>
      %31 = tpu.matmul %26, %28, %cst_21 {dimension_numbers = #tpu.dot_dimension_numbers<[1], [1], [0], [0], [0, 0, 1, 0], [], []>} : vector<8x8xbf16>, vector<8x8xbf16>, vector<8x8xf32> -> vector<8x8xf32>
      %cst_22 = arith.constant -1.000000e+30 : f32
      %32 = vector.broadcast %cst_22 : f32 to vector<8x8xf32>
      %33 = arith.select %20, %31, %32 : vector<8x8xi1>, vector<8x8xf32>
      %c0_23 = arith.constant 0 : index
      %c0_24 = arith.constant 0 : index
      %c0_25 = arith.constant 0 : index
      %34 = vector.load %arg7[%c0_23, %c0_24, %c0_25] : memref<4x8x1xf32, #tpu.memory_space<vmem>>, vector<1x8x1xf32>
      %35 = vector.shape_cast %34 : vector<1x8x1xf32> to vector<8x1xf32>
      %cst_26 = arith.constant dense<0xFF800000> : vector<8xf32>
      %36 = vector.multi_reduction <maximumf>, %33, %cst_26 [1] : vector<8x8xf32> to vector<8xf32>
      %37 = vector.shape_cast %36 : vector<8xf32> to vector<8x1xf32>
      %38 = arith.maximumf %35, %37 : vector<8x1xf32>
      %39 = arith.subf %35, %38 : vector<8x1xf32>
      %40 = math.exp %39 : vector<8x1xf32>
      %41 = vector.broadcast %38 : vector<8x1xf32> to vector<8x8xf32>
      %42 = arith.subf %33, %41 : vector<8x8xf32>
      %43 = math.exp %42 : vector<8x8xf32>
      %c0_27 = arith.constant 0 : index
      %c0_28 = arith.constant 0 : index
      %c0_29 = arith.constant 0 : index
      %44 = vector.load %arg8[%c0_27, %c0_28, %c0_29] : memref<4x8x1xf32, #tpu.memory_space<vmem>>, vector<1x8x1xf32>
      %45 = vector.shape_cast %44 : vector<1x8x1xf32> to vector<8x1xf32>
      %46 = arith.mulf %40, %45 : vector<8x1xf32>
      %cst_30 = arith.constant dense<0.000000e+00> : vector<8xf32>
      %47 = vector.multi_reduction <add>, %43, %cst_30 [1] : vector<8x8xf32> to vector<8xf32>
      %48 = vector.shape_cast %47 : vector<8xf32> to vector<8x1xf32>
      %49 = arith.addf %46, %48 : vector<8x1xf32>
      %c0_31 = arith.constant 0 : index
      %c0_32 = arith.constant 0 : index
      %c0_33 = arith.constant 0 : index
      %50 = vector.load %arg8[%c0_31, %c0_32, %c0_33] : memref<4x8x1xf32, #tpu.memory_space<vmem>>, vector<1x8x1xf32>
      %51 = vector.shape_cast %50 : vector<1x8x1xf32> to vector<8x1xf32>
      %52 = vector.shape_cast %49 : vector<8x1xf32> to vector<1x8x1xf32>
      tpu.vector_store %arg8[%c0_31, %c0_32, %c0_33], %52 {strides = array<i32>} : memref<4x8x1xf32, #tpu.memory_space<vmem>>, vector<1x8x1xf32>,
      %c0_34 = arith.constant 0 : index
      %c0_35 = arith.constant 0 : index
      %c0_36 = arith.constant 0 : index
      %53 = vector.load %arg9[%c0_34, %c0_35, %c0_36] : memref<4x8x8xf32, #tpu.memory_space<vmem>>, vector<1x8x8xf32>
      %54 = vector.shape_cast %53 : vector<1x8x8xf32> to vector<8x8xf32>
      %55 = vector.broadcast %40 : vector<8x1xf32> to vector<8x8xf32>
      %56 = arith.mulf %55, %54 : vector<8x8xf32>
      %57 = arith.truncf %43 : vector<8x8xf32> to vector<8x8xbf16>
      %cst_37 = arith.constant dense<0.000000e+00> : vector<8x8xf32>
      %58 = tpu.matmul %57, %30, %cst_37 {dimension_numbers = #tpu.dot_dimension_numbers<[1], [0], [0], [1], [0, 0, 1, 1], [], []>} : vector<8x8xbf16>, vector<8x8xbf16>, vector<8x8xf32> -> vector<8x8xf32>
      %59 = arith.addf %56, %58 : vector<8x8xf32>
      %c0_38 = arith.constant 0 : index
      %c0_39 = arith.constant 0 : index
      %c0_40 = arith.constant 0 : index
      %60 = vector.load %arg9[%c0_38, %c0_39, %c0_40] : memref<4x8x8xf32, #tpu.memory_space<vmem>>, vector<1x8x8xf32>
      %61 = vector.shape_cast %60 : vector<1x8x8xf32> to vector<8x8xf32>
      %62 = vector.shape_cast %59 : vector<8x8xf32> to vector<1x8x8xf32>
      tpu.vector_store %arg9[%c0_38, %c0_39, %c0_40], %62 {strides = array<i32>} : memref<4x8x8xf32, #tpu.memory_space<vmem>>, vector<1x8x8xf32>,
      %c0_41 = arith.constant 0 : index
      %c0_42 = arith.constant 0 : index
      %c0_43 = arith.constant 0 : index
      %63 = vector.load %arg7[%c0_41, %c0_42, %c0_43] : memref<4x8x1xf32, #tpu.memory_space<vmem>>, vector<1x8x1xf32>
      %64 = vector.shape_cast %63 : vector<1x8x1xf32> to vector<8x1xf32>
      %65 = vector.shape_cast %38 : vector<8x1xf32> to vector<1x8x1xf32>
      tpu.vector_store %arg7[%c0_41, %c0_42, %c0_43], %65 {strides = array<i32>} : memref<4x8x1xf32, #tpu.memory_space<vmem>>, vector<1x8x1xf32>,
      %c0_44 = arith.constant 0 : index
      %c0_45 = arith.constant 0 : index
      %c0_46 = arith.constant 0 : index
      %c1 = arith.constant 1 : index
      %c0_47 = arith.constant 0 : index
      %66 = vector.load %arg3[%c0_44, %c0_45, %c0_46, %c1, %c0_47] : memref<1x8x1x4x8xbf16, #tpu.memory_space<vmem>>, vector<1x8x1x1x8xbf16>
      %67 = vector.shape_cast %66 : vector<1x8x1x1x8xbf16> to vector<8x8xbf16>
      %68 = arith.extf %67 : vector<8x8xbf16> to vector<8x8xf32>
      %cst_48 = arith.constant 0.353553385 : f32
      %69 = vector.broadcast %cst_48 : f32 to vector<8x8xf32>
      %70 = arith.mulf %68, %69 : vector<8x8xf32>
      %71 = arith.truncf %70 : vector<8x8xf32> to vector<8x8xbf16>
      %c0_49 = arith.constant 0 : index
      %c0_50 = arith.constant 0 : index
      %c0_51 = arith.constant 0 : index
      %c1_52 = arith.constant 1 : index
      %c0_53 = arith.constant 0 : index
      %72 = vector.load %arg4[%c0_49, %c0_50, %c0_51, %c1_52, %c0_53] : memref<1x8x1x4x8xbf16, #tpu.memory_space<vmem>>, vector<1x8x1x1x8xbf16>
      %73 = vector.shape_cast %72 : vector<1x8x1x1x8xbf16> to vector<8x8xbf16>
      %c0_54 = arith.constant 0 : index
      %c0_55 = arith.constant 0 : index
      %c0_56 = arith.constant 0 : index
      %c1_57 = arith.constant 1 : index
      %c0_58 = arith.constant 0 : index
      %74 = vector.load %arg5[%c0_54, %c0_55, %c0_56, %c1_57, %c0_58] : memref<1x8x1x4x8xbf16, #tpu.memory_space<vmem>>, vector<1x8x1x1x8xbf16>
      %75 = vector.shape_cast %74 : vector<1x8x1x1x8xbf16> to vector<8x8xbf16>
      %cst_59 = arith.constant dense<0.000000e+00> : vector<8x8xf32>
      %76 = tpu.matmul %71, %73, %cst_59 {dimension_numbers = #tpu.dot_dimension_numbers<[1], [1], [0], [0], [0, 0, 1, 0], [], []>} : vector<8x8xbf16>, vector<8x8xbf16>, vector<8x8xf32> -> vector<8x8xf32>
      %cst_60 = arith.constant -1.000000e+30 : f32
      %77 = vector.broadcast %cst_60 : f32 to vector<8x8xf32>
      %78 = arith.select %20, %76, %77 : vector<8x8xi1>, vector<8x8xf32>
      %c1_61 = arith.constant 1 : index
      %c0_62 = arith.constant 0 : index
      %c0_63 = arith.constant 0 : index
      %79 = vector.load %arg7[%c1_61, %c0_62, %c0_63] : memref<4x8x1xf32, #tpu.memory_space<vmem>>, vector<1x8x1xf32>
      %80 = vector.shape_cast %79 : vector<1x8x1xf32> to vector<8x1xf32>
      %cst_64 = arith.constant dense<0xFF800000> : vector<8xf32>
      %81 = vector.multi_reduction <maximumf>, %78, %cst_64 [1] : vector<8x8xf32> to vector<8xf32>
      %82 = vector.shape_cast %81 : vector<8xf32> to vector<8x1xf32>
      %83 = arith.maximumf %80, %82 : vector<8x1xf32>
      %84 = arith.subf %80, %83 : vector<8x1xf32>
      %85 = math.exp %84 : vector<8x1xf32>
      %86 = vector.broadcast %83 : vector<8x1xf32> to vector<8x8xf32>
      %87 = arith.subf %78, %86 : vector<8x8xf32>
      %88 = math.exp %87 : vector<8x8xf32>
      %c1_65 = arith.constant 1 : index
      %c0_66 = arith.constant 0 : index
      %c0_67 = arith.constant 0 : index
      %89 = vector.load %arg8[%c1_65, %c0_66, %c0_67] : memref<4x8x1xf32, #tpu.memory_space<vmem>>, vector<1x8x1xf32>
      %90 = vector.shape_cast %89 : vector<1x8x1xf32> to vector<8x1xf32>
      %91 = arith.mulf %85, %90 : vector<8x1xf32>
      %cst_68 = arith.constant dense<0.000000e+00> : vector<8xf32>
      %92 = vector.multi_reduction <add>, %88, %cst_68 [1] : vector<8x8xf32> to vector<8xf32>
      %93 = vector.shape_cast %92 : vector<8xf32> to vector<8x1xf32>
      %94 = arith.addf %91, %93 : vector<8x1xf32>
      %c1_69 = arith.constant 1 : index
      %c0_70 = arith.constant 0 : index
      %c0_71 = arith.constant 0 : index
      %95 = vector.load %arg8[%c1_69, %c0_70, %c0_71] : memref<4x8x1xf32, #tpu.memory_space<vmem>>, vector<1x8x1xf32>
      %96 = vector.shape_cast %95 : vector<1x8x1xf32> to vector<8x1xf32>
      %97 = vector.shape_cast %94 : vector<8x1xf32> to vector<1x8x1xf32>
      tpu.vector_store %arg8[%c1_69, %c0_70, %c0_71], %97 {strides = array<i32>} : memref<4x8x1xf32, #tpu.memory_space<vmem>>, vector<1x8x1xf32>,
      %c1_72 = arith.constant 1 : index
      %c0_73 = arith.constant 0 : index
      %c0_74 = arith.constant 0 : index
      %98 = vector.load %arg9[%c1_72, %c0_73, %c0_74] : memref<4x8x8xf32, #tpu.memory_space<vmem>>, vector<1x8x8xf32>
      %99 = vector.shape_cast %98 : vector<1x8x8xf32> to vector<8x8xf32>
      %100 = vector.broadcast %85 : vector<8x1xf32> to vector<8x8xf32>
      %101 = arith.mulf %100, %99 : vector<8x8xf32>
      %102 = arith.truncf %88 : vector<8x8xf32> to vector<8x8xbf16>
      %cst_75 = arith.constant dense<0.000000e+00> : vector<8x8xf32>
      %103 = tpu.matmul %102, %75, %cst_75 {dimension_numbers = #tpu.dot_dimension_numbers<[1], [0], [0], [1], [0, 0, 1, 1], [], []>} : vector<8x8xbf16>, vector<8x8xbf16>, vector<8x8xf32> -> vector<8x8xf32>
      %104 = arith.addf %101, %103 : vector<8x8xf32>
      %c1_76 = arith.constant 1 : index
      %c0_77 = arith.constant 0 : index
      %c0_78 = arith.constant 0 : index
      %105 = vector.load %arg9[%c1_76, %c0_77, %c0_78] : memref<4x8x8xf32, #tpu.memory_space<vmem>>, vector<1x8x8xf32>
      %106 = vector.shape_cast %105 : vector<1x8x8xf32> to vector<8x8xf32>
      %107 = vector.shape_cast %104 : vector<8x8xf32> to vector<1x8x8xf32>
      tpu.vector_store %arg9[%c1_76, %c0_77, %c0_78], %107 {strides = array<i32>} : memref<4x8x8xf32, #tpu.memory_space<vmem>>, vector<1x8x8xf32>,
      %c1_79 = arith.constant 1 : index
      %c0_80 = arith.constant 0 : index
      %c0_81 = arith.constant 0 : index
      %108 = vector.load %arg7[%c1_79, %c0_80, %c0_81] : memref<4x8x1xf32, #tpu.memory_space<vmem>>, vector<1x8x1xf32>
      %109 = vector.shape_cast %108 : vector<1x8x1xf32> to vector<8x1xf32>
      %110 = vector.shape_cast %83 : vector<8x1xf32> to vector<1x8x1xf32>
      tpu.vector_store %arg7[%c1_79, %c0_80, %c0_81], %110 {strides = array<i32>} : memref<4x8x1xf32, #tpu.memory_space<vmem>>, vector<1x8x1xf32>,
      %c0_82 = arith.constant 0 : index
      %c0_83 = arith.constant 0 : index
      %c0_84 = arith.constant 0 : index
      %c2 = arith.constant 2 : index
      %c0_85 = arith.constant 0 : index
      %111 = vector.load %arg3[%c0_82, %c0_83, %c0_84, %c2, %c0_85] : memref<1x8x1x4x8xbf16, #tpu.memory_space<vmem>>, vector<1x8x1x1x8xbf16>
      %112 = vector.shape_cast %111 : vector<1x8x1x1x8xbf16> to vector<8x8xbf16>
      %113 = arith.extf %112 : vector<8x8xbf16> to vector<8x8xf32>
      %cst_86 = arith.constant 0.353553385 : f32
      %114 = vector.broadcast %cst_86 : f32 to vector<8x8xf32>
      %115 = arith.mulf %113, %114 : vector<8x8xf32>
      %116 = arith.truncf %115 : vector<8x8xf32> to vector<8x8xbf16>
      %c0_87 = arith.constant 0 : index
      %c0_88 = arith.constant 0 : index
      %c0_89 = arith.constant 0 : index
      %c2_90 = arith.constant 2 : index
      %c0_91 = arith.constant 0 : index
      %117 = vector.load %arg4[%c0_87, %c0_88, %c0_89, %c2_90, %c0_91] : memref<1x8x1x4x8xbf16, #tpu.memory_space<vmem>>, vector<1x8x1x1x8xbf16>
      %118 = vector.shape_cast %117 : vector<1x8x1x1x8xbf16> to vector<8x8xbf16>
      %c0_92 = arith.constant 0 : index
      %c0_93 = arith.constant 0 : index
      %c0_94 = arith.constant 0 : index
      %c2_95 = arith.constant 2 : index
      %c0_96 = arith.constant 0 : index
      %119 = vector.load %arg5[%c0_92, %c0_93, %c0_94, %c2_95, %c0_96] : memref<1x8x1x4x8xbf16, #tpu.memory_space<vmem>>, vector<1x8x1x1x8xbf16>
      %120 = vector.shape_cast %119 : vector<1x8x1x1x8xbf16> to vector<8x8xbf16>
      %cst_97 = arith.constant dense<0.000000e+00> : vector<8x8xf32>
      %121 = tpu.matmul %116, %118, %cst_97 {dimension_numbers = #tpu.dot_dimension_numbers<[1], [1], [0], [0], [0, 0, 1, 0], [], []>} : vector<8x8xbf16>, vector<8x8xbf16>, vector<8x8xf32> -> vector<8x8xf32>
      %cst_98 = arith.constant -1.000000e+30 : f32
      %122 = vector.broadcast %cst_98 : f32 to vector<8x8xf32>
      %123 = arith.select %20, %121, %122 : vector<8x8xi1>, vector<8x8xf32>
      %c2_99 = arith.constant 2 : index
      %c0_100 = arith.constant 0 : index
      %c0_101 = arith.constant 0 : index
      %124 = vector.load %arg7[%c2_99, %c0_100, %c0_101] : memref<4x8x1xf32, #tpu.memory_space<vmem>>, vector<1x8x1xf32>
      %125 = vector.shape_cast %124 : vector<1x8x1xf32> to vector<8x1xf32>
      %cst_102 = arith.constant dense<0xFF800000> : vector<8xf32>
      %126 = vector.multi_reduction <maximumf>, %123, %cst_102 [1] : vector<8x8xf32> to vector<8xf32>
      %127 = vector.shape_cast %126 : vector<8xf32> to vector<8x1xf32>
      %128 = arith.maximumf %125, %127 : vector<8x1xf32>
      %129 = arith.subf %125, %128 : vector<8x1xf32>
      %130 = math.exp %129 : vector<8x1xf32>
      %131 = vector.broadcast %128 : vector<8x1xf32> to vector<8x8xf32>
      %132 = arith.subf %123, %131 : vector<8x8xf32>
      %133 = math.exp %132 : vector<8x8xf32>
      %c2_103 = arith.constant 2 : index
      %c0_104 = arith.constant 0 : index
      %c0_105 = arith.constant 0 : index
      %134 = vector.load %arg8[%c2_103, %c0_104, %c0_105] : memref<4x8x1xf32, #tpu.memory_space<vmem>>, vector<1x8x1xf32>
      %135 = vector.shape_cast %134 : vector<1x8x1xf32> to vector<8x1xf32>
      %136 = arith.mulf %130, %135 : vector<8x1xf32>
      %cst_106 = arith.constant dense<0.000000e+00> : vector<8xf32>
      %137 = vector.multi_reduction <add>, %133, %cst_106 [1] : vector<8x8xf32> to vector<8xf32>
      %138 = vector.shape_cast %137 : vector<8xf32> to vector<8x1xf32>
      %139 = arith.addf %136, %138 : vector<8x1xf32>
      %c2_107 = arith.constant 2 : index
      %c0_108 = arith.constant 0 : index
      %c0_109 = arith.constant 0 : index
      %140 = vector.load %arg8[%c2_107, %c0_108, %c0_109] : memref<4x8x1xf32, #tpu.memory_space<vmem>>, vector<1x8x1xf32>
      %141 = vector.shape_cast %140 : vector<1x8x1xf32> to vector<8x1xf32>
      %142 = vector.shape_cast %139 : vector<8x1xf32> to vector<1x8x1xf32>
      tpu.vector_store %arg8[%c2_107, %c0_108, %c0_109], %142 {strides = array<i32>} : memref<4x8x1xf32, #tpu.memory_space<vmem>>, vector<1x8x1xf32>,
      %c2_110 = arith.constant 2 : index
      %c0_111 = arith.constant 0 : index
      %c0_112 = arith.constant 0 : index
      %143 = vector.load %arg9[%c2_110, %c0_111, %c0_112] : memref<4x8x8xf32, #tpu.memory_space<vmem>>, vector<1x8x8xf32>
      %144 = vector.shape_cast %143 : vector<1x8x8xf32> to vector<8x8xf32>
      %145 = vector.broadcast %130 : vector<8x1xf32> to vector<8x8xf32>
      %146 = arith.mulf %145, %144 : vector<8x8xf32>
      %147 = arith.truncf %133 : vector<8x8xf32> to vector<8x8xbf16>
      %cst_113 = arith.constant dense<0.000000e+00> : vector<8x8xf32>
      %148 = tpu.matmul %147, %120, %cst_113 {dimension_numbers = #tpu.dot_dimension_numbers<[1], [0], [0], [1], [0, 0, 1, 1], [], []>} : vector<8x8xbf16>, vector<8x8xbf16>, vector<8x8xf32> -> vector<8x8xf32>
      %149 = arith.addf %146, %148 : vector<8x8xf32>
      %c2_114 = arith.constant 2 : index
      %c0_115 = arith.constant 0 : index
      %c0_116 = arith.constant 0 : index
      %150 = vector.load %arg9[%c2_114, %c0_115, %c0_116] : memref<4x8x8xf32, #tpu.memory_space<vmem>>, vector<1x8x8xf32>
      %151 = vector.shape_cast %150 : vector<1x8x8xf32> to vector<8x8xf32>
      %152 = vector.shape_cast %149 : vector<8x8xf32> to vector<1x8x8xf32>
      tpu.vector_store %arg9[%c2_114, %c0_115, %c0_116], %152 {strides = array<i32>} : memref<4x8x8xf32, #tpu.memory_space<vmem>>, vector<1x8x8xf32>,
      %c2_117 = arith.constant 2 : index
      %c0_118 = arith.constant 0 : index
      %c0_119 = arith.constant 0 : index
      %153 = vector.load %arg7[%c2_117, %c0_118, %c0_119] : memref<4x8x1xf32, #tpu.memory_space<vmem>>, vector<1x8x1xf32>
      %154 = vector.shape_cast %153 : vector<1x8x1xf32> to vector<8x1xf32>
      %155 = vector.shape_cast %128 : vector<8x1xf32> to vector<1x8x1xf32>
      tpu.vector_store %arg7[%c2_117, %c0_118, %c0_119], %155 {strides = array<i32>} : memref<4x8x1xf32, #tpu.memory_space<vmem>>, vector<1x8x1xf32>,
      %c0_120 = arith.constant 0 : index
      %c0_121 = arith.constant 0 : index
      %c0_122 = arith.constant 0 : index
      %c3 = arith.constant 3 : index
      %c0_123 = arith.constant 0 : index
      %156 = vector.load %arg3[%c0_120, %c0_121, %c0_122, %c3, %c0_123] : memref<1x8x1x4x8xbf16, #tpu.memory_space<vmem>>, vector<1x8x1x1x8xbf16>
      %157 = vector.shape_cast %156 : vector<1x8x1x1x8xbf16> to vector<8x8xbf16>
      %158 = arith.extf %157 : vector<8x8xbf16> to vector<8x8xf32>
      %cst_124 = arith.constant 0.353553385 : f32
      %159 = vector.broadcast %cst_124 : f32 to vector<8x8xf32>
      %160 = arith.mulf %158, %159 : vector<8x8xf32>
      %161 = arith.truncf %160 : vector<8x8xf32> to vector<8x8xbf16>
      %c0_125 = arith.constant 0 : index
      %c0_126 = arith.constant 0 : index
      %c0_127 = arith.constant 0 : index
      %c3_128 = arith.constant 3 : index
      %c0_129 = arith.constant 0 : index
      %162 = vector.load %arg4[%c0_125, %c0_126, %c0_127, %c3_128, %c0_129] : memref<1x8x1x4x8xbf16, #tpu.memory_space<vmem>>, vector<1x8x1x1x8xbf16>
      %163 = vector.shape_cast %162 : vector<1x8x1x1x8xbf16> to vector<8x8xbf16>
      %c0_130 = arith.constant 0 : index
      %c0_131 = arith.constant 0 : index
      %c0_132 = arith.constant 0 : index
      %c3_133 = arith.constant 3 : index
      %c0_134 = arith.constant 0 : index
      %164 = vector.load %arg5[%c0_130, %c0_131, %c0_132, %c3_133, %c0_134] : memref<1x8x1x4x8xbf16, #tpu.memory_space<vmem>>, vector<1x8x1x1x8xbf16>
      %165 = vector.shape_cast %164 : vector<1x8x1x1x8xbf16> to vector<8x8xbf16>
      %cst_135 = arith.constant dense<0.000000e+00> : vector<8x8xf32>
      %166 = tpu.matmul %161, %163, %cst_135 {dimension_numbers = #tpu.dot_dimension_numbers<[1], [1], [0], [0], [0, 0, 1, 0], [], []>} : vector<8x8xbf16>, vector<8x8xbf16>, vector<8x8xf32> -> vector<8x8xf32>
      %cst_136 = arith.constant -1.000000e+30 : f32
      %167 = vector.broadcast %cst_136 : f32 to vector<8x8xf32>
      %168 = arith.select %20, %166, %167 : vector<8x8xi1>, vector<8x8xf32>
      %c3_137 = arith.constant 3 : index
      %c0_138 = arith.constant 0 : index
      %c0_139 = arith.constant 0 : index
      %169 = vector.load %arg7[%c3_137, %c0_138, %c0_139] : memref<4x8x1xf32, #tpu.memory_space<vmem>>, vector<1x8x1xf32>
      %170 = vector.shape_cast %169 : vector<1x8x1xf32> to vector<8x1xf32>
      %cst_140 = arith.constant dense<0xFF800000> : vector<8xf32>
      %171 = vector.multi_reduction <maximumf>, %168, %cst_140 [1] : vector<8x8xf32> to vector<8xf32>
      %172 = vector.shape_cast %171 : vector<8xf32> to vector<8x1xf32>
      %173 = arith.maximumf %170, %172 : vector<8x1xf32>
      %174 = arith.subf %170, %173 : vector<8x1xf32>
      %175 = math.exp %174 : vector<8x1xf32>
      %176 = vector.broadcast %173 : vector<8x1xf32> to vector<8x8xf32>
      %177 = arith.subf %168, %176 : vector<8x8xf32>
      %178 = math.exp %177 : vector<8x8xf32>
      %c3_141 = arith.constant 3 : index
      %c0_142 = arith.constant 0 : index
      %c0_143 = arith.constant 0 : index
      %179 = vector.load %arg8[%c3_141, %c0_142, %c0_143] : memref<4x8x1xf32, #tpu.memory_space<vmem>>, vector<1x8x1xf32>
      %180 = vector.shape_cast %179 : vector<1x8x1xf32> to vector<8x1xf32>
      %181 = arith.mulf %175, %180 : vector<8x1xf32>
      %cst_144 = arith.constant dense<0.000000e+00> : vector<8xf32>
      %182 = vector.multi_reduction <add>, %178, %cst_144 [1] : vector<8x8xf32> to vector<8xf32>
      %183 = vector.shape_cast %182 : vector<8xf32> to vector<8x1xf32>
      %184 = arith.addf %181, %183 : vector<8x1xf32>
      %c3_145 = arith.constant 3 : index
      %c0_146 = arith.constant 0 : index
      %c0_147 = arith.constant 0 : index
      %185 = vector.load %arg8[%c3_145, %c0_146, %c0_147] : memref<4x8x1xf32, #tpu.memory_space<vmem>>, vector<1x8x1xf32>
      %186 = vector.shape_cast %185 : vector<1x8x1xf32> to vector<8x1xf32>
      %187 = vector.shape_cast %184 : vector<8x1xf32> to vector<1x8x1xf32>
      tpu.vector_store %arg8[%c3_145, %c0_146, %c0_147], %187 {strides = array<i32>} : memref<4x8x1xf32, #tpu.memory_space<vmem>>, vector<1x8x1xf32>,
      %c3_148 = arith.constant 3 : index
      %c0_149 = arith.constant 0 : index
      %c0_150 = arith.constant 0 : index
      %188 = vector.load %arg9[%c3_148, %c0_149, %c0_150] : memref<4x8x8xf32, #tpu.memory_space<vmem>>, vector<1x8x8xf32>
      %189 = vector.shape_cast %188 : vector<1x8x8xf32> to vector<8x8xf32>
      %190 = vector.broadcast %175 : vector<8x1xf32> to vector<8x8xf32>
      %191 = arith.mulf %190, %189 : vector<8x8xf32>
      %192 = arith.truncf %178 : vector<8x8xf32> to vector<8x8xbf16>
      %cst_151 = arith.constant dense<0.000000e+00> : vector<8x8xf32>
      %193 = tpu.matmul %192, %165, %cst_151 {dimension_numbers = #tpu.dot_dimension_numbers<[1], [0], [0], [1], [0, 0, 1, 1], [], []>} : vector<8x8xbf16>, vector<8x8xbf16>, vector<8x8xf32> -> vector<8x8xf32>
      %194 = arith.addf %191, %193 : vector<8x8xf32>
      %c3_152 = arith.constant 3 : index
      %c0_153 = arith.constant 0 : index
      %c0_154 = arith.constant 0 : index
      %195 = vector.load %arg9[%c3_152, %c0_153, %c0_154] : memref<4x8x8xf32, #tpu.memory_space<vmem>>, vector<1x8x8xf32>
      %196 = vector.shape_cast %195 : vector<1x8x8xf32> to vector<8x8xf32>
      %197 = vector.shape_cast %194 : vector<8x8xf32> to vector<1x8x8xf32>
      tpu.vector_store %arg9[%c3_152, %c0_153, %c0_154], %197 {strides = array<i32>} : memref<4x8x8xf32, #tpu.memory_space<vmem>>, vector<1x8x8xf32>,
      %c3_155 = arith.constant 3 : index
      %c0_156 = arith.constant 0 : index
      %c0_157 = arith.constant 0 : index
      %198 = vector.load %arg7[%c3_155, %c0_156, %c0_157] : memref<4x8x1xf32, #tpu.memory_space<vmem>>, vector<1x8x1xf32>
      %199 = vector.shape_cast %198 : vector<1x8x1xf32> to vector<8x1xf32>
      %200 = vector.shape_cast %173 : vector<8x1xf32> to vector<1x8x1xf32>
      tpu.vector_store %arg7[%c3_155, %c0_156, %c0_157], %200 {strides = array<i32>} : memref<4x8x1xf32, #tpu.memory_space<vmem>>, vector<1x8x1xf32>,
    } else {
    }
    %c0_i32_3 = arith.constant 0 : i32
    %9 = arith.cmpi eq, %arg2, %c0_i32_3 : i32
    %10 = arith.extui %9 : i1 to i32
    %c0_i32_4 = arith.constant 0 : i32
    %11 = arith.cmpi ne, %10, %c0_i32_4 : i32
    scf.if %11 {
      %c0 = arith.constant 0 : index
      %c0_5 = arith.constant 0 : index
      %c0_6 = arith.constant 0 : index
      %12 = vector.load %arg9[%c0, %c0_5, %c0_6] : memref<4x8x8xf32, #tpu.memory_space<vmem>>, vector<4x8x8xf32>
      %c0_7 = arith.constant 0 : index
      %c0_8 = arith.constant 0 : index
      %c0_9 = arith.constant 0 : index
      %13 = vector.load %arg8[%c0_7, %c0_8, %c0_9] : memref<4x8x1xf32, #tpu.memory_space<vmem>>, vector<4x8x1xf32>
      %14 = tpu.reciprocal %13 {approx = true} : vector<4x8x1xf32> -> vector<4x8x1xf32>
      %15 = vector.broadcast %14 : vector<4x8x1xf32> to vector<4x8x8xf32>
      %16 = arith.mulf %12, %15 : vector<4x8x8xf32>
      %17 = arith.truncf %16 : vector<4x8x8xf32> to vector<4x8x8xbf16>
      %c0_10 = arith.constant 0 : index
      %c0_11 = arith.constant 0 : index
      %c0_12 = arith.constant 0 : index
      %c0_13 = arith.constant 0 : index
      %18 = vector.load %arg6[%c0_10, %c0_11, %c0_12, %c0_13] : memref<1x4x8x8xbf16, #tpu.memory_space<vmem>>, vector<1x4x8x8xbf16>
      %19 = vector.shape_cast %18 : vector<1x4x8x8xbf16> to vector<4x8x8xbf16>
      %20 = vector.shape_cast %17 : vector<4x8x8xbf16> to vector<1x4x8x8xbf16>
      tpu.vector_store %arg6[%c0_10, %c0_11, %c0_12, %c0_13], %20 {strides = array<i32>} : memref<1x4x8x8xbf16, #tpu.memory_space<vmem>>, vector<1x4x8x8xbf16>,
    } else {
    }
    return
  }
  func.func @transform_0(%arg0: i32, %arg1: i32, %arg2: i32) -> (i32, i32, i32, i32, i32) {
    %c0_i32 = arith.constant 0 : i32
    %c0_i32_0 = arith.constant 0 : i32
    %c0_i32_1 = arith.constant 0 : i32
    %c0_i32_2 = arith.constant 0 : i32
    return %arg0, %arg1, %c0_i32, %c0_i32_0, %c0_i32_1 : i32, i32, i32, i32, i32
  }
  func.func @transform_1(%arg0: i32, %arg1: i32, %arg2: i32) -> (i32, i32, i32, i32, i32) {
    %c1_i32 = arith.constant 1 : i32
    %c0_i32 = arith.constant 0 : i32
    %c0_i32_0 = arith.constant 0 : i32
    %c0_i32_1 = arith.constant 0 : i32
    return %arg0, %arg2, %c1_i32, %c0_i32, %c0_i32_0 : i32, i32, i32, i32, i32
  }
  func.func @transform_2(%arg0: i32, %arg1: i32, %arg2: i32) -> (i32, i32, i32, i32, i32) {
    %c2_i32 = arith.constant 2 : i32
    %c0_i32 = arith.constant 0 : i32
    %c0_i32_0 = arith.constant 0 : i32
    %c0_i32_1 = arith.constant 0 : i32
    return %arg0, %arg2, %c2_i32, %c0_i32, %c0_i32_0 : i32, i32, i32, i32, i32
  }
  func.func @transform_3(%arg0: i32, %arg1: i32, %arg2: i32) -> (i32, i32, i32, i32) {
    %c0_i32 = arith.constant 0 : i32
    %c0_i32_0 = arith.constant 0 : i32
    %c0_i32_1 = arith.constant 0 : i32
    return %arg0, %c0_i32, %arg1, %c0_i32_0 : i32, i32, i32, i32
  }
}

module attributes {stable_mosaic.version = 11 : i64} {
  func.func @_ln_router_kernel(%arg0: i32, %arg1: memref<16x32xf32, #tpu.memory_space<vmem>>, %arg2: memref<1x32xf32, #tpu.memory_space<vmem>>, %arg3: memref<1x32xf32, #tpu.memory_space<vmem>>, %arg4: memref<32x8xbf16, #tpu.memory_space<vmem>>, %arg5: memref<1x8xf32, #tpu.memory_space<vmem>>, %arg6: memref<16x8xf32, #tpu.memory_space<vmem>>) attributes {dimension_semantics = [#tpu.dimension_semantics<parallel>], iteration_bounds = array<i64: 1>, scalar_prefetch = 0 : i64, scratch_operands = 0 : i64, tpu.core_type = #tpu.core_type<tc>, window_params = [{transform_indices = @transform_0, window_bounds = array<i64: 16, 32>}, {pipeline_mode = #tpu.pipeline_mode<synchronous>, transform_indices = @transform_1, window_bounds = array<i64: 1, 32>}, {pipeline_mode = #tpu.pipeline_mode<synchronous>, transform_indices = @transform_2, window_bounds = array<i64: 1, 32>}, {pipeline_mode = #tpu.pipeline_mode<synchronous>, transform_indices = @transform_3, window_bounds = array<i64: 32, 8>}, {pipeline_mode = #tpu.pipeline_mode<synchronous>, transform_indices = @transform_4, window_bounds = array<i64: 1, 8>}, {transform_indices = @transform_5, window_bounds = array<i64: 16, 8>}]} {
    %c0 = arith.constant 0 : index
    %c0_0 = arith.constant 0 : index
    %0 = vector.load %arg1[%c0, %c0_0] : memref<16x32xf32, #tpu.memory_space<vmem>>, vector<16x32xf32>
    %c0_1 = arith.constant 0 : index
    %c0_2 = arith.constant 0 : index
    %1 = vector.load %arg2[%c0_1, %c0_2] : memref<1x32xf32, #tpu.memory_space<vmem>>, vector<1x32xf32>
    %c0_3 = arith.constant 0 : index
    %c0_4 = arith.constant 0 : index
    %2 = vector.load %arg3[%c0_3, %c0_4] : memref<1x32xf32, #tpu.memory_space<vmem>>, vector<1x32xf32>
    %cst = arith.constant dense<0.000000e+00> : vector<16xf32>
    %3 = vector.multi_reduction <add>, %0, %cst [1] : vector<16x32xf32> to vector<16xf32>
    %4 = vector.shape_cast %3 : vector<16xf32> to vector<16x1xf32>
    %cst_5 = arith.constant 3.200000e+01 : f32
    %5 = vector.broadcast %cst_5 : f32 to vector<16x1xf32>
    %6 = arith.divf %4, %5 : vector<16x1xf32>
    %7 = vector.broadcast %6 : vector<16x1xf32> to vector<16x32xf32>
    %8 = arith.subf %0, %7 : vector<16x32xf32>
    %9 = arith.mulf %8, %8 : vector<16x32xf32>
    %cst_6 = arith.constant dense<0.000000e+00> : vector<16xf32>
    %10 = vector.multi_reduction <add>, %9, %cst_6 [1] : vector<16x32xf32> to vector<16xf32>
    %11 = vector.shape_cast %10 : vector<16xf32> to vector<16x1xf32>
    %cst_7 = arith.constant 3.200000e+01 : f32
    %12 = vector.broadcast %cst_7 : f32 to vector<16x1xf32>
    %13 = arith.divf %11, %12 : vector<16x1xf32>
    %14 = vector.broadcast %6 : vector<16x1xf32> to vector<16x32xf32>
    %15 = arith.subf %0, %14 : vector<16x32xf32>
    %cst_8 = arith.constant 9.99999974E-6 : f32
    %16 = vector.broadcast %cst_8 : f32 to vector<16x1xf32>
    %17 = arith.addf %13, %16 : vector<16x1xf32>
    %18 = math.rsqrt %17 : vector<16x1xf32>
    %19 = vector.broadcast %18 : vector<16x1xf32> to vector<16x32xf32>
    %20 = arith.mulf %15, %19 : vector<16x32xf32>
    %21 = vector.broadcast %1 : vector<1x32xf32> to vector<16x32xf32>
    %22 = arith.mulf %20, %21 : vector<16x32xf32>
    %23 = vector.broadcast %2 : vector<1x32xf32> to vector<16x32xf32>
    %24 = arith.addf %22, %23 : vector<16x32xf32>
    %25 = arith.truncf %24 : vector<16x32xf32> to vector<16x32xbf16>
    %c0_9 = arith.constant 0 : index
    %c0_10 = arith.constant 0 : index
    %26 = vector.load %arg4[%c0_9, %c0_10] : memref<32x8xbf16, #tpu.memory_space<vmem>>, vector<32x8xbf16>
    %cst_11 = arith.constant dense<0.000000e+00> : vector<16x8xf32>
    %27 = tpu.matmul %25, %26, %cst_11 {dimension_numbers = #tpu.dot_dimension_numbers<[1], [0], [0], [1], [0, 0, 1, 1], [], []>} : vector<16x32xbf16>, vector<32x8xbf16>, vector<16x8xf32> -> vector<16x8xf32>
    %c0_12 = arith.constant 0 : index
    %c0_13 = arith.constant 0 : index
    %28 = vector.load %arg5[%c0_12, %c0_13] : memref<1x8xf32, #tpu.memory_space<vmem>>, vector<1x8xf32>
    %29 = vector.broadcast %28 : vector<1x8xf32> to vector<16x8xf32>
    %30 = arith.addf %27, %29 : vector<16x8xf32>
    %c0_14 = arith.constant 0 : index
    %c0_15 = arith.constant 0 : index
    %31 = vector.load %arg6[%c0_14, %c0_15] : memref<16x8xf32, #tpu.memory_space<vmem>>, vector<16x8xf32>
    tpu.vector_store %arg6[%c0_14, %c0_15], %30 {strides = array<i32>} : memref<16x8xf32, #tpu.memory_space<vmem>>, vector<16x8xf32>,
    return
  }
  func.func @transform_0(%arg0: i32) -> (i32, i32) {
    %c0_i32 = arith.constant 0 : i32
    %c0_i32_0 = arith.constant 0 : i32
    return %arg0, %c0_i32 : i32, i32
  }
  func.func @transform_1(%arg0: i32) -> (i32, i32) {
    %c0_i32 = arith.constant 0 : i32
    %c0_i32_0 = arith.constant 0 : i32
    %c0_i32_1 = arith.constant 0 : i32
    return %c0_i32, %c0_i32_0 : i32, i32
  }
  func.func @transform_2(%arg0: i32) -> (i32, i32) {
    %c0_i32 = arith.constant 0 : i32
    %c0_i32_0 = arith.constant 0 : i32
    %c0_i32_1 = arith.constant 0 : i32
    return %c0_i32, %c0_i32_0 : i32, i32
  }
  func.func @transform_3(%arg0: i32) -> (i32, i32) {
    %c0_i32 = arith.constant 0 : i32
    %c0_i32_0 = arith.constant 0 : i32
    %c0_i32_1 = arith.constant 0 : i32
    return %c0_i32, %c0_i32_0 : i32, i32
  }
  func.func @transform_4(%arg0: i32) -> (i32, i32) {
    %c0_i32 = arith.constant 0 : i32
    %c0_i32_0 = arith.constant 0 : i32
    %c0_i32_1 = arith.constant 0 : i32
    return %c0_i32, %c0_i32_0 : i32, i32
  }
  func.func @transform_5(%arg0: i32) -> (i32, i32) {
    %c0_i32 = arith.constant 0 : i32
    %c0_i32_0 = arith.constant 0 : i32
    return %arg0, %c0_i32 : i32, i32
  }
}

module attributes {stable_mosaic.version = 11 : i64} {
  func.func @_moe_kernel(%arg0: i32, %arg1: i32, %arg2: memref<16x32xf32, #tpu.memory_space<vmem>>, %arg3: memref<1x32xf32, #tpu.memory_space<vmem>>, %arg4: memref<1x32xf32, #tpu.memory_space<vmem>>, %arg5: memref<16x4xf32, #tpu.memory_space<vmem>>, %arg6: memref<1x32x128xbf16, #tpu.memory_space<vmem>>, %arg7: memref<1x1x128xf32, #tpu.memory_space<vmem>>, %arg8: memref<1x128x32xbf16, #tpu.memory_space<vmem>>, %arg9: memref<1x1x32xf32, #tpu.memory_space<vmem>>, %arg10: memref<16x32xf32, #tpu.memory_space<vmem>>, %arg11: memref<16x32xbf16, #tpu.memory_space<vmem>>, %arg12: memref<16x32xf32, #tpu.memory_space<vmem>>) attributes {dimension_semantics = [#tpu.dimension_semantics<parallel>, #tpu.dimension_semantics<arbitrary>], iteration_bounds = array<i64: 1, 4>, scalar_prefetch = 0 : i64, scratch_operands = 2 : i64, tpu.core_type = #tpu.core_type<tc>, window_params = [{transform_indices = @transform_0, window_bounds = array<i64: 16, 32>}, {pipeline_mode = #tpu.pipeline_mode<synchronous>, transform_indices = @transform_1, window_bounds = array<i64: 1, 32>}, {pipeline_mode = #tpu.pipeline_mode<synchronous>, transform_indices = @transform_2, window_bounds = array<i64: 1, 32>}, {transform_indices = @transform_3, window_bounds = array<i64: 16, 4>}, {transform_indices = @transform_4, window_bounds = array<i64: 1, 32, 128>}, {transform_indices = @transform_5, window_bounds = array<i64: 1, 1, 128>}, {transform_indices = @transform_6, window_bounds = array<i64: 1, 128, 32>}, {transform_indices = @transform_7, window_bounds = array<i64: 1, 1, 32>}, {transform_indices = @transform_8, window_bounds = array<i64: 16, 32>}]} {
    %c0_i32 = arith.constant 0 : i32
    %0 = arith.cmpi eq, %arg1, %c0_i32 : i32
    %1 = arith.extui %0 : i1 to i32
    %c0_i32_0 = arith.constant 0 : i32
    %2 = arith.cmpi ne, %1, %c0_i32_0 : i32
    scf.if %2 {
      %c0_25 = arith.constant 0 : index
      %c0_26 = arith.constant 0 : index
      %37 = vector.load %arg2[%c0_25, %c0_26] : memref<16x32xf32, #tpu.memory_space<vmem>>, vector<16x32xf32>
      %c0_27 = arith.constant 0 : index
      %c0_28 = arith.constant 0 : index
      %38 = vector.load %arg3[%c0_27, %c0_28] : memref<1x32xf32, #tpu.memory_space<vmem>>, vector<1x32xf32>
      %c0_29 = arith.constant 0 : index
      %c0_30 = arith.constant 0 : index
      %39 = vector.load %arg4[%c0_29, %c0_30] : memref<1x32xf32, #tpu.memory_space<vmem>>, vector<1x32xf32>
      %cst_31 = arith.constant dense<0.000000e+00> : vector<16xf32>
      %40 = vector.multi_reduction <add>, %37, %cst_31 [1] : vector<16x32xf32> to vector<16xf32>
      %41 = vector.shape_cast %40 : vector<16xf32> to vector<16x1xf32>
      %cst_32 = arith.constant 3.200000e+01 : f32
      %42 = vector.broadcast %cst_32 : f32 to vector<16x1xf32>
      %43 = arith.divf %41, %42 : vector<16x1xf32>
      %44 = vector.broadcast %43 : vector<16x1xf32> to vector<16x32xf32>
      %45 = arith.subf %37, %44 : vector<16x32xf32>
      %46 = arith.mulf %45, %45 : vector<16x32xf32>
      %cst_33 = arith.constant dense<0.000000e+00> : vector<16xf32>
      %47 = vector.multi_reduction <add>, %46, %cst_33 [1] : vector<16x32xf32> to vector<16xf32>
      %48 = vector.shape_cast %47 : vector<16xf32> to vector<16x1xf32>
      %cst_34 = arith.constant 3.200000e+01 : f32
      %49 = vector.broadcast %cst_34 : f32 to vector<16x1xf32>
      %50 = arith.divf %48, %49 : vector<16x1xf32>
      %51 = vector.broadcast %43 : vector<16x1xf32> to vector<16x32xf32>
      %52 = arith.subf %37, %51 : vector<16x32xf32>
      %cst_35 = arith.constant 9.99999974E-6 : f32
      %53 = vector.broadcast %cst_35 : f32 to vector<16x1xf32>
      %54 = arith.addf %50, %53 : vector<16x1xf32>
      %55 = math.rsqrt %54 : vector<16x1xf32>
      %56 = vector.broadcast %55 : vector<16x1xf32> to vector<16x32xf32>
      %57 = arith.mulf %52, %56 : vector<16x32xf32>
      %58 = vector.broadcast %38 : vector<1x32xf32> to vector<16x32xf32>
      %59 = arith.mulf %57, %58 : vector<16x32xf32>
      %60 = vector.broadcast %39 : vector<1x32xf32> to vector<16x32xf32>
      %61 = arith.addf %59, %60 : vector<16x32xf32>
      %62 = arith.truncf %61 : vector<16x32xf32> to vector<16x32xbf16>
      %c0_36 = arith.constant 0 : index
      %c0_37 = arith.constant 0 : index
      %63 = vector.load %arg11[%c0_36, %c0_37] : memref<16x32xbf16, #tpu.memory_space<vmem>>, vector<16x32xbf16>
      tpu.vector_store %arg11[%c0_36, %c0_37], %62 {strides = array<i32>} : memref<16x32xbf16, #tpu.memory_space<vmem>>, vector<16x32xbf16>,
      %c0_38 = arith.constant 0 : index
      %c0_39 = arith.constant 0 : index
      %64 = vector.load %arg12[%c0_38, %c0_39] : memref<16x32xf32, #tpu.memory_space<vmem>>, vector<16x32xf32>
      tpu.vector_store %arg12[%c0_38, %c0_39], %37 {strides = array<i32>} : memref<16x32xf32, #tpu.memory_space<vmem>>, vector<16x32xf32>,
    } else {
    }
    %c0 = arith.constant 0 : index
    %c0_1 = arith.constant 0 : index
    %3 = vector.load %arg11[%c0, %c0_1] : memref<16x32xbf16, #tpu.memory_space<vmem>>, vector<16x32xbf16>
    %c0_2 = arith.constant 0 : index
    %c0_3 = arith.constant 0 : index
    %c0_4 = arith.constant 0 : index
    %4 = vector.load %arg6[%c0_2, %c0_3, %c0_4] : memref<1x32x128xbf16, #tpu.memory_space<vmem>>, vector<1x32x128xbf16>
    %5 = vector.shape_cast %4 : vector<1x32x128xbf16> to vector<32x128xbf16>
    %cst = arith.constant dense<0.000000e+00> : vector<16x128xf32>
    %6 = tpu.matmul %3, %5, %cst {dimension_numbers = #tpu.dot_dimension_numbers<[1], [0], [0], [1], [0, 0, 1, 1], [], []>} : vector<16x32xbf16>, vector<32x128xbf16>, vector<16x128xf32> -> vector<16x128xf32>
    %c0_5 = arith.constant 0 : index
    %c0_6 = arith.constant 0 : index
    %c0_7 = arith.constant 0 : index
    %7 = vector.load %arg7[%c0_5, %c0_6, %c0_7] : memref<1x1x128xf32, #tpu.memory_space<vmem>>, vector<1x1x128xf32>
    %8 = vector.shape_cast %7 : vector<1x1x128xf32> to vector<1x128xf32>
    %9 = vector.broadcast %8 : vector<1x128xf32> to vector<16x128xf32>
    %10 = arith.addf %6, %9 : vector<16x128xf32>
    %cst_8 = arith.constant 0.000000e+00 : f32
    %11 = vector.broadcast %cst_8 : f32 to vector<16x128xf32>
    %12 = arith.maximumf %10, %11 : vector<16x128xf32>
    %13 = arith.truncf %12 : vector<16x128xf32> to vector<16x128xbf16>
    %c0_9 = arith.constant 0 : index
    %c0_10 = arith.constant 0 : index
    %c0_11 = arith.constant 0 : index
    %14 = vector.load %arg8[%c0_9, %c0_10, %c0_11] : memref<1x128x32xbf16, #tpu.memory_space<vmem>>, vector<1x128x32xbf16>
    %15 = vector.shape_cast %14 : vector<1x128x32xbf16> to vector<128x32xbf16>
    %cst_12 = arith.constant dense<0.000000e+00> : vector<16x32xf32>
    %16 = tpu.matmul %13, %15, %cst_12 {dimension_numbers = #tpu.dot_dimension_numbers<[1], [0], [0], [1], [0, 0, 1, 1], [], []>} : vector<16x128xbf16>, vector<128x32xbf16>, vector<16x32xf32> -> vector<16x32xf32>
    %c0_13 = arith.constant 0 : index
    %c0_14 = arith.constant 0 : index
    %c0_15 = arith.constant 0 : index
    %17 = vector.load %arg9[%c0_13, %c0_14, %c0_15] : memref<1x1x32xf32, #tpu.memory_space<vmem>>, vector<1x1x32xf32>
    %18 = vector.shape_cast %17 : vector<1x1x32xf32> to vector<1x32xf32>
    %19 = vector.broadcast %18 : vector<1x32xf32> to vector<16x32xf32>
    %20 = arith.addf %16, %19 : vector<16x32xf32>
    %c0_16 = arith.constant 0 : index
    %c0_17 = arith.constant 0 : index
    %21 = vector.load %arg5[%c0_16, %c0_17] : memref<16x4xf32, #tpu.memory_space<vmem>>, vector<16x4xf32>
    %22 = tpu.iota {dimensions = array<i32: 1>} : vector<16x4xi32>
    %23 = vector.broadcast %arg1 : i32 to vector<16x4xi32>
    %24 = arith.cmpi eq, %22, %23 : vector<16x4xi32>
    %cst_18 = arith.constant 0.000000e+00 : f32
    %25 = vector.broadcast %cst_18 : f32 to vector<16x4xf32>
    %26 = arith.select %24, %21, %25 : vector<16x4xi1>, vector<16x4xf32>
    %cst_19 = arith.constant dense<0.000000e+00> : vector<16xf32>
    %27 = vector.multi_reduction <add>, %26, %cst_19 [1] : vector<16x4xf32> to vector<16xf32>
    %28 = vector.shape_cast %27 : vector<16xf32> to vector<16x1xf32>
    %c0_20 = arith.constant 0 : index
    %c0_21 = arith.constant 0 : index
    %29 = vector.load %arg12[%c0_20, %c0_21] : memref<16x32xf32, #tpu.memory_space<vmem>>, vector<16x32xf32>
    %30 = vector.broadcast %28 : vector<16x1xf32> to vector<16x32xf32>
    %31 = arith.mulf %20, %30 : vector<16x32xf32>
    %32 = arith.addf %29, %31 : vector<16x32xf32>
    %c0_22 = arith.constant 0 : index
    %c0_23 = arith.constant 0 : index
    %33 = vector.load %arg12[%c0_22, %c0_23] : memref<16x32xf32, #tpu.memory_space<vmem>>, vector<16x32xf32>
    tpu.vector_store %arg12[%c0_22, %c0_23], %32 {strides = array<i32>} : memref<16x32xf32, #tpu.memory_space<vmem>>, vector<16x32xf32>,
    %c3_i32 = arith.constant 3 : i32
    %34 = arith.cmpi eq, %arg1, %c3_i32 : i32
    %35 = arith.extui %34 : i1 to i32
    %c0_i32_24 = arith.constant 0 : i32
    %36 = arith.cmpi ne, %35, %c0_i32_24 : i32
    scf.if %36 {
      %c0_25 = arith.constant 0 : index
      %c0_26 = arith.constant 0 : index
      %37 = vector.load %arg12[%c0_25, %c0_26] : memref<16x32xf32, #tpu.memory_space<vmem>>, vector<16x32xf32>
      %c0_27 = arith.constant 0 : index
      %c0_28 = arith.constant 0 : index
      %38 = vector.load %arg10[%c0_27, %c0_28] : memref<16x32xf32, #tpu.memory_space<vmem>>, vector<16x32xf32>
      tpu.vector_store %arg10[%c0_27, %c0_28], %37 {strides = array<i32>} : memref<16x32xf32, #tpu.memory_space<vmem>>, vector<16x32xf32>,
    } else {
    }
    return
  }
  func.func @transform_0(%arg0: i32, %arg1: i32) -> (i32, i32) {
    %c0_i32 = arith.constant 0 : i32
    %c0_i32_0 = arith.constant 0 : i32
    return %arg0, %c0_i32 : i32, i32
  }
  func.func @transform_1(%arg0: i32, %arg1: i32) -> (i32, i32) {
    %c0_i32 = arith.constant 0 : i32
    %c0_i32_0 = arith.constant 0 : i32
    %c0_i32_1 = arith.constant 0 : i32
    return %c0_i32, %c0_i32_0 : i32, i32
  }
  func.func @transform_2(%arg0: i32, %arg1: i32) -> (i32, i32) {
    %c0_i32 = arith.constant 0 : i32
    %c0_i32_0 = arith.constant 0 : i32
    %c0_i32_1 = arith.constant 0 : i32
    return %c0_i32, %c0_i32_0 : i32, i32
  }
  func.func @transform_3(%arg0: i32, %arg1: i32) -> (i32, i32) {
    %c0_i32 = arith.constant 0 : i32
    %c0_i32_0 = arith.constant 0 : i32
    return %arg0, %c0_i32 : i32, i32
  }
  func.func @transform_4(%arg0: i32, %arg1: i32) -> (i32, i32, i32) {
    %c0_i32 = arith.constant 0 : i32
    %c0_i32_0 = arith.constant 0 : i32
    %c0_i32_1 = arith.constant 0 : i32
    return %arg1, %c0_i32, %c0_i32_0 : i32, i32, i32
  }
  func.func @transform_5(%arg0: i32, %arg1: i32) -> (i32, i32, i32) {
    %c0_i32 = arith.constant 0 : i32
    %c0_i32_0 = arith.constant 0 : i32
    %c0_i32_1 = arith.constant 0 : i32
    return %arg1, %c0_i32, %c0_i32_0 : i32, i32, i32
  }
  func.func @transform_6(%arg0: i32, %arg1: i32) -> (i32, i32, i32) {
    %c0_i32 = arith.constant 0 : i32
    %c0_i32_0 = arith.constant 0 : i32
    %c0_i32_1 = arith.constant 0 : i32
    return %arg1, %c0_i32, %c0_i32_0 : i32, i32, i32
  }
  func.func @transform_7(%arg0: i32, %arg1: i32) -> (i32, i32, i32) {
    %c0_i32 = arith.constant 0 : i32
    %c0_i32_0 = arith.constant 0 : i32
    %c0_i32_1 = arith.constant 0 : i32
    return %arg1, %c0_i32, %c0_i32_0 : i32, i32, i32
  }
  func.func @transform_8(%arg0: i32, %arg1: i32) -> (i32, i32) {
    %c0_i32 = arith.constant 0 : i32
    %c0_i32_0 = arith.constant 0 : i32
    return %arg0, %c0_i32 : i32, i32
  }
}

</mosaic_0001>

<bundles_post_ra>
// kernel: block_forward.5
= control target key start
LH: loop header
LB: loop body
LE: loop exit
PB: predicated region body
PF: predicated region fallthrough
CT: control target
= control target key end

     0   :  { %vm22_vm0 = vcmask 261120   ;;  %v147_v4 = vmov 32.0   ;;  %vm120_vm8 = vcmask 781312   ;;  %s202_s0 = inlined_call_operand.vmem [shape: f32[16,32], index: 0, kind: input, shape index: {}]   ;;  %s203_s1 = inlined_call_operand.vmem [shape: f32[1,32], index: 1, kind: input, shape index: {}]   ;;  %s204_s2 = inlined_call_operand.vmem [shape: f32[1,32], index: 2, kind: input, shape index: {}]   ;;  %s205_s3 = inlined_call_operand.vmem [shape: bf16[32,96], index: 3, kind: input, shape index: {}]   ;;  %s206_s4 = inlined_call_operand.vmem [shape: bf16[16,96], index: 4, kind: output, shape index: {}]  }
   0x1   :  { %v18_v0 = vld [vmem:[%s202_s0] sm:$0xff]  ;;  %v19_v2 = vld [vmem:[%s202_s0 + $0x8] sm:$0xff]  ;;  %141 = vrcp.f32 %v147_v4 }
   0x2   :  { %v23_v1 = vsel %vm22_vm0, %v18_v0, 0.0  ;;  %v26_v3 = vsel %vm22_vm0, %v19_v2, 0.0  ;;  %v137_v21 = vld [vmem:[%s205_s3 + $0x8] sm:$0xff]  ;;  %v136_v23 = vld [vmem:[%s205_s3] sm:$0xff] }
   0x3   :  { %24 = vadd.xlane.f32.xlu0 %v23_v1  ;;  %110 = vmatpush.bf16.msra.mxu0 %v137_v21  ;;  %v139_v42 = vld [vmem:[%s203_s1] ss:$0 sm:$0xff] }
   0x4   :  { %v140_v47 = vld [vmem:[%s204_s2] ss:$0 sm:$0xff] }
   0x7   :  { %v142_v5 = vpop.eup %141  ;;  %111 = vmatpush.bf16.msra.mxu0 %v136_v23 }
   0x8   :  { %v30_v6 = vmul.f32 32.0, %v142_v5  ;;  %vm34_vm1 = vweird.f32 %v142_v5 }
   0xa   :  { %v31_v7 = vsub.f32 1.0, %v30_v6 }
   0xb   :  { %27 = vadd.xlane.f32.xlu0 %v26_v3 }
   0xc   :  { %v32_v8 = vmul.f32 %v142_v5, %v31_v7 }
   0xe   :  { %v33_v9 = vadd.f32 %v142_v5, %v32_v8 }
  0x10   :  { %v35_v10 = vsel %vm34_vm1, %v142_v5, %v33_v9 }
  0x76   :  { %v25_v11 = vpop.xlane.xlu0 %24 }
  0x77   :  { %v36_v12 = vmul.f32 %v35_v10, %v25_v11 }
  0x79   :  { %v38_v13 = vsub.f32 %v18_v0, %v36_v12 }
  0x7b   :  { %v40_v14 = vmul.f32 %v38_v13, %v38_v13 }
  0x7d   :  { %v42_v15 = vsel %vm22_vm0, %v40_v14, 0.0 }
  0x7e   :  { %43 = vadd.xlane.f32.xlu1 %v42_v15  ;;  %v28_v16 = vpop.xlane.xlu0 %27 }
  0x7f   :  { %v37_v17 = vmul.f32 %v35_v10, %v28_v16 }
  0x81   :  { %v39_v18 = vsub.f32 %v19_v2, %v37_v17 }
  0x83   :  { %v41_v19 = vmul.f32 %v39_v18, %v39_v18 }
  0x85   :  { %v45_v20 = vsel %vm22_vm0, %v41_v19, 0.0 }
  0x86   :  { %46 = vadd.xlane.f32.xlu1 %v45_v20 }
  0xf1   :  { %v44_v22 = vpop.xlane.xlu1 %43 }
  0xf2   :  { %v48_v24 = vmul.f32 %v44_v22, %v35_v10 }
  0xf4   :  { %v50_v25 = vadd.f32 1e-05, %v48_v24 }
  0xf6   :  { %143 = vrsqrt.f32 %v50_v25  ;;  %vm58_vm3 = vweird.f32 %v50_v25 }
  0xf9   :  { %v47_v26 = vpop.xlane.xlu1 %46 }
  0xfa   :  { %v49_v27 = vmul.f32 %v47_v26, %v35_v10 }
  0xfc   :  { %v144_v28 = vpop.eup %143  ;;  %v51_v29 = vadd.f32 1e-05, %v49_v27 }
  0xfd   :  { %v53_v30 = vmul.f32 %v144_v28, %v50_v25  ;;  %vm59_vm2 = vweird.f32 %v144_v28 }
  0xfe   :  { %145 = vrsqrt.f32 %v51_v29  ;;  %vm60_vm4 = vmor %vm58_vm3, %vm59_vm2  ;;  %vm68_vm6 = vweird.f32 %v51_v29 }
  0xff   :  { %v54_v31 = vmul.f32 %v144_v28, %v53_v30 }
 0x101   :  { %v55_v32 = vmul.f32 0.5, %v54_v31 }
 0x103   :  { %v56_v33 = vsub.f32 1.5, %v55_v32 }
 0x104   :  { %v146_v34 = vpop.eup %145 }
 0x105   :  { %v57_v35 = vmul.f32 %v144_v28, %v56_v33  ;;  %v63_v36 = vmul.f32 %v146_v34, %v51_v29  ;;  %vm69_vm5 = vweird.f32 %v146_v34 }
 0x106   :  { %vm70_vm7 = vmor %vm68_vm6, %vm69_vm5 }
 0x107   :  { %v64_v37 = vmul.f32 %v146_v34, %v63_v36  ;;  %v61_v38 = vsel %vm60_vm4, %v144_v28, %v57_v35 }
 0x108   :  { %v72_v41 = vmul.f32 %v61_v38, %v38_v13 }
 0x109   :  { %v65_v39 = vmul.f32 0.5, %v64_v37 }
 0x10a   :  { %v77_v46 = vmul.f32 %v139_v42, %v72_v41 }
 0x10b   :  { %v66_v40 = vsub.f32 1.5, %v65_v39 }
 0x10c   :  { %v82_v49 = vadd.f32 %v140_v47, %v77_v46 }
 0x10d   :  { %v67_v43 = vmul.f32 %v146_v34, %v66_v40 }
 0x10f   :  { %v71_v44 = vsel %vm70_vm7, %v146_v34, %v67_v43 }
 0x110   :  { %v73_v45 = vmul.f32 %v71_v44, %v39_v18 }
 0x112   :  { %v78_v48 = vmul.f32 %v139_v42, %v73_v45 }
 0x114   :  { %v83_v50 = vadd.f32 %v140_v47, %v78_v48 }
 0x116   :  { %v84_v51 = vpack.c.bf16 %v83_v50, %v82_v49 }
 0x118   :  { %135 = vmatmul.msk.bf16.vlgmr.msra.gmra.mxu0 %vm22_vm0, %v84_v51 }
 0x195   :  { %v113_v52 = vpop.f32.mrf.mxu0 }
 0x196   :  { %v118_v53 = vpack.c.bf16 %v113_v52, %v113_v52 }
 0x198   :  { %121 = vst.msk [vmem:[%s206_s4] sm:$0xf] %vm120_vm8, %v118_v53 }
 0x19d   :  { %v115_v54 = vpop.f32.mrf.mxu0 }
 0x19e   :  { %v119_v55 = vpack.c.bf16 %v115_v54, %v115_v54 }
 0x1a0   :  { %122 = vst.msk [vmem:[%s206_s4 + $0x4] sm:$0xf] %vm120_vm8, %v119_v55 }

// kernel: block_forward.7
= control target key start
LH: loop header
LB: loop body
LE: loop exit
PB: predicated region body
PF: predicated region fallthrough
CT: control target
= control target key end

     0   :  { %s491_s12 = smov 0   ;;  %s493_s13 = smov 0   ;;  %s533_s0 = inlined_call_operand.vmem [shape: bf16[2,32,8], index: 0, kind: input, shape index: {}]   ;;  %s534_s1 = inlined_call_operand.vmem [shape: f32[2,8,32], index: 1, kind: input, shape index: {}]   ;;  %s535_s2 = inlined_call_operand.vmem [shape: bf16[32,32], index: 2, kind: input, shape index: {}]   ;;  %s536_s3 = inlined_call_operand.vmem [shape: f32[2,8,32], index: 3, kind: output, shape index: {}]  }
   0x1   :  { %s495_s14 = smov 0  }
   0x2 LB: > { %s25_s15 = sadd.s32 1, %s465_s13  ;;  %p393_p0 = scmp.ge.s32.totalorder %s469_s14, 1  ;;  %s469_s14 = sphi %s495_s14, %s13_s14   ;;  %s465_s13 = sphi %s493_s13, %s538_s13   ;;  %s461_s12 = sphi %s491_s12, %s537_s12  }
   0x3   : > { %p27_p1 = scmp.ge.s32.totalorder %s25_s15, 2  ;;  %p170_p2 = scmp.lt.s32.totalorder %s469_s14, 3 }
   0x5   : > { %s540_s15 = smov (%p27_p1, %s25_s15), 0  ;;  %p171_p3 = pnand %p393_p0, %p170_p2 }
   0x6   : > { %p206_p4 = scmp.lt.s32.totalorder (!%p171_p3), %s461_s12, 1 }
   0x7   : > { %174 = sbr.rel (%p171_p3) target bundleno = 323 (0x143), region = 32 }
   0xc   : > { %v421_v0 = vld [vmem:[%s535_s2 + $0x8] sm:$0xff]  ;;  %s542_s12 = smov (!%p206_p4, %s461_s12), 1  ;;  %v420_v1 = vld [vmem:[%s535_s2] sm:$0xff]  ;;  %vm277_vm0 = vcmask 261120  }
   0xd   : > { %287 = vmatpush.bf16.msra.mxu0 %v421_v0  ;;  %s417_s20 = sshll.u32 %s542_s12, 4  ;;  %s396_s24 = sshll.u32 %s542_s12, 3 }
   0xe   : > { %s213_s23 = scalar_lea.vmem %s533_s0, %s417_s20  ;;  %s220_s27 = scalar_lea.vmem %s534_s1, %s396_s24 }
   0xf   : > { %v418_v2 = vld [vmem:[%s213_s23] sm:$0xff]  ;;  %v419_v3 = vld [vmem:[%s213_s23 + $0x8] sm:$0xff]  ;;  %s227_s30 = scalar_lea.vmem %s536_s3, %s396_s24 }
  0x10   : > { %249 = vxpose.xlu0.c.b16.start [1/2] (short) (narrow) %v418_v2, 16  ;;  %v294_v5 = vld [vmem:[%s220_s27] sm:$0xff] }
  0x11   : > { %288 = vmatpush.bf16.msra.mxu0 %v420_v1 }
  0x20   : > { %250 = vxpose.xlu0.c.b16.end [2/2] (short) (narrow) %v419_v3, 16 }
  0xbc   : > { %v257_v4 = vpop.trf.xlu0 }
  0xbd   : > { %414 = vmatmul.msk.bf16.vlgmr.msra.gmra.mxu0 %vm277_vm0, %v257_v4 }
 0x13a   : > { %v290_v6 = vpop.f32.mrf.mxu0 }
 0x13b   : > { %v295_v7 = vadd.f32 %v294_v5, %v290_v6 }
 0x13d   : > { %296 = vst.msk [vmem:[%s227_s30] sm:$0xff] %vm277_vm0, %v295_v7 }
 0x142   : > { %v292_v8 = vpop.f32.mrf.mxu0 }
 0x143 PF: > { %s13_s14 = sadd.s32 1, %s469_s14   ;;  %s537_s12 = smov %s465_s13 }
 0x144   : > { %p10_p5 = scmp.ge.s32.totalorder %s13_s14, 4   ;;  %s538_s13 = smov %s540_s15 }
 0x146   :  { %12 = sbr.rel (!%p10_p5) target bundleno = 2 (0x2), region = 65 }

// kernel: block_forward.8
= control target key start
LH: loop header
LB: loop body
LE: loop exit
PB: predicated region body
PF: predicated region fallthrough
CT: control target
= control target key end

     0   :  { %vm25_vm0 = vcmask 261120   ;;  %v153_v4 = vmov 32.0   ;;  %vm125_vm8 = vcmask 64512   ;;  %s216_s0 = inlined_call_operand.vmem [shape: f32[16,32], index: 0, kind: input, shape index: {}]   ;;  %s217_s1 = inlined_call_operand.vmem [shape: f32[1,32], index: 1, kind: input, shape index: {}]   ;;  %s218_s2 = inlined_call_operand.vmem [shape: f32[1,32], index: 2, kind: input, shape index: {}]   ;;  %s219_s4 = inlined_call_operand.vmem [shape: f32[1,8], index: 4, kind: input, shape index: {}]   ;;  %s220_s3 = inlined_call_operand.vmem [shape: bf16[32,8], index: 3, kind: input, shape index: {}]   ;;  %s221_s5 = inlined_call_operand.vmem [shape: f32[16,8], index: 5, kind: output, shape index: {}]  }
   0x1   :  { %v21_v0 = vld [vmem:[%s216_s0] sm:$0xff]  ;;  %v22_v2 = vld [vmem:[%s216_s0 + $0x8] sm:$0xff]  ;;  %147 = vrcp.f32 %v153_v4 }
   0x2   :  { %v26_v1 = vsel %vm25_vm0, %v21_v0, 0.0  ;;  %v29_v3 = vsel %vm25_vm0, %v22_v2, 0.0  ;;  %v142_v21 = vld [vmem:[%s220_s3 + $0x8] sm:$0xff]  ;;  %v141_v23 = vld [vmem:[%s220_s3] sm:$0xff] }
   0x3   :  { %27 = vadd.xlane.f32.xlu0 %v26_v1  ;;  %117 = vmatpush.bf16.msra.mxu0 %v142_v21  ;;  %v144_v42 = vld [vmem:[%s217_s1] ss:$0 sm:$0xff] }
   0x4   :  { %v145_v47 = vld [vmem:[%s218_s2] ss:$0 sm:$0xff] }
   0x5   :  { %v146_v52 = vld [vmem:[%s219_s4] ss:$0 sm:$0xff] }
   0x7   :  { %v148_v5 = vpop.eup %147  ;;  %118 = vmatpush.bf16.msra.mxu0 %v141_v23 }
   0x8   :  { %v33_v6 = vmul.f32 32.0, %v148_v5  ;;  %vm37_vm1 = vweird.f32 %v148_v5 }
   0xa   :  { %v34_v7 = vsub.f32 1.0, %v33_v6 }
   0xb   :  { %30 = vadd.xlane.f32.xlu0 %v29_v3 }
   0xc   :  { %v35_v8 = vmul.f32 %v148_v5, %v34_v7 }
   0xe   :  { %v36_v9 = vadd.f32 %v148_v5, %v35_v8 }
  0x10   :  { %v38_v10 = vsel %vm37_vm1, %v148_v5, %v36_v9 }
  0x76   :  { %v28_v11 = vpop.xlane.xlu0 %27 }
  0x77   :  { %v39_v12 = vmul.f32 %v38_v10, %v28_v11 }
  0x79   :  { %v41_v13 = vsub.f32 %v21_v0, %v39_v12 }
  0x7b   :  { %v43_v14 = vmul.f32 %v41_v13, %v41_v13 }
  0x7d   :  { %v45_v15 = vsel %vm25_vm0, %v43_v14, 0.0 }
  0x7e   :  { %46 = vadd.xlane.f32.xlu1 %v45_v15  ;;  %v31_v16 = vpop.xlane.xlu0 %30 }
  0x7f   :  { %v40_v17 = vmul.f32 %v38_v10, %v31_v16 }
  0x81   :  { %v42_v18 = vsub.f32 %v22_v2, %v40_v17 }
  0x83   :  { %v44_v19 = vmul.f32 %v42_v18, %v42_v18 }
  0x85   :  { %v48_v20 = vsel %vm25_vm0, %v44_v19, 0.0 }
  0x86   :  { %49 = vadd.xlane.f32.xlu1 %v48_v20 }
  0xf1   :  { %v47_v22 = vpop.xlane.xlu1 %46 }
  0xf2   :  { %v51_v24 = vmul.f32 %v47_v22, %v38_v10 }
  0xf4   :  { %v53_v25 = vadd.f32 1e-05, %v51_v24 }
  0xf6   :  { %149 = vrsqrt.f32 %v53_v25  ;;  %vm61_vm3 = vweird.f32 %v53_v25 }
  0xf9   :  { %v50_v26 = vpop.xlane.xlu1 %49 }
  0xfa   :  { %v52_v27 = vmul.f32 %v50_v26, %v38_v10 }
  0xfc   :  { %v150_v28 = vpop.eup %149  ;;  %v54_v29 = vadd.f32 1e-05, %v52_v27 }
  0xfd   :  { %v56_v30 = vmul.f32 %v150_v28, %v53_v25  ;;  %vm62_vm2 = vweird.f32 %v150_v28 }
  0xfe   :  { %151 = vrsqrt.f32 %v54_v29  ;;  %vm63_vm4 = vmor %vm61_vm3, %vm62_vm2  ;;  %vm71_vm6 = vweird.f32 %v54_v29 }
  0xff   :  { %v57_v31 = vmul.f32 %v150_v28, %v56_v30 }
 0x101   :  { %v58_v32 = vmul.f32 0.5, %v57_v31 }
 0x103   :  { %v59_v33 = vsub.f32 1.5, %v58_v32 }
 0x104   :  { %v152_v34 = vpop.eup %151 }
 0x105   :  { %v60_v35 = vmul.f32 %v150_v28, %v59_v33  ;;  %v66_v36 = vmul.f32 %v152_v34, %v54_v29  ;;  %vm72_vm5 = vweird.f32 %v152_v34 }
 0x106   :  { %vm73_vm7 = vmor %vm71_vm6, %vm72_vm5 }
 0x107   :  { %v67_v37 = vmul.f32 %v152_v34, %v66_v36  ;;  %v64_v38 = vsel %vm63_vm4, %v150_v28, %v60_v35 }
 0x108   :  { %v75_v41 = vmul.f32 %v64_v38, %v41_v13 }
 0x109   :  { %v68_v39 = vmul.f32 0.5, %v67_v37 }
 0x10a   :  { %v80_v46 = vmul.f32 %v144_v42, %v75_v41 }
 0x10b   :  { %v69_v40 = vsub.f32 1.5, %v68_v39 }
 0x10c   :  { %v85_v49 = vadd.f32 %v145_v47, %v80_v46 }
 0x10d   :  { %v70_v43 = vmul.f32 %v152_v34, %v69_v40 }
 0x10f   :  { %v74_v44 = vsel %vm73_vm7, %v152_v34, %v70_v43 }
 0x110   :  { %v76_v45 = vmul.f32 %v74_v44, %v42_v18 }
 0x112   :  { %v81_v48 = vmul.f32 %v144_v42, %v76_v45 }
 0x114   :  { %v86_v50 = vadd.f32 %v145_v47, %v81_v48 }
 0x116   :  { %v87_v51 = vpack.c.bf16 %v86_v50, %v85_v49 }
 0x118   :  { %140 = vmatmul.msk.bf16.vlgmr.msra.gmra.mxu0 %vm25_vm0, %v87_v51 }
 0x195   :  { %v120_v53 = vpop.f32.mrf.mxu0 }
 0x196   :  { %v121_v54 = vadd.f32 %v146_v52, %v120_v53 }
 0x198   :  { %126 = vst.msk [vmem:[%s221_s5] sm:$0xff] %vm125_vm8, %v121_v54 }
 0x19d   :  { %v122_v55 = vpop.f32.mrf.mxu0 }
 0x19e   :  { %v123_v56 = vadd.f32 %v146_v52, %v122_v55 }
 0x1a0   :  { %127 = vst.msk [vmem:[%s221_s5 + $0x8] sm:$0xff] %vm125_vm8, %v123_v56 }

// kernel: block_forward.6
= control target key start
LH: loop header
LB: loop body
LE: loop exit
PB: predicated region body
PF: predicated region fallthrough
CT: control target
= control target key end

     0   :  { %s1942_s12 = smov 0   ;;  %s1944_s13 = smov 0   ;;  %s2482_s0 = inlined_call_operand.vmem [shape: bf16[2,8,3,4,8], index: 0, kind: input, shape index: {}, may-alias: {0,1,2}]   ;;  %s2483_s1 = inlined_call_operand.vmem [shape: bf16[2,8,3,4,8], index: 1, kind: input, shape index: {}, may-alias: {0,1,2}]   ;;  %s2484_s2 = inlined_call_operand.vmem [shape: bf16[2,8,3,4,8], index: 2, kind: input, shape index: {}, may-alias: {0,1,2}]   ;;  %s2485_s3 = inlined_call_operand.vmem [shape: bf16[2,4,8,8], index: 3, kind: output, shape index: {}]  }
   0x1   :  { %s1946_s14 = smov 0   ;;  %s1948_s15 = smov 0  }
   0x2   :  { %s1950_s16 = smov 0  }
   0x3 LB: > { %s32_s17 = sadd.s32 1, %s1913_s15  ;;  %p48_p1 = scmp.ne.s32.totalorder %s1905_s13, %s1901_s12  ;;  %s1917_s16 = sphi %s1950_s16, %s13_s16   ;;  %s1913_s15 = sphi %s1948_s15, %s2490_s15   ;;  %s1909_s14 = sphi %s1946_s14, %s2489_s14   ;;  %s1905_s13 = sphi %s1944_s13, %s2488_s13   ;;  %s1901_s12 = sphi %s1942_s12, %s2487_s12  }
   0x4   : > { %p34_p0 = scmp.ge.s32.totalorder %s32_s17, 2  ;;  %p49_p2 = scmp.eq.s32.totalorder %s1917_s16, 0 }
   0x5   : > { %s41_s20 = sadd.s32 1, %s1905_s13  ;;  %p1768_p5 = scmp.ge.s32.totalorder %s1917_s16, 2 }
   0x6   : > { %s2492_s17 = smov (%p34_p0, %s32_s17), 0  ;;  %p1973_p3 = por %p49_p2, %p48_p1 }
   0x7   : > { %s36_s19 = ssub.s32 %s1913_s15, %s2492_s17  ;;  %158 = sbr.rel (%p1768_p5) target bundleno = 51 (0x33), region = 16 }
   0x8   : > { %p39_p4 = scmp.eq.s32.totalorder %s36_s19, 0 }
   0xa   : > { %s1981_s21 = scalar_select %p39_p4, %s1905_s13, %s41_s20  }
   0xc   : > { %161 = sbr.rel (!%p1973_p3) target bundleno = 25 (0x19), region = 20  ;;  %s163_s22 = sand.u32 (%p1973_p3), 1, %s1905_s13  }
   0xd   : > { %s1808_s23 = smul.u32 (%p1973_p3), 48, %s1913_s15  ;;  %s1769_s24 = sshll.u32 (%p1973_p3), %s163_s22, 4 }
   0xe   : > { %s165_s28 = scalar_lea.vmem (%p1973_p3), [#allocation5], %s1769_s24 }
   0xf   : > { %s171_s27 = scalar_lea.vmem (%p1973_p3), %s2482_s0, %s1808_s23 }
  0x10   : > { %v188_v0 = vld [vmem:[%s171_s27] sm:$0x3] (%p1973_p3)  ;;  %v190_v1 = vld [vmem:[%s171_s27 + $0x6] sm:$0x3] (%p1973_p3)  ;;  %v192_v2 = vld [vmem:[%s171_s27 + $0xc] sm:$0x3] (%p1973_p3) }
  0x11   : > { %189 = vst [vmem:[%s165_s28] sm:$0x3] %v188_v0  ;;  %v194_v3 = vld [vmem:[%s171_s27 + $0x12] sm:$0x3]  ;;  %v196_v4 = vld [vmem:[%s171_s27 + $0x18] sm:$0x3] }
  0x12   : > { %191 = vst [vmem:[%s165_s28 + $0x2] sm:$0x3] %v190_v1  ;;  %v198_v5 = vld [vmem:[%s171_s27 + $0x1e] sm:$0x3]  ;;  %v200_v6 = vld [vmem:[%s171_s27 + $0x24] sm:$0x3] }
  0x13   : > { %193 = vst [vmem:[%s165_s28 + $0x4] sm:$0x3] %v192_v2  ;;  %v202_v7 = vld [vmem:[%s171_s27 + $0x2a] sm:$0x3] }
  0x14   : > { %195 = vst [vmem:[%s165_s28 + $0x6] sm:$0x3] %v194_v3 }
  0x15   : > { %197 = vst [vmem:[%s165_s28 + $0x8] sm:$0x3] %v196_v4 }
  0x16   : > { %199 = vst [vmem:[%s165_s28 + $0xa] sm:$0x3] %v198_v5 }
  0x17   : > { %201 = vst [vmem:[%s165_s28 + $0xc] sm:$0x3] %v200_v6 }
  0x18   : > { %203 = vst [vmem:[%s165_s28 + $0xe] sm:$0x3] %v202_v7 }
  0x19 PF: > { %243 = sbr.rel (!%p1973_p3) target bundleno = 38 (0x26), region = 61  ;;  %s245_s29 = sand.u32 (%p1973_p3), 1, %s1905_s13  }
  0x1a   : > { %s1772_s30 = smul.u32 (%p1973_p3), 48, %s1913_s15  ;;  %s1771_s4 = sshll.u32 (%p1973_p3), %s245_s29, 4 }
  0x1b   : > { %s247_s8 = scalar_lea.vmem (%p1973_p3), [#allocation6], %s1771_s4 }
  0x1c   : > { %s1672_s7 = scalar_lea.vmem (%p1973_p3), %s2483_s1, %s1772_s30 }
  0x1d   : > { %v1773_v8 = vld [vmem:[%s1672_s7 + $0x2] sm:$0x3] (%p1973_p3)  ;;  %v1774_v9 = vld [vmem:[%s1672_s7 + $0x8] sm:$0x3] (%p1973_p3)  ;;  %v1775_v10 = vld [vmem:[%s1672_s7 + $0xe] sm:$0x3] (%p1973_p3) }
  0x1e   : > { %272 = vst [vmem:[%s247_s8] sm:$0x3] %v1773_v8  ;;  %v1776_v11 = vld [vmem:[%s1672_s7 + $0x14] sm:$0x3]  ;;  %v1777_v12 = vld [vmem:[%s1672_s7 + $0x1a] sm:$0x3] }
  0x1f   : > { %274 = vst [vmem:[%s247_s8 + $0x2] sm:$0x3] %v1774_v9  ;;  %v1778_v13 = vld [vmem:[%s1672_s7 + $0x20] sm:$0x3]  ;;  %v1779_v14 = vld [vmem:[%s1672_s7 + $0x26] sm:$0x3] }
  0x20   : > { %276 = vst [vmem:[%s247_s8 + $0x4] sm:$0x3] %v1775_v10  ;;  %v1780_v15 = vld [vmem:[%s1672_s7 + $0x2c] sm:$0x3] }
  0x21   : > { %278 = vst [vmem:[%s247_s8 + $0x6] sm:$0x3] %v1776_v11 }
  0x22   : > { %280 = vst [vmem:[%s247_s8 + $0x8] sm:$0x3] %v1777_v12 }
  0x23   : > { %282 = vst [vmem:[%s247_s8 + $0xa] sm:$0x3] %v1778_v13 }
  0x24   : > { %284 = vst [vmem:[%s247_s8 + $0xc] sm:$0x3] %v1779_v14 }
  0x25   : > { %286 = vst [vmem:[%s247_s8 + $0xe] sm:$0x3] %v1780_v15 }
  0x26 PF: > { %326 = sbr.rel (!%p1973_p3) target bundleno = 51 (0x33), region = 102  ;;  %s328_s9 = sand.u32 (%p1973_p3), 1, %s1905_s13  }
  0x27   : > { %s1782_s10 = smul.u32 (%p1973_p3), 48, %s1913_s15  ;;  %s1781_s11 = sshll.u32 (%p1973_p3), %s328_s9, 4 }
  0x28   : > { %s330_s23 = scalar_lea.vmem (%p1973_p3), [#allocation7], %s1781_s11 }
  0x29   : > { %s1680_s22 = scalar_lea.vmem (%p1973_p3), %s2484_s2, %s1782_s10 }
  0x2a   : > { %v1783_v16 = vld [vmem:[%s1680_s22 + $0x4] sm:$0x3] (%p1973_p3)  ;;  %v1784_v17 = vld [vmem:[%s1680_s22 + $0xa] sm:$0x3] (%p1973_p3)  ;;  %v1785_v18 = vld [vmem:[%s1680_s22 + $0x10] sm:$0x3] (%p1973_p3) }
  0x2b   : > { %355 = vst [vmem:[%s330_s23] sm:$0x3] %v1783_v16  ;;  %v1786_v19 = vld [vmem:[%s1680_s22 + $0x16] sm:$0x3]  ;;  %v1787_v20 = vld [vmem:[%s1680_s22 + $0x1c] sm:$0x3] }
  0x2c   : > { %357 = vst [vmem:[%s330_s23 + $0x2] sm:$0x3] %v1784_v17  ;;  %v1788_v21 = vld [vmem:[%s1680_s22 + $0x22] sm:$0x3]  ;;  %v1789_v22 = vld [vmem:[%s1680_s22 + $0x28] sm:$0x3] }
  0x2d   : > { %359 = vst [vmem:[%s330_s23 + $0x4] sm:$0x3] %v1785_v18  ;;  %v1790_v23 = vld [vmem:[%s1680_s22 + $0x2e] sm:$0x3] }
  0x2e   : > { %361 = vst [vmem:[%s330_s23 + $0x6] sm:$0x3] %v1786_v19 }
  0x2f   : > { %363 = vst [vmem:[%s330_s23 + $0x8] sm:$0x3] %v1787_v20 }
  0x30   : > { %365 = vst [vmem:[%s330_s23 + $0xa] sm:$0x3] %v1788_v21 }
  0x31   : > { %367 = vst [vmem:[%s330_s23 + $0xc] sm:$0x3] %v1789_v22 }
  0x32   : > { %369 = vst [vmem:[%s330_s23 + $0xe] sm:$0x3] %v1790_v23 }
  0x33 PF: > { %p1791_p6 = scmp.ge.s32.totalorder %s1917_s16, 1  ;;  %p408_p7 = scmp.lt.s32.totalorder %s1917_s16, 3 }
  0x35   : > { %p409_p8 = pnand %p1791_p6, %p408_p7 }
  0x36   : > { %s415_s18 = sand.u32 (!%p409_p8), 1, %s1901_s12   ;;  %p466_p9 = scmp.lt.s32.totalorder (!%p409_p8), %s1909_s14, 1 }
  0x37   : > { %412 = sbr.rel (%p409_p8) target bundleno = 1101 (0x44d), region = 143  ;;  %s2008_s24 = sshll.u32 (!%p409_p8), %s415_s18, 4 }
  0x38   : > { %s2011_s25 = scalar_lea.vmem (!%p409_p8), [#allocation6], %s2008_s24  ;;  %s2016_s26 = scalar_lea.vmem (!%p409_p8), [#allocation5], %s2008_s24 }
  0x39   : > { %s2038_s12 = scalar_lea.vmem (!%p409_p8), [#allocation7], %s2008_s24 }
  0x3c   : > { %v541_v24 = vld [vmem:[%s2011_s25] sm:$0x1]  ;;  %v542_v25 = vld [vmem:[%s2011_s25 + $0x2] sm:$0x1]  ;;  %v511_v27 = vld [vmem:[%s2016_s26 + $0x4] sm:$0x1] }
  0x3d   : > { %596 = vst [vmem:[#allocation1] ss:$4 sm:$0xff] %v541_v24  ;;  %v510_v26 = vld [vmem:[%s2016_s26 + $0x2] sm:$0x1]  ;;  %v509_v29 = vld [vmem:[%s2016_s26] sm:$0x1]  ;;  %v519_v34 = vunpack.c.l.bf16 %v511_v27 }
  0x3e   : > { %601 = vst [vmem:[#allocation1 + $0x20] ss:$4 sm:$0xff] %v542_v25  ;;  %v518_v28 = vunpack.c.l.bf16 %v510_v26  ;;  %v543_v30 = vld [vmem:[%s2011_s25 + $0x4] sm:$0x1]  ;;  %v544_v31 = vld [vmem:[%s2011_s25 + $0x6] sm:$0x1]  ;;  %v517_v36 = vunpack.c.l.bf16 %v509_v29 }
  0x3f   : > { %v512_v32 = vld [vmem:[%s2016_s26 + $0x6] sm:$0x1]  ;;  %v513_v33 = vld [vmem:[%s2016_s26 + $0x8] sm:$0x1]  ;;  %v527_v40 = vmul.f32 0.35355338, %v519_v34 }
  0x40   : > { %v526_v37 = vmul.f32 0.35355338, %v518_v28  ;;  %v520_v39 = vunpack.c.l.bf16 %v512_v32  ;;  %v521_v41 = vunpack.c.l.bf16 %v513_v33  ;;  %v525_v42 = vmul.f32 0.35355338, %v517_v36  ;;  %v514_v44 = vld [vmem:[%s2016_s26 + $0xa] sm:$0x1] }
  0x41   : > { %v545_v45 = vld [vmem:[%s2011_s25 + $0x8] sm:$0x1]  ;;  %v546_v48 = vld [vmem:[%s2011_s25 + $0xa] sm:$0x1]  ;;  %v515_v49 = vld [vmem:[%s2016_s26 + $0xc] sm:$0x1]  ;;  %v535_v50 = vpack.c.bf16 %v527_v40, %v527_v40  ;;  %v522_v52 = vunpack.c.l.bf16 %v514_v44 }
  0x42   : > { %v534_v43 = vpack.c.bf16 %v526_v37, %v526_v37  ;;  %v528_v47 = vmul.f32 0.35355338, %v520_v39  ;;  %v529_v53 = vmul.f32 0.35355338, %v521_v41  ;;  %v533_v54 = vpack.c.bf16 %v525_v42, %v525_v42  ;;  %v516_v61 = vld [vmem:[%s2016_s26 + $0xe] sm:$0x1] }
  0x43   : > { %vm574_vm0 = vcmask 1041409   ;;  %v523_v62 = vunpack.c.l.bf16 %v515_v49  ;;  %v567_v63 = vunpack.c.l.b16 %v535_v50  ;;  %v530_v1 = vmul.f32 0.35355338, %v522_v52  ;;  %v547_v6 = vld [vmem:[%s2011_s25 + $0xc] sm:$0x1]  ;;  %s2494_s14 = smov (!%p466_p9, %s1909_s14), 1 }
  0x44   : > { %v597_v35 = vld.sshfl [vmem:[#allocation1] sm:$0xff pattern:$0x73625140]  ;;  %v566_v55 = vunpack.c.l.b16 %v534_v43  ;;  %v536_v60 = vpack.c.bf16 %v528_v47, %v528_v47  ;;  %v565_v2 = vunpack.c.l.b16 %v533_v54  ;;  %v537_v5 = vpack.c.bf16 %v529_v53, %v529_v53  ;;  %v550_v34 = vld [vmem:[%s2038_s12 + $0x2] sm:$0x1]  ;;  %s1807_s27 = sshll.u32 %s2494_s14, 4 }
  0x45   : > { %v602_v38 = vld.sshfl [vmem:[#allocation1 + $0x20] sm:$0xff pattern:$0x73625140]  ;;  %605 = vst [vmem:[#allocation1] ss:$4 sm:$0xff] %v543_v30  ;;  %v628_v58 = vunpack.c.l.b16 %v597_v35  ;;  %vm577_vm1 = vcmask 1042434   ;;  %v524_v8 = vunpack.c.l.bf16 %v516_v61  ;;  %v538_v15 = vpack.c.bf16 %v530_v1, %v530_v1  ;;  %s2454_s30 = scalar_lea.vmem %s2485_s3, %s1807_s27 }
  0x46   : > { %609 = vst [vmem:[#allocation1 + $0x20] ss:$4 sm:$0xff] %v544_v31  ;;  %v629_v46 = vunpack.c.l.b16 %v602_v38  ;;  %v573_v3 = vrot.slane %v566_v55, 7  ;;  %v568_v9 = vunpack.c.l.b16 %v536_v60  ;;  %v548_v10 = vld [vmem:[%s2011_s25 + $0xe] sm:$0x1]  ;;  %v576_v12 = vrot.slane %v567_v63, 6 }
  0x47   : > { %v531_v11 = vmul.f32 0.35355338, %v523_v62  ;;  %vm580_vm2 = vcmask 1043459   ;;  %v569_v20 = vunpack.c.l.b16 %v537_v5  ;;  %v532_v22 = vmul.f32 0.35355338, %v524_v8 }
  0x48   : > { %v636_v59 = vrot.slane %v629_v46, 7  ;;  %v575_v16 = vsel %vm574_vm0, %v573_v3, %v565_v2  ;;  %v579_v23 = vrot.slane %v568_v9, 5  ;;  %vm583_vm3 = vcmask 1044484   ;;  %v549_v30 = vld [vmem:[%s2038_s12] sm:$0x1] }
  0x49   : > { %v539_v25 = vpack.c.bf16 %v531_v11, %v531_v11  ;;  %v578_v26 = vsel %vm577_vm1, %v576_v12, %v575_v16  ;;  %v570_v28 = vunpack.c.l.b16 %v538_v15  ;;  %v582_v29 = vrot.slane %v569_v20, 4  ;;  %v551_v52 = vld [vmem:[%s2038_s12 + $0x4] sm:$0x1]  ;;  %v552_v55 = vld [vmem:[%s2038_s12 + $0x6] sm:$0x1] }
  0x4a   : > { %v637_v7 = vsel %vm574_vm0, %v636_v59, %v628_v58  ;;  %v540_v32 = vpack.c.bf16 %v532_v22, %v532_v22  ;;  %v581_v33 = vsel %vm580_vm2, %v579_v23, %v578_v26  ;;  %vm586_vm4 = vcmask 1045509   ;;  %v553_v61 = vld [vmem:[%s2038_s12 + $0x8] sm:$0x1]  ;;  %v554_v62 = vld [vmem:[%s2038_s12 + $0xa] sm:$0x1] }
  0x4b   : > { %v571_v36 = vunpack.c.l.b16 %v539_v25  ;;  %v585_v38 = vrot.slane %v570_v28, 3  ;;  %v584_v41 = vsel %vm583_vm3, %v582_v29, %v581_v33  ;;  %vm589_vm5 = vcmask 1046534   ;;  %v555_v1 = vld [vmem:[%s2038_s12 + $0xc] sm:$0x1]  ;;  %v556_v2 = vld [vmem:[%s2038_s12 + $0xe] sm:$0x1] }
  0x4c   : > { %v606_v51 = vld.sshfl [vmem:[#allocation1] sm:$0xff pattern:$0x73625140]  ;;  %v572_v44 = vunpack.c.l.b16 %v540_v32  ;;  %vm592_vm6 = vcmask 1047559   ;;  %vm488_vm7 = vcmask 64512   ;;  %vm479_vm9 = vcmask 7168  }
  0x4d   : > { %v610_v56 = vld.sshfl [vmem:[#allocation1 + $0x20] sm:$0xff pattern:$0x73625140]  ;;  %613 = vst [vmem:[#allocation1] ss:$4 sm:$0xff] %v545_v45  ;;  %v630_v57 = vunpack.c.l.b16 %v606_v51  ;;  %v588_v46 = vrot.slane %v571_v36, 2 }
  0x4e   : > { %617 = vst [vmem:[#allocation1 + $0x20] ss:$4 sm:$0xff] %v546_v48  ;;  %v631_v0 = vunpack.c.l.b16 %v610_v56  ;;  %v587_v48 = vsel %vm586_vm4, %v585_v38, %v584_v41  ;;  %v591_v51 = vrot.slane %v572_v44, 1  ;;  %v815_v5 = vld [vmem:[%s2011_s25] sm:$0x1]  ;;  %vm763_vm10 = vcmask 1043456  }
  0x4f   : > { %v638_v4 = vrot.slane %v630_v57, 6  ;;  %v590_v54 = vsel %vm589_vm5, %v588_v46, %v587_v48  ;;  %v817_v9 = vld [vmem:[%s2011_s25 + $0x4] sm:$0x1]  ;;  %v824_v22 = vld [vmem:[%s2038_s12 + $0x2] sm:$0x1]  ;;  %vm1627_vm11 = vcmask 60416  }
  0x50   : > { %v640_v14 = vrot.slane %v631_v0, 5  ;;  %v593_v59 = vsel %vm592_vm6, %v591_v51, %v590_v54  ;;  %v825_v25 = vld [vmem:[%s2038_s12 + $0x4] sm:$0x1]  ;;  %v826_v26 = vld [vmem:[%s2038_s12 + $0x6] sm:$0x1] }
  0x51   : > { %v639_v19 = vsel %vm577_vm1, %v638_v4, %v637_v7  ;;  %v594_v60 = vpack.c.b16 %v593_v59, %v593_v59  ;;  %v816_v7 = vld [vmem:[%s2011_s25 + $0x2] sm:$0x1]  ;;  %v827_v29 = vld [vmem:[%s2038_s12 + $0x8] sm:$0x1]  ;;  %v829_v33 = vld [vmem:[%s2038_s12 + $0xc] sm:$0x1] }
  0x52   : > { %v641_v27 = vsel %vm580_vm2, %v640_v14, %v639_v19  ;;  %v820_v14 = vld [vmem:[%s2011_s25 + $0xa] sm:$0x1]  ;;  %v1084_v41 = vld [vmem:[%s2011_s25 + $0x4] sm:$0x2]  ;;  %v1087_v46 = vld [vmem:[%s2011_s25 + $0xa] sm:$0x2] }
  0x53   : > { %v783_v54 = vld [vmem:[%s2016_s26] sm:$0x1] }
  0x54   : > { %v614_v13 = vld.sshfl [vmem:[#allocation1] sm:$0xff pattern:$0x73625140] }
  0x55   : > { %v618_v17 = vld.sshfl [vmem:[#allocation1 + $0x20] sm:$0xff pattern:$0x73625140]  ;;  %621 = vst [vmem:[#allocation1] ss:$4 sm:$0xff] %v547_v6  ;;  %v632_v18 = vunpack.c.l.b16 %v614_v13 }
  0x56   : > { %625 = vst [vmem:[#allocation1 + $0x20] ss:$4 sm:$0xff] %v548_v10  ;;  %v633_v21 = vunpack.c.l.b16 %v618_v17  ;;  %v818_v10 = vld [vmem:[%s2011_s25 + $0x6] sm:$0x1]  ;;  %v819_v13 = vld [vmem:[%s2011_s25 + $0x8] sm:$0x1] }
  0x57   : > { %v642_v24 = vrot.slane %v632_v18, 4  ;;  %v821_v17 = vld [vmem:[%s2011_s25 + $0xc] sm:$0x1]  ;;  %v822_v18 = vld [vmem:[%s2011_s25 + $0xe] sm:$0x1] }
  0x58   : > { %v644_v31 = vrot.slane %v633_v21, 3  ;;  %v823_v21 = vld [vmem:[%s2038_s12] sm:$0x1] }
  0x59   : > { %v643_v35 = vsel %vm583_vm3, %v642_v24, %v641_v27 }
  0x5a   : > { %v645_v43 = vsel %vm586_vm4, %v644_v31, %v643_v35 }
  0x5c   : > { %v622_v37 = vld.sshfl [vmem:[#allocation1] sm:$0xff pattern:$0x73625140] }
  0x5d   : > { %v626_v39 = vld.sshfl [vmem:[#allocation1 + $0x20] sm:$0xff pattern:$0x73625140]  ;;  %v634_v40 = vunpack.c.l.b16 %v622_v37  ;;  %705 = vst [vmem:[#allocation1] ss:$4 sm:$0xff] %v549_v30 }
  0x5e   : > { %v635_v42 = vunpack.c.l.b16 %v626_v39  ;;  %710 = vst [vmem:[#allocation1 + $0x20] ss:$4 sm:$0xff] %v550_v34  ;;  %v828_v30 = vld [vmem:[%s2038_s12 + $0xa] sm:$0x1]  ;;  %v830_v34 = vld [vmem:[%s2038_s12 + $0xe] sm:$0x1] }
  0x5f   : > { %v646_v45 = vrot.slane %v634_v40, 2  ;;  %v1082_v37 = vld [vmem:[%s2011_s25] sm:$0x2]  ;;  %v1083_v39 = vld [vmem:[%s2011_s25 + $0x2] sm:$0x2] }
  0x60   : > { %v648_v47 = vrot.slane %v635_v42, 1  ;;  %v1085_v42 = vld [vmem:[%s2011_s25 + $0x6] sm:$0x2] }
  0x61   : > { %v647_v49 = vsel %vm589_vm5, %v646_v45, %v645_v43  ;;  %v1086_v45 = vld [vmem:[%s2011_s25 + $0x8] sm:$0x2] }
  0x62   : > { %v649_v50 = vsel %vm592_vm6, %v648_v47, %v647_v49 }
  0x63   : > { %v650_v53 = vpack.c.b16 %v649_v50, %v649_v50 }
  0x64   : > { %v2052_v56 = vld.sshfl [vmem:[#allocation1] sm:$0xff pattern:$0x73625140] }
  0x65   : > { %v656_v57 = vsel %vm488_vm7, %v650_v53, 0  ;;  %v2055_v58 = vld.sshfl [vmem:[#allocation1 + $0x20] sm:$0xff pattern:$0x73625140]  ;;  %714 = vst [vmem:[#allocation1] ss:$4 sm:$0xff] %v551_v52 }
  0x66   : > { %665 = vmatpush.bf16.xpose.msra.mxu0 %v656_v57  ;;  %718 = vst [vmem:[#allocation1 + $0x20] ss:$4 sm:$0xff] %v552_v55  ;;  %v1088_v53 = vld [vmem:[%s2011_s25 + $0xc] sm:$0x2]  ;;  %v784_v55 = vld [vmem:[%s2016_s26 + $0x2] sm:$0x1] }
  0x67   : > { %v785_v57 = vld [vmem:[%s2016_s26 + $0x4] sm:$0x1] }
  0x6c   : > { %v2060_v63 = vld.sshfl [vmem:[#allocation1] sm:$0xff pattern:$0x73625140] }
  0x6d   : > { %1797 = vmatmul.msk.bf16.vlgmr.msra.gmra.mxu0 %vm488_vm7, %v594_v60  ;;  %v2063_v0 = vld.sshfl [vmem:[#allocation1 + $0x20] sm:$0xff pattern:$0x73625140]  ;;  %722 = vst [vmem:[#allocation1] ss:$4 sm:$0xff] %v553_v61 }
  0x6e   : > { %726 = vst [vmem:[#allocation1 + $0x20] ss:$4 sm:$0xff] %v554_v62 }
  0x74   : > { %v2067_v3 = vld.sshfl [vmem:[#allocation1] sm:$0xff pattern:$0x73625140] }
  0x75   : > { %v2069_v4 = vld.sshfl [vmem:[#allocation1 + $0x20] sm:$0xff pattern:$0x73625140]  ;;  %730 = vst [vmem:[#allocation1] ss:$4 sm:$0xff] %v555_v1 }
  0x76   : > { %734 = vst [vmem:[#allocation1 + $0x20] ss:$4 sm:$0xff] %v556_v2  ;;  %v1089_v1 = vld [vmem:[%s2011_s25 + $0xe] sm:$0x2]  ;;  %v786_v2 = vld [vmem:[%s2016_s26 + $0x6] sm:$0x1] }
  0x7c   : > { %v2072_v6 = vld.sshfl [vmem:[#allocation1] sm:$0xff pattern:$0x73625140] }
  0x7d   : > { %v2075_v8 = vld.sshfl [vmem:[#allocation1 + $0x20] sm:$0xff pattern:$0x73625140]  ;;  %863 = vst [vmem:[#allocation1] ss:$4 sm:$0xff] %v815_v5 }
  0x7e   : > { %868 = vst [vmem:[#allocation1 + $0x20] ss:$4 sm:$0xff] %v816_v7  ;;  %v787_v5 = vld [vmem:[%s2016_s26 + $0x8] sm:$0x1]  ;;  %v788_v7 = vld [vmem:[%s2016_s26 + $0xa] sm:$0x1] }
  0x84   : > { %v2079_v11 = vld.sshfl [vmem:[#allocation1] sm:$0xff pattern:$0x73625140] }
  0x85   : > { %v2081_v12 = vld.sshfl [vmem:[#allocation1 + $0x20] sm:$0xff pattern:$0x73625140]  ;;  %872 = vst [vmem:[#allocation1] ss:$4 sm:$0xff] %v817_v9  ;;  %v895_v49 = vunpack.c.l.b16 %v2079_v11 }
  0x86   : > { %876 = vst [vmem:[#allocation1 + $0x20] ss:$4 sm:$0xff] %v818_v10  ;;  %v896_v50 = vunpack.c.l.b16 %v2081_v12  ;;  %v789_v12 = vld [vmem:[%s2016_s26 + $0xc] sm:$0x1] }
  0x87   : > { %v903_v9 = vrot.slane %v895_v49, 1 }
  0x8c   : > { %v2085_v15 = vld.sshfl [vmem:[#allocation1] sm:$0xff pattern:$0x73625140] }
  0x8d   : > { %v2087_v16 = vld.sshfl [vmem:[#allocation1 + $0x20] sm:$0xff pattern:$0x73625140]  ;;  %880 = vst [vmem:[#allocation1] ss:$4 sm:$0xff] %v819_v13  ;;  %v897_v51 = vunpack.c.l.b16 %v2085_v15  ;;  %v791_v13 = vunpack.c.l.bf16 %v783_v54 }
  0x8e   : > { %884 = vst [vmem:[#allocation1 + $0x20] ss:$4 sm:$0xff] %v820_v14  ;;  %v898_v52 = vunpack.c.l.b16 %v2087_v16 }
  0x8f   : > { %v905_v10 = vrot.slane %v897_v51, 7 }
  0x90   : > { %v907_v11 = vrot.slane %v898_v52, 6 }
  0x94   : > { %v2091_v19 = vld.sshfl [vmem:[#allocation1] sm:$0xff pattern:$0x73625140] }
  0x95   : > { %v2093_v20 = vld.sshfl [vmem:[#allocation1 + $0x20] sm:$0xff pattern:$0x73625140]  ;;  %888 = vst [vmem:[#allocation1] ss:$4 sm:$0xff] %v821_v17  ;;  %v899_v59 = vunpack.c.l.b16 %v2091_v19  ;;  %v904_v19 = vsel %vm574_vm0, %v896_v50, %v903_v9 }
  0x96   : > { %892 = vst [vmem:[#allocation1 + $0x20] ss:$4 sm:$0xff] %v822_v18  ;;  %v900_v60 = vunpack.c.l.b16 %v2093_v20  ;;  %v790_v18 = vld [vmem:[%s2016_s26 + $0xe] sm:$0x1] }
  0x97   : > { %v909_v14 = vrot.slane %v899_v59, 5 }
  0x98   : > { %v911_v15 = vrot.slane %v900_v60, 4 }
  0x9c   : > { %v2097_v23 = vld.sshfl [vmem:[#allocation1] sm:$0xff pattern:$0x73625140] }
  0x9d   : > { %v2099_v24 = vld.sshfl [vmem:[#allocation1 + $0x20] sm:$0xff pattern:$0x73625140]  ;;  %973 = vst [vmem:[#allocation1] ss:$4 sm:$0xff] %v823_v21  ;;  %v901_v61 = vunpack.c.l.b16 %v2097_v23  ;;  %v792_v21 = vunpack.c.l.bf16 %v784_v55  ;;  %v794_v23 = vunpack.c.l.bf16 %v786_v2 }
  0x9e   : > { %978 = vst [vmem:[#allocation1 + $0x20] ss:$4 sm:$0xff] %v824_v22  ;;  %v902_v62 = vunpack.c.l.b16 %v2099_v24  ;;  %v793_v22 = vunpack.c.l.bf16 %v785_v57  ;;  %v906_v24 = vsel %vm577_vm1, %v905_v10, %v904_v19 }
  0x9f   : > { %v913_v16 = vrot.slane %v901_v61, 3 }
  0xa0   : > { %v915_v17 = vrot.slane %v902_v62, 2 }
  0xa4   : > { %v2103_v27 = vld.sshfl [vmem:[#allocation1] sm:$0xff pattern:$0x73625140] }
  0xa5   : > { %v2105_v28 = vld.sshfl [vmem:[#allocation1 + $0x20] sm:$0xff pattern:$0x73625140]  ;;  %982 = vst [vmem:[#allocation1] ss:$4 sm:$0xff] %v825_v25 }
  0xa6   : > { %986 = vst [vmem:[#allocation1 + $0x20] ss:$4 sm:$0xff] %v826_v26  ;;  %v795_v26 = vunpack.c.l.bf16 %v787_v5  ;;  %v1091_v5 = vld [vmem:[%s2038_s12 + $0x2] sm:$0x2] }
  0xac   : > { %v2109_v31 = vld.sshfl [vmem:[#allocation1] sm:$0xff pattern:$0x73625140] }
  0xad   : > { %v2111_v32 = vld.sshfl [vmem:[#allocation1 + $0x20] sm:$0xff pattern:$0x73625140]  ;;  %990 = vst [vmem:[#allocation1] ss:$4 sm:$0xff] %v827_v29  ;;  %v796_v29 = vunpack.c.l.bf16 %v788_v7 }
  0xae   : > { %994 = vst [vmem:[#allocation1 + $0x20] ss:$4 sm:$0xff] %v828_v30  ;;  %v797_v30 = vunpack.c.l.bf16 %v789_v12 }
  0xaf   : > { %v804_v50 = vmul.f32 0.35355338, %v796_v29 }
  0xb0   : > { %v805_v51 = vmul.f32 0.35355338, %v797_v30 }
  0xb1   : > { %v812_v62 = vpack.c.bf16 %v804_v50, %v804_v50  ;;  %v1093_v50 = vld [vmem:[%s2038_s12 + $0x6] sm:$0x2] }
  0xb2   : > { %v813_v7 = vpack.c.bf16 %v805_v51, %v805_v51 }
  0xb4   : > { %v2115_v35 = vld.sshfl [vmem:[#allocation1] sm:$0xff pattern:$0x73625140] }
  0xb5   : > { %v2117_v36 = vld.sshfl [vmem:[#allocation1 + $0x20] sm:$0xff pattern:$0x73625140]  ;;  %998 = vst [vmem:[#allocation1] ss:$4 sm:$0xff] %v829_v33  ;;  %v908_v33 = vsel %vm580_vm2, %v907_v11, %v906_v24 }
  0xb6   : > { %1002 = vst [vmem:[#allocation1 + $0x20] ss:$4 sm:$0xff] %v830_v34  ;;  %v798_v34 = vunpack.c.l.bf16 %v790_v18 }
  0xb8   : > { %v806_v52 = vmul.f32 0.35355338, %v798_v34 }
  0xba   : > { %v814_v9 = vpack.c.bf16 %v806_v52, %v806_v52 }
  0xbc   : > { %v2120_v38 = vld.sshfl [vmem:[#allocation1] sm:$0xff pattern:$0x73625140] }
  0xbd   : > { %v2123_v40 = vld.sshfl [vmem:[#allocation1 + $0x20] sm:$0xff pattern:$0x73625140]  ;;  %1130 = vst [vmem:[#allocation1] ss:$4 sm:$0xff] %v1082_v37 }
  0xbe   : > { %1135 = vst [vmem:[#allocation1 + $0x20] ss:$4 sm:$0xff] %v1083_v39  ;;  %v799_v37 = vmul.f32 0.35355338, %v791_v13  ;;  %v800_v39 = vmul.f32 0.35355338, %v792_v21  ;;  %v845_v21 = vunpack.c.l.b16 %v813_v7 }
  0xc0   : > { %v807_v54 = vpack.c.bf16 %v799_v37, %v799_v37  ;;  %v808_v55 = vpack.c.bf16 %v800_v39, %v800_v39  ;;  %v857_v37 = vrot.slane %v845_v21, 3 }
  0xc2   : > { %v839_v10 = vunpack.c.l.b16 %v807_v54  ;;  %v840_v11 = vunpack.c.l.b16 %v808_v55 }
  0xc4   : > { %v2127_v43 = vld.sshfl [vmem:[#allocation1] sm:$0xff pattern:$0x73625140] }
  0xc5   : > { %v2129_v44 = vld.sshfl [vmem:[#allocation1 + $0x20] sm:$0xff pattern:$0x73625140]  ;;  %1139 = vst [vmem:[#allocation1] ss:$4 sm:$0xff] %v1084_v41  ;;  %v910_v41 = vsel %vm583_vm3, %v909_v14, %v908_v33 }
  0xc6   : > { %1143 = vst [vmem:[#allocation1 + $0x20] ss:$4 sm:$0xff] %v1085_v42  ;;  %v801_v42 = vmul.f32 0.35355338, %v793_v22  ;;  %v912_v49 = vsel %vm586_vm4, %v911_v15, %v910_v41  ;;  %v846_v22 = vunpack.c.l.b16 %v814_v9  ;;  %v1096_v9 = vld [vmem:[%s2038_s12 + $0xc] sm:$0x2] }
  0xc8   : > { %v809_v57 = vpack.c.bf16 %v801_v42, %v801_v42 }
  0xca   : > { %v841_v12 = vunpack.c.l.b16 %v809_v57 }
  0xcc   : > { %v2133_v47 = vld.sshfl [vmem:[#allocation1] sm:$0xff pattern:$0x73625140]  ;;  %v849_v24 = vrot.slane %v841_v12, 7 }
  0xcd   : > { %v2135_v48 = vld.sshfl [vmem:[#allocation1 + $0x20] sm:$0xff pattern:$0x73625140]  ;;  %1147 = vst [vmem:[#allocation1] ss:$4 sm:$0xff] %v1086_v45 }
  0xce   : > { %1151 = vst [vmem:[#allocation1 + $0x20] ss:$4 sm:$0xff] %v1087_v46  ;;  %v802_v45 = vmul.f32 0.35355338, %v794_v23  ;;  %v803_v46 = vmul.f32 0.35355338, %v795_v26 }
  0xcf   : > { %v847_v23 = vrot.slane %v839_v10, 1  ;;  %v1097_v10 = vld [vmem:[%s2038_s12 + $0xe] sm:$0x2] }
  0xd0   : > { %v810_v60 = vpack.c.bf16 %v802_v45, %v802_v45  ;;  %v811_v61 = vpack.c.bf16 %v803_v46, %v803_v46  ;;  %v859_v45 = vrot.slane %v846_v22, 2  ;;  %v1092_v46 = vld [vmem:[%s2038_s12 + $0x4] sm:$0x2] }
  0xd1   : > { %v848_v30 = vsel %vm574_vm0, %v840_v11, %v847_v23  ;;  %v1319_v23 = vld [vmem:[%s2016_s26 + $0x4] sm:$0x2] }
  0xd2   : > { %v842_v13 = vunpack.c.l.b16 %v810_v60  ;;  %v843_v14 = vunpack.c.l.b16 %v811_v61  ;;  %v850_v34 = vsel %vm577_vm1, %v849_v24, %v848_v30  ;;  %v1320_v30 = vld [vmem:[%s2016_s26 + $0x6] sm:$0x2] }
  0xd4   : > { %v2156_v20 = vld.sshfl [vmem:[#allocation1] sm:$0xff pattern:$0x73625140]  ;;  %v851_v26 = vrot.slane %v842_v13, 6  ;;  %v853_v29 = vrot.slane %v843_v14, 5 }
  0xd5   : > { %v2159_v25 = vld.sshfl [vmem:[#allocation1 + $0x20] sm:$0xff pattern:$0x73625140]  ;;  %1155 = vst [vmem:[#allocation1] ss:$4 sm:$0xff] %v1088_v53  ;;  %v914_v53 = vsel %vm589_vm5, %v913_v16, %v912_v49  ;;  %v500_v16 = vlaneseq }
  0xd6   : > { %1159 = vst [vmem:[#allocation1 + $0x20] ss:$4 sm:$0xff] %v1089_v1  ;;  %v916_v59 = vsel %vm592_vm6, %v915_v17, %v914_v53  ;;  %v1090_v1 = vld [vmem:[%s2038_s12] sm:$0x2]  ;;  %v844_v17 = vunpack.c.l.b16 %v812_v62  ;;  %v852_v42 = vsel %vm580_vm2, %v851_v26, %v850_v34  ;;  %v1094_v62 = vld [vmem:[%s2038_s12 + $0x8] sm:$0x2]  ;;  %v1327_v34 = vunpack.c.l.bf16 %v1319_v23 }
  0xd7   : > { %v917_v2 = vpack.c.b16 %v916_v59, %v916_v59  ;;  %v2175_v39 = vshrl.u32 %v500_v16, 7  ;;  %v2177_v41 = vand.u32 127, %v500_v16  ;;  %v854_v49 = vsel %vm583_vm3, %v853_v29, %v852_v42  ;;  %v1349_v13 = vld [vmem:[%s2011_s25] sm:$0x2]  ;;  %v1350_v14 = vld [vmem:[%s2011_s25 + $0x2] sm:$0x2] }
  0xd8   : > { %v855_v33 = vrot.slane %v844_v17, 4  ;;  %v1317_v16 = vld [vmem:[%s2016_s26] sm:$0x2]  ;;  %v1318_v17 = vld [vmem:[%s2016_s26 + $0x2] sm:$0x2] }
  0xd9   : > { %v922_v18 = vsel %vm488_vm7, %v917_v2, 0  ;;  %vm508_vm8 = vcmp.le.s32.totalorder %v2177_v41, %v2175_v39  ;;  %v1325_v22 = vunpack.c.l.bf16 %v1317_v16  ;;  %v1326_v24 = vunpack.c.l.bf16 %v1318_v17  ;;  %v1351_v26 = vld [vmem:[%s2011_s25 + $0x4] sm:$0x2]  ;;  %v1352_v29 = vld [vmem:[%s2011_s25 + $0x6] sm:$0x2] }
  0xda   : > { %931 = vmatpush.bf16.xpose.msra.mxu2 %v922_v18  ;;  %v856_v51 = vsel %vm586_vm4, %v855_v33, %v854_v49  ;;  %v1321_v33 = vld [vmem:[%s2016_s26 + $0x8] sm:$0x2]  ;;  %v1328_v49 = vunpack.c.l.bf16 %v1320_v30  ;;  %v1324_v30 = vld [vmem:[%s2016_s26 + $0xe] sm:$0x2] }
  0xdb   : > { %v858_v53 = vsel %vm589_vm5, %v857_v37, %v856_v51  ;;  %v1333_v37 = vmul.f32 0.35355338, %v1325_v22  ;;  %v1329_v51 = vunpack.c.l.bf16 %v1321_v33 }
  0xdc   : > { %v2168_v15 = vld.sshfl [vmem:[#allocation1] sm:$0xff pattern:$0x73625140]  ;;  %v860_v55 = vsel %vm592_vm6, %v859_v45, %v858_v53  ;;  %v1334_v45 = vmul.f32 0.35355338, %v1326_v24 }
  0xdd   : > { %v2171_v19 = vld.sshfl [vmem:[#allocation1 + $0x20] sm:$0xff pattern:$0x73625140]  ;;  %1240 = vst [vmem:[#allocation1] ss:$4 sm:$0xff] %v1090_v1  ;;  %v861_v57 = vpack.c.b16 %v860_v55, %v860_v55  ;;  %v1341_v53 = vpack.c.bf16 %v1333_v37, %v1333_v37  ;;  %v1919_v37 = vmov -inf  }
  0xde   : > { %1245 = vst [vmem:[#allocation1 + $0x20] ss:$4 sm:$0xff] %v1091_v5  ;;  %v1095_v1 = vld [vmem:[%s2038_s12 + $0xa] sm:$0x2]  ;;  %v1342_v55 = vpack.c.bf16 %v1334_v45, %v1334_v45  ;;  %v1337_v16 = vmul.f32 0.35355338, %v1329_v51 }
  0xdf   : > { %v1373_v17 = vunpack.c.l.b16 %v1341_v53  ;;  %480 = vst.msk [vmem:[#allocation2] sm:$0xff] %vm479_vm9, %v1919_v37  ;;  %v1355_v51 = vld [vmem:[%s2011_s25 + $0xc] sm:$0x2] }
  0xe0   : > { %v1374_v22 = vunpack.c.l.b16 %v1342_v55  ;;  %481 = vst.msk [vmem:[#allocation2 + $0x8] sm:$0xff] %vm479_vm9, %v1919_v37  ;;  %v1332_v55 = vunpack.c.l.bf16 %v1324_v30 }
  0xe1   : > { %1799 = vmatmul.msk.bf16.vlgmr.msra.gmra.mxu2 %vm488_vm7, %v861_v57  ;;  %v1322_v57 = vld [vmem:[%s2016_s26 + $0xa] sm:$0x2]  ;;  %v1381_v45 = vrot.slane %v1373_v17, 3  ;;  %482 = vst.msk [vmem:[#allocation2 + $0x10] sm:$0xff] %vm479_vm9, %v1919_v37 }
  0xe2   : > { %483 = vst.msk [vmem:[#allocation2 + $0x18] sm:$0xff] %vm479_vm9, %v1919_v37 }
  0xe4   : > { %v2184_v52 = vld.sshfl [vmem:[#allocation1] sm:$0xff pattern:$0x73625140] }
  0xe5   : > { %v2187_v54 = vld.sshfl [vmem:[#allocation1 + $0x20] sm:$0xff pattern:$0x73625140]  ;;  %1249 = vst [vmem:[#allocation1] ss:$4 sm:$0xff] %v1092_v46 }
  0xe6   : > { %1253 = vst [vmem:[#allocation1 + $0x20] ss:$4 sm:$0xff] %v1093_v50  ;;  %v1335_v50 = vmul.f32 0.35355338, %v1327_v34 }
  0xea   : > { %v667_v59 = vpop.f32.mrf.mxu0 }
  0xeb   : > { %v2195_v60 = vsel %vm508_vm8, %v667_v59, -1e+30  ;;  %v1353_v59 = vld [vmem:[%s2011_s25 + $0x8] sm:$0x2] }
  0xec   : > { %v673_v61 = vsel %vm488_vm7, %v2195_v60, -inf  ;;  %v2202_v2 = vld.sshfl [vmem:[#allocation1] sm:$0xff pattern:$0x73625140] }
  0xed   : > { %674 = vmax.xlane.f32.xlu0 %v673_v61  ;;  %v2204_v5 = vld.sshfl [vmem:[#allocation1 + $0x20] sm:$0xff pattern:$0x73625140]  ;;  %1257 = vst [vmem:[#allocation1] ss:$4 sm:$0xff] %v1094_v62 }
  0xee   : > { %1261 = vst [vmem:[#allocation1 + $0x20] ss:$4 sm:$0xff] %v1095_v1  ;;  %v1354_v1 = vld [vmem:[%s2011_s25 + $0xa] sm:$0x2] }
  0xf2   : > { %v669_v7 = vpop.f32.mrf.mxu0 }
  0xf3   : > { %v1323_v7 = vld [vmem:[%s2016_s26 + $0xc] sm:$0x2] }
  0xf4   : > { %v2208_v11 = vld.sshfl [vmem:[#allocation1] sm:$0xff pattern:$0x73625140]  ;;  %v1331_v33 = vunpack.c.l.bf16 %v1323_v7 }
  0xf5   : > { %v2210_v12 = vld.sshfl [vmem:[#allocation1 + $0x20] sm:$0xff pattern:$0x73625140]  ;;  %1265 = vst [vmem:[#allocation1] ss:$4 sm:$0xff] %v1096_v9 }
  0xf6   : > { %1269 = vst [vmem:[#allocation1 + $0x20] ss:$4 sm:$0xff] %v1097_v10  ;;  %v1336_v9 = vmul.f32 0.35355338, %v1328_v49  ;;  %v1343_v10 = vpack.c.bf16 %v1335_v50, %v1335_v50  ;;  %v1345_v50 = vpack.c.bf16 %v1337_v16, %v1337_v16 }
  0xf8   : > { %v1375_v34 = vunpack.c.l.b16 %v1343_v10 }
  0xfc   : > { %v2215_v18 = vld.sshfl [vmem:[#allocation1] sm:$0xff pattern:$0x73625140] }
  0xfd   : > { %v2218_v21 = vld.sshfl [vmem:[#allocation1 + $0x20] sm:$0xff pattern:$0x73625140]  ;;  %1397 = vst [vmem:[#allocation1] ss:$4 sm:$0xff] %v1349_v13 }
  0xfe   : > { %1402 = vst [vmem:[#allocation1 + $0x20] ss:$4 sm:$0xff] %v1350_v14  ;;  %v1330_v14 = vunpack.c.l.bf16 %v1322_v57  ;;  %v1344_v57 = vpack.c.bf16 %v1336_v9, %v1336_v9 }
 0x100   : > { %v1376_v9 = vunpack.c.l.b16 %v1344_v57 }
 0x104   : > { %v1398_v42 = vld.sshfl [vmem:[#allocation1] sm:$0xff pattern:$0x73625140] }
 0x105   : > { %v1403_v46 = vld.sshfl [vmem:[#allocation1 + $0x20] sm:$0xff pattern:$0x73625140]  ;;  %1406 = vst [vmem:[#allocation1] ss:$4 sm:$0xff] %v1351_v26  ;;  %v1429_v61 = vunpack.c.l.b16 %v1398_v42 }
 0x106   : > { %1410 = vst [vmem:[#allocation1 + $0x20] ss:$4 sm:$0xff] %v1352_v29  ;;  %v1430_v62 = vunpack.c.l.b16 %v1403_v46  ;;  %v1338_v42 = vmul.f32 0.35355338, %v1330_v14  ;;  %v1382_v46 = vrot.slane %v1374_v22, 2  ;;  %v1377_v22 = vunpack.c.l.b16 %v1345_v50 }
 0x107   : > { %v1437_v26 = vrot.slane %v1429_v61, 3  ;;  %v1339_v61 = vmul.f32 0.35355338, %v1331_v33 }
 0x108   : > { %v1438_v29 = vrot.slane %v1430_v62, 2  ;;  %v1384_v62 = vrot.slane %v1375_v34, 1  ;;  %v1346_v10 = vpack.c.bf16 %v1338_v42, %v1338_v42  ;;  %v1387_v37 = vrot.slane %v1377_v22, 7 }
 0x109   : > { %v1347_v30 = vpack.c.bf16 %v1339_v61, %v1339_v61 }
 0x10a   : > { %v1439_v53 = vsel %vm574_vm0, %v1438_v29, %v1437_v26  ;;  %v1340_v26 = vmul.f32 0.35355338, %v1332_v55 }
 0x10c   : > { %v1407_v13 = vld.sshfl [vmem:[#allocation1] sm:$0xff pattern:$0x73625140] }
 0x10d   : > { %v1411_v23 = vld.sshfl [vmem:[#allocation1 + $0x20] sm:$0xff pattern:$0x73625140]  ;;  %1414 = vst [vmem:[#allocation1] ss:$4 sm:$0xff] %v1353_v59  ;;  %v1431_v24 = vunpack.c.l.b16 %v1407_v13  ;;  %v1383_v13 = vsel %vm574_vm0, %v1382_v46, %v1381_v45  ;;  %v1348_v45 = vpack.c.bf16 %v1340_v26, %v1340_v26 }
 0x10e   : > { %1418 = vst [vmem:[#allocation1 + $0x20] ss:$4 sm:$0xff] %v1354_v1  ;;  %v1356_v59 = vld [vmem:[%s2011_s25 + $0xe] sm:$0x2]  ;;  %v1432_v7 = vunpack.c.l.b16 %v1411_v23  ;;  %v1385_v33 = vsel %vm577_vm1, %v1384_v62, %v1383_v13  ;;  %v1378_v23 = vunpack.c.l.b16 %v1346_v10 }
 0x10f   : > { %v1440_v49 = vrot.slane %v1431_v24, 1  ;;  %v1386_v46 = vsel %vm580_vm2, %v1376_v9, %v1385_v33  ;;  %v1920_v33 = vmov 0  }
 0x110   : > { %v1388_v57 = vsel %vm583_vm3, %v1387_v37, %v1386_v46  ;;  %1852 = vset.pattern.permute.xlu0 %v1920_v33  ;;  %1853 = vset.pattern.permute.xlu2 %v1920_v33 }
 0x111   : > { %v1441_v17 = vsel %vm577_vm1, %v1440_v49, %v1439_v53  ;;  %v1379_v49 = vunpack.c.l.b16 %v1347_v30  ;;  %v1389_v53 = vrot.slane %v1378_v23, 6  ;;  %1854 = vset.pattern.permute.xlu1 %v1920_v33  ;;  %v2260_v23 = vld [vmem:[#allocation2] sm:$0xff] }
 0x112   : > { %v1442_v34 = vsel %vm580_vm2, %v1432_v7, %v1441_v17 }
 0x113   : > { %v1391_v10 = vrot.slane %v1379_v49, 5 }
 0x114   : > { %v1415_v1 = vld.sshfl [vmem:[#allocation1] sm:$0xff pattern:$0x73625140] }
 0x115   : > { %v1419_v14 = vld.sshfl [vmem:[#allocation1 + $0x20] sm:$0xff pattern:$0x73625140]  ;;  %1422 = vst [vmem:[#allocation1] ss:$4 sm:$0xff] %v1355_v51  ;;  %v1433_v16 = vunpack.c.l.b16 %v1415_v1  ;;  %v1380_v1 = vunpack.c.l.b16 %v1348_v45 }
 0x116   : > { %1426 = vst [vmem:[#allocation1 + $0x20] ss:$4 sm:$0xff] %v1356_v59  ;;  %v1434_v24 = vunpack.c.l.b16 %v1419_v14  ;;  %v1390_v14 = vsel %vm586_vm4, %v1389_v53, %v1388_v57  ;;  %v738_v57 = vunpack.c.l.b16 %v2055_v58 }
 0x117   : > { %v1443_v29 = vrot.slane %v1433_v16, 7  ;;  %v1393_v22 = vrot.slane %v1380_v1, 4  ;;  %v1392_v26 = vsel %vm589_vm5, %v1391_v10, %v1390_v14  ;;  %v737_v1 = vunpack.c.l.b16 %v2052_v56 }
 0x118   : > { %v1445_v42 = vrot.slane %v1434_v24, 6  ;;  %v745_v10 = vrot.slane %v738_v57, 7  ;;  %v1167_v57 = vunpack.c.l.b16 %v2159_v25 }
 0x119   : > { %v1444_v51 = vsel %vm583_vm3, %v1443_v29, %v1442_v34  ;;  %v1394_v29 = vsel %vm592_vm6, %v1393_v22, %v1392_v26  ;;  %v1921_v34 = vmov 0.0  }
 0x11a   : > { %v1446_v62 = vsel %vm586_vm4, %v1445_v42, %v1444_v51  ;;  %v1395_v30 = vpack.c.b16 %v1394_v29, %v1394_v29  ;;  %484 = vst.msk [vmem:[#allocation3] sm:$0xff] %vm479_vm9, %v1921_v34 }
 0x11b   : > { %485 = vst.msk [vmem:[#allocation3 + $0x8] sm:$0xff] %vm479_vm9, %v1921_v34 }
 0x11c   : > { %v1423_v50 = vld.sshfl [vmem:[#allocation1] sm:$0xff pattern:$0x73625140]  ;;  %486 = vst.msk [vmem:[#allocation3 + $0x10] sm:$0xff] %vm479_vm9, %v1921_v34 }
 0x11d   : > { %v1427_v59 = vld.sshfl [vmem:[#allocation1 + $0x20] sm:$0xff pattern:$0x73625140]  ;;  %v1435_v55 = vunpack.c.l.b16 %v1423_v50  ;;  %487 = vst.msk [vmem:[#allocation3 + $0x18] sm:$0xff] %vm479_vm9, %v1921_v34 }
 0x11e   : > { %v1436_v61 = vunpack.c.l.b16 %v1427_v59  ;;  %489 = vst.msk [vmem:[#allocation4] sm:$0xff] %vm488_vm7, %v1921_v34 }
 0x11f   : > { %v1447_v7 = vrot.slane %v1435_v55, 5  ;;  %490 = vst.msk [vmem:[#allocation4 + $0x8] sm:$0xff] %vm488_vm7, %v1921_v34 }
 0x120   : > { %v1449_v13 = vrot.slane %v1436_v61, 4  ;;  %491 = vst.msk [vmem:[#allocation4 + $0x10] sm:$0xff] %vm488_vm7, %v1921_v34 }
 0x121   : > { %v1448_v16 = vsel %vm589_vm5, %v1447_v7, %v1446_v62  ;;  %492 = vst.msk [vmem:[#allocation4 + $0x18] sm:$0xff] %vm488_vm7, %v1921_v34  ;;  %v739_v62 = vunpack.c.l.b16 %v2060_v63  ;;  %v740_v7 = vunpack.c.l.b16 %v2063_v0  ;;  %v744_v63 = vunpack.c.l.b16 %v2075_v8 }
 0x122   : > { %v1450_v17 = vsel %vm592_vm6, %v1449_v13, %v1448_v16  ;;  %v741_v13 = vunpack.c.l.b16 %v2067_v3  ;;  %v742_v16 = vunpack.c.l.b16 %v2069_v4  ;;  %v1162_v34 = vunpack.c.l.b16 %v2127_v43  ;;  %v1051_v43 = vld [vmem:[%s2016_s26 + $0x2] sm:$0x2] }
 0x123   : > { %v1451_v24 = vpack.c.b16 %v1450_v17, %v1450_v17  ;;  %v747_v14 = vrot.slane %v739_v62, 6  ;;  %v746_v17 = vsel %vm574_vm0, %v745_v10, %v737_v1  ;;  %v749_v22 = vrot.slane %v740_v7, 5  ;;  %v1050_v62 = vld [vmem:[%s2016_s26] sm:$0x2] }
 0x124   : > { %v751_v26 = vrot.slane %v741_v13, 4  ;;  %v1163_v8 = vunpack.c.l.b16 %v2129_v44  ;;  %v1169_v44 = vunpack.c.l.b16 %v2171_v19 }
 0x125   : > { %v1456_v9 = vsel %vm488_vm7, %v1451_v24, 0  ;;  %v743_v24 = vunpack.c.l.b16 %v2072_v6  ;;  %v748_v58 = vsel %vm577_vm1, %v747_v14, %v746_v17  ;;  %v1058_v14 = vunpack.c.l.bf16 %v1050_v62 }
 0x126   : > { %1465 = vmatpush.bf16.xpose.msrb.mxu0 %v1456_v9  ;;  %v750_v56 = vsel %vm580_vm2, %v749_v22, %v748_v58  ;;  %v753_v9 = vrot.slane %v742_v16, 3  ;;  %v1182_v25 = vrot.slane %v1169_v44, 3  ;;  %v1053_v22 = vld [vmem:[%s2016_s26 + $0x6] sm:$0x2]  ;;  %v1052_v58 = vld [vmem:[%s2016_s26 + $0x4] sm:$0x2] }
 0x127   : > { %v752_v0 = vsel %vm583_vm3, %v751_v26, %v750_v56  ;;  %v755_v29 = vrot.slane %v743_v24, 2  ;;  %v1066_v26 = vmul.f32 0.35355338, %v1058_v14 }
 0x128   : > { %v754_v3 = vsel %vm586_vm4, %v753_v9, %v752_v0  ;;  %v1054_v9 = vld [vmem:[%s2016_s26 + $0x8] sm:$0x2]  ;;  %v1061_v0 = vunpack.c.l.bf16 %v1053_v22 }
 0x129   : > { %v756_v4 = vsel %vm589_vm5, %v755_v29, %v754_v3  ;;  %v1060_v3 = vunpack.c.l.bf16 %v1052_v58 }
 0x12d   : > { %1803 = vmatmul.msk.bf16.vlgmr.msrb.gmra.mxu0 %vm488_vm7, %v1395_v30  ;;  %v757_v30 = vrot.slane %v744_v63, 1 }
 0x12f   : > { %v758_v6 = vsel %vm592_vm6, %v757_v30, %v756_v4  ;;  %v1074_v30 = vpack.c.bf16 %v1066_v26, %v1066_v26 }
 0x130   : > { %v759_v33 = vpack.c.b16 %v758_v6, %v758_v6  ;;  %v1055_v6 = vld [vmem:[%s2016_s26 + $0xa] sm:$0x2] }
 0x160   : > { %v675_v37 = vpop.xlane.xlu0 %674 }
 0x161   : > { %v2263_v42 = vmax.f32 %v2260_v23, %v675_v37  ;;  %v765_v37 = vsel %vm763_vm10, %v759_v33, 0  ;;  %v1062_v33 = vunpack.c.l.bf16 %v1054_v9 }
 0x162   : > { %774 = vmatpush.bf16.msra.mxu1 %v765_v37  ;;  %v1056_v37 = vld [vmem:[%s2016_s26 + $0xc] sm:$0x2] }
 0x163   : > { %v677_v45 = vsub.f32 %v2260_v23, %v2263_v42  ;;  %782 = vst.msk [vmem:[#allocation2] sm:$0xff] %vm479_vm9, %v2263_v42  ;;  %682 = vperm.xlu0 %1852, %v2263_v42   ;;  %v1064_v62 = vunpack.c.l.bf16 %v1056_v37 }
 0x164   : > { %v933_v46 = vpop.f32.mrf.mxu2 }
 0x165   : > { %v2273_v51 = vsel %vm508_vm8, %v933_v46, -1e+30  ;;  %v1165_v46 = vunpack.c.l.b16 %v2135_v48 }
 0x166   : > { %v940_v49 = vsel %vm488_vm7, %v2273_v51, -inf }
 0x167   : > { %941 = vmax.xlane.f32.xlu1 %v940_v49  ;;  %v1170_v49 = vrot.slane %v1162_v34, 2  ;;  %v1174_v7 = vrot.slane %v1165_v46, 7  ;;  %v1069_v34 = vmul.f32 0.35355338, %v1061_v0  ;;  %v1063_v46 = vunpack.c.l.bf16 %v1055_v6 }
 0x16c   : > { %v935_v50 = vpop.f32.mrf.mxu2 }
 0x16d   : > { %v1171_v50 = vrot.slane %v1163_v8, 1  ;;  %v1068_v8 = vmul.f32 0.35355338, %v1060_v3 }
 0x16f   : > { %v1172_v1 = vsel %vm574_vm0, %v1171_v50, %v1170_v49  ;;  %v1106_v49 = vunpack.c.l.b16 %v1074_v30  ;;  %v2332_v30 = vld [vmem:[#allocation2 + $0x8] sm:$0xff] }
 0x1aa   : > { %v1467_v53 = vpop.f32.mrf.mxu0 }
 0x1ab   : > { %v2280_v59 = vsel %vm508_vm8, %v1467_v53, -1e+30  ;;  %v1164_v53 = vunpack.c.l.b16 %v2133_v47  ;;  %v1178_v47 = vrot.slane %v1167_v57, 5 }
 0x1ac   : > { %v1474_v55 = vsel %vm488_vm7, %v2280_v59, -inf }
 0x1ad   : > { %1475 = vmax.xlane.f32.xlu2 %v1474_v55  ;;  %v1166_v55 = vunpack.c.l.b16 %v2156_v20  ;;  %v1173_v48 = vsel %vm577_vm1, %v1164_v53, %v1172_v1  ;;  %v1070_v53 = vmul.f32 0.35355338, %v1062_v33  ;;  %v1071_v1 = vmul.f32 0.35355338, %v1063_v46 }
 0x1ae   : > { %v1175_v20 = vsel %vm580_vm2, %v1174_v7, %v1173_v48  ;;  %v1114_v7 = vrot.slane %v1106_v49, 2 }
 0x1af   : > { %v1176_v10 = vrot.slane %v1166_v55, 6  ;;  %v1077_v55 = vpack.c.bf16 %v1069_v34, %v1069_v34 }
 0x1b1   : > { %v1177_v16 = vsel %vm583_vm3, %v1176_v10, %v1175_v20  ;;  %v1078_v10 = vpack.c.bf16 %v1070_v53, %v1070_v53  ;;  %v1109_v20 = vunpack.c.l.b16 %v1077_v55 }
 0x1b2   : > { %v1469_v61 = vpop.f32.mrf.mxu0  ;;  %v1179_v19 = vsel %vm586_vm4, %v1178_v47, %v1177_v16 }
 0x1b3   : > { %v1168_v61 = vunpack.c.l.b16 %v2168_v15  ;;  %v1059_v15 = vunpack.c.l.bf16 %v1051_v43  ;;  %v1076_v43 = vpack.c.bf16 %v1068_v8, %v1068_v8  ;;  %v1118_v22 = vrot.slane %v1109_v20, 7 }
 0x1b4   : > { %v1008_v20 = vunpack.c.l.b16 %v2111_v32  ;;  %v1012_v32 = vunpack.c.l.b16 %v2123_v40 }
 0x1b5   : > { %v1180_v13 = vrot.slane %v1168_v61, 4  ;;  %v1067_v63 = vmul.f32 0.35355338, %v1059_v15  ;;  %v1057_v61 = vld [vmem:[%s2016_s26 + $0xe] sm:$0x2]  ;;  %v1108_v14 = vunpack.c.l.b16 %v1076_v43  ;;  %v1079_v15 = vpack.c.bf16 %v1071_v1, %v1071_v1 }
 0x1b6   : > { %v1357_v1 = vld [vmem:[%s2038_s12] sm:$0x2] }
 0x1b7   : > { %v1181_v17 = vsel %vm589_vm5, %v1180_v13, %v1179_v19  ;;  %v1075_v4 = vpack.c.bf16 %v1067_v63, %v1067_v63  ;;  %v1065_v13 = vunpack.c.l.bf16 %v1057_v61  ;;  %v1110_v19 = vunpack.c.l.b16 %v1078_v10  ;;  %v1358_v10 = vld [vmem:[%s2038_s12 + $0x2] sm:$0x2]  ;;  %1507 = vst [vmem:[#allocation1] ss:$4 sm:$0xff] %v1357_v1 }
 0x1b8   : > { %v1183_v24 = vsel %vm592_vm6, %v1182_v25, %v1181_v17  ;;  %v1072_v25 = vmul.f32 0.35355338, %v1064_v62  ;;  %1512 = vst [vmem:[#allocation1 + $0x20] ss:$4 sm:$0xff] %v1358_v10 }
 0x1b9   : > { %v1184_v56 = vpack.c.b16 %v1183_v24, %v1183_v24  ;;  %v1107_v50 = vunpack.c.l.b16 %v1075_v4  ;;  %v1073_v17 = vmul.f32 0.35355338, %v1065_v13  ;;  %v1120_v26 = vrot.slane %v1110_v19, 6 }
 0x1ba   : > { %v1080_v24 = vpack.c.bf16 %v1072_v25, %v1072_v25  ;;  %v1006_v13 = vunpack.c.l.b16 %v2105_v28 }
 0x1bb   : > { %v1189_v29 = vsel %vm488_vm7, %v1184_v56, 0  ;;  %v1115_v48 = vrot.slane %v1107_v50, 1  ;;  %v1081_v56 = vpack.c.bf16 %v1073_v17, %v1073_v17  ;;  %v1011_v17 = vunpack.c.l.b16 %v2120_v38 }
 0x1bc   : > { %1198 = vmatpush.bf16.xpose.msrb.mxu1 %v1189_v29  ;;  %v1112_v29 = vunpack.c.l.b16 %v1080_v24 }
 0x1bd   : > { %v1116_v16 = vsel %vm574_vm0, %v1115_v48, %v1114_v7  ;;  %v1113_v6 = vunpack.c.l.b16 %v1081_v56  ;;  %v1007_v48 = vunpack.c.l.b16 %v2109_v31  ;;  %v1017_v31 = vrot.slane %v1008_v20, 6 }
 0x1be   : > { %v1117_v58 = vsel %vm577_vm1, %v1108_v14, %v1116_v16  ;;  %v1124_v34 = vrot.slane %v1112_v29, 4  ;;  %v1009_v14 = vunpack.c.l.b16 %v2115_v35  ;;  %v1508_v56 = vld.sshfl [vmem:[#allocation1] sm:$0xff pattern:$0x73625140] }
 0x1bf   : > { %v1119_v9 = vsel %vm580_vm2, %v1118_v22, %v1117_v58  ;;  %v1126_v49 = vrot.slane %v1113_v6, 3  ;;  %v1023_v58 = vrot.slane %v1011_v17, 3  ;;  %v1539_v1 = vunpack.c.l.b16 %v1508_v56 }
 0x1c0   : > { %v1121_v4 = vsel %vm583_vm3, %v1120_v26, %v1119_v9  ;;  %v1019_v28 = vrot.slane %v1009_v14, 5  ;;  %v1359_v26 = vld [vmem:[%s2038_s12 + $0x4] sm:$0x2]  ;;  %v1360_v9 = vld [vmem:[%s2038_s12 + $0x6] sm:$0x2] }
 0x1c1   : > { %1516 = vst [vmem:[#allocation1] ss:$4 sm:$0xff] %v1359_v26  ;;  %v1547_v10 = vrot.slane %v1539_v1, 3 }
 0x1d5   : > { %v683_v57 = vpop.permute.xlu0 %682 }
 0x1d6   : > { %v685_v44 = vsub.f32 %v2195_v60, %v683_v57  ;;  %v1111_v60 = vunpack.c.l.b16 %v1079_v15  ;;  %v2348_v57 = vld [vmem:[#allocation2 + $0x18] sm:$0xff]  ;;  %v1015_v15 = vrot.slane %v1007_v48, 7 }
 0x1d8   : > { %v686_v47 = vmul.f32 1.442695, %v685_v44  ;;  %v1122_v3 = vrot.slane %v1111_v60, 5  ;;  %v1005_v44 = vunpack.c.l.b16 %v2103_v27  ;;  %v1010_v27 = vunpack.c.l.b16 %v2117_v36 }
 0x1d9   : > { %v1025_v60 = vrot.slane %v1012_v32, 2 }
 0x1da   : > { %1855 = vpow2.f32 %v686_v47  ;;  %v942_v33 = vpop.xlane.xlu1 %941  ;;  %v1123_v37 = vsel %vm586_vm4, %v1122_v3, %v1121_v4  ;;  %v1013_v25 = vrot.slane %v1005_v44, 1  ;;  %v1021_v35 = vrot.slane %v1010_v27, 4 }
 0x1db   : > { %v2337_v8 = vmax.f32 %v2332_v30, %v942_v33  ;;  %v1125_v50 = vsel %vm589_vm5, %v1124_v34, %v1123_v37  ;;  %v1361_v34 = vld [vmem:[%s2038_s12 + $0x8] sm:$0x2]  ;;  %v1362_v37 = vld [vmem:[%s2038_s12 + $0xa] sm:$0x2] }
 0x1dc   : > { %v1127_v53 = vsel %vm592_vm6, %v1126_v49, %v1125_v50  ;;  %v1014_v19 = vsel %vm574_vm0, %v1006_v13, %v1013_v25  ;;  %v1517_v49 = vld.sshfl [vmem:[#allocation1] sm:$0xff pattern:$0x73625140] }
 0x1dd   : > { %v944_v46 = vsub.f32 %v2332_v30, %v2337_v8  ;;  %1049 = vst.msk [vmem:[#allocation2 + $0x8] sm:$0xff] %vm479_vm9, %v2337_v8  ;;  %949 = vperm.xlu2 %1853, %v2337_v8   ;;  %v1128_v55 = vpack.c.b16 %v1127_v53, %v1127_v53  ;;  %v1541_v48 = vunpack.c.l.b16 %v1517_v49 }
 0x1de   : > { %1524 = vst [vmem:[#allocation1] ss:$4 sm:$0xff] %v1361_v34 }
 0x1df   : > { %v1550_v20 = vrot.slane %v1541_v48, 1 }
 0x1e0   : > { %v2327_v63 = vpop.eup %1855 }
 0x1e1   : > { %v703_v0 = vpack.c.bf16 %v2327_v63, %v2327_v63  ;;  %v690_v4 = vsel %vm488_vm7, %v2327_v63, 0.0 }
 0x1e3   : > { %1798 = vmatmul.msk.bf16.vlgmr.msra.gmra.mxu1 %vm488_vm7, %v703_v0  ;;  %v1513_v0 = vld.sshfl [vmem:[#allocation1 + $0x20] sm:$0xff pattern:$0x73625140] }
 0x1e4   : > { %1520 = vst [vmem:[#allocation1 + $0x20] ss:$4 sm:$0xff] %v1360_v9 }
 0x1e5   : > { %v1525_v44 = vld.sshfl [vmem:[#allocation1] sm:$0xff pattern:$0x73625140] }
 0x1e6   : > { %v1543_v13 = vunpack.c.l.b16 %v1525_v44 }
 0x1eb   : > { %v1521_v50 = vld.sshfl [vmem:[#allocation1 + $0x20] sm:$0xff pattern:$0x73625140] }
 0x1ec   : > { %1528 = vst [vmem:[#allocation1 + $0x20] ss:$4 sm:$0xff] %v1362_v37  ;;  %v1542_v14 = vunpack.c.l.b16 %v1521_v50 }
 0x1f3   : > { %1801 = vmatmul.msk.bf16.vlgmr.msrb.gmra.mxu1 %vm488_vm7, %v1128_v55  ;;  %v1363_v55 = vld [vmem:[%s2038_s12 + $0xc] sm:$0x2] }
 0x1f4   : > { %v1529_v63 = vld.sshfl [vmem:[#allocation1 + $0x20] sm:$0xff pattern:$0x73625140]  ;;  %1532 = vst [vmem:[#allocation1] ss:$4 sm:$0xff] %v1363_v55  ;;  %v688_v55 = vld [vmem:[#allocation3] sm:$0xff] }
 0x1fb   : > { %v1533_v27 = vld.sshfl [vmem:[#allocation1] sm:$0xff pattern:$0x73625140] }
 0x220   : > { %v1476_v61 = vpop.xlane.xlu2 %1475 }
 0x221   : > { %v2351_v62 = vmax.f32 %v2348_v57, %v1476_v61  ;;  %v1364_v61 = vld [vmem:[%s2038_s12 + $0xe] sm:$0x2] }
 0x222   : > { %1536 = vst [vmem:[#allocation1 + $0x20] ss:$4 sm:$0xff] %v1364_v61 }
 0x223   : > { %v1478_v43 = vsub.f32 %v2348_v57, %v2351_v62  ;;  %1583 = vst.msk [vmem:[#allocation2 + $0x18] sm:$0xff] %vm479_vm9, %v2351_v62  ;;  %1483 = vperm.xlu2 %1853, %v2351_v62   ;;  %v956_v62 = vld [vmem:[#allocation3 + $0x8] sm:$0xff] }
 0x225   : > { %v1479_v39 = vmul.f32 1.442695, %v1478_v43 }
 0x229   : > { %v1537_v17 = vld.sshfl [vmem:[#allocation1 + $0x20] sm:$0xff pattern:$0x73625140] }
 0x237   : > { %v950_v7 = vpop.permute.xlu2 %949 }
 0x238   : > { %v952_v47 = vsub.f32 %v2273_v51, %v950_v7  ;;  %v1016_v51 = vsel %vm577_vm1, %v1015_v15, %v1014_v19  ;;  %v1540_v7 = vunpack.c.l.b16 %v1513_v0  ;;  %v1544_v15 = vunpack.c.l.b16 %v1529_v63 }
 0x239   : > { %v1018_v22 = vsel %vm580_vm2, %v1017_v31, %v1016_v51  ;;  %v1553_v31 = vrot.slane %v1543_v13, 7  ;;  %v1545_v51 = vunpack.c.l.b16 %v1533_v27 }
 0x23a   : > { %v953_v16 = vmul.f32 1.442695, %v952_v47  ;;  %v1020_v24 = vsel %vm583_vm3, %v1019_v28, %v1018_v22  ;;  %v1548_v47 = vrot.slane %v1540_v7, 2  ;;  %v1555_v32 = vrot.slane %v1544_v15, 6 }
 0x23b   : > { %v1022_v36 = vsel %vm586_vm4, %v1021_v35, %v1020_v24  ;;  %v1546_v22 = vunpack.c.l.b16 %v1537_v17  ;;  %v1498_v17 = vld [vmem:[#allocation4 + $0x18] sm:$0xff] }
 0x23c   : > { %1857 = vpow2.f32 %v953_v16  ;;  %v1024_v38 = vsel %vm589_vm5, %v1023_v58, %v1022_v36  ;;  %v1549_v16 = vsel %vm574_vm0, %v1548_v47, %v1547_v10  ;;  %v1557_v58 = vrot.slane %v1545_v51, 5 }
 0x23d   : > { %v1026_v29 = vsel %vm592_vm6, %v1025_v60, %v1024_v38  ;;  %v1551_v19 = vsel %vm577_vm1, %v1550_v20, %v1549_v16  ;;  %v1559_v36 = vrot.slane %v1546_v22, 4  ;;  %v1490_v20 = vld [vmem:[#allocation3 + $0x18] sm:$0xff] }
 0x23e   : > { %v1027_v40 = vpack.c.b16 %v1026_v29, %v1026_v29  ;;  %v1552_v28 = vsel %vm580_vm2, %v1542_v14, %v1551_v19 }
 0x23f   : > { %v1554_v35 = vsel %vm583_vm3, %v1553_v31, %v1552_v28 }
 0x240   : > { %v1032_v6 = vsel %vm763_vm10, %v1027_v40, 0  ;;  %v1556_v24 = vsel %vm586_vm4, %v1555_v32, %v1554_v35  ;;  %v1272_v35 = vunpack.c.l.b16 %v2184_v52 }
 0x241   : > { %1041 = vmatpush.bf16.msra.mxu3 %v1032_v6  ;;  %v1558_v60 = vsel %vm589_vm5, %v1557_v58, %v1556_v24  ;;  %v1273_v24 = vunpack.c.l.b16 %v2187_v54  ;;  %v1275_v58 = vunpack.c.l.b16 %v2204_v5  ;;  %v1279_v54 = vunpack.c.l.b16 %v2218_v21 }
 0x242   : > { %v1858_v3 = vpop.eup %1857  ;;  %v1560_v26 = vsel %vm592_vm6, %v1559_v36, %v1558_v60  ;;  %v1280_v36 = vrot.slane %v1272_v35, 2 }
 0x243   : > { %v971_v33 = vpack.c.bf16 %v1858_v3, %v1858_v3  ;;  %v958_v53 = vsel %vm488_vm7, %v1858_v3, 0.0  ;;  %v1561_v38 = vpack.c.b16 %v1560_v26, %v1560_v26  ;;  %v1281_v60 = vrot.slane %v1273_v24, 1 }
 0x244   : > { %959 = vadd.xlane.f32.xlu0 %v958_v53  ;;  %v945_v53 = vmul.f32 1.442695, %v944_v46  ;;  %v1274_v26 = vunpack.c.l.b16 %v2202_v2 }
 0x245   : > { %1800 = vmatmul.msk.bf16.vlgmr.msra.gmra.mxu3 %vm488_vm7, %v971_v33  ;;  %v1566_v9 = vsel %vm763_vm10, %v1561_v38, 0  ;;  %v1277_v38 = vunpack.c.l.b16 %v2210_v12 }
 0x246   : > { %1575 = vmatpush.bf16.msrb.mxu2 %v1566_v9  ;;  %v1282_v9 = vsel %vm574_vm0, %v1281_v60, %v1280_v36 }
 0x24c   : > { %691 = vadd.xlane.f32.xlu2 %v690_v4 }
 0x260   : > { %v2387_v25 = vpop.f32.mrf.mxu1 }
 0x268   : > { %v778_v56 = vpop.f32.mrf.mxu1 }
 0x269   : > { %v1276_v56 = vunpack.c.l.b16 %v2208_v11 }
 0x26b   : > { %v1286_v52 = vrot.slane %v1276_v56, 6 }
 0x270   : > { %v1200_v0 = vpop.f32.mrf.mxu1 }
 0x271   : > { %v2400_v29 = vsel %vm508_vm8, %v1200_v0, -1e+30  ;;  %v1284_v0 = vrot.slane %v1275_v58, 7 }
 0x272   : > { %v1207_v40 = vsel %vm488_vm7, %v2400_v29, -inf }
 0x273   : > { %1208 = vmax.xlane.f32.xlu1 %v1207_v40  ;;  %v1278_v40 = vunpack.c.l.b16 %v2215_v18 }
 0x275   : > { %v1290_v2 = vrot.slane %v1278_v40, 4 }
 0x278   : > { %v1202_v3 = vpop.f32.mrf.mxu1 }
 0x279   : > { %v1283_v3 = vsel %vm577_vm1, %v1274_v26, %v1282_v9 }
 0x27a   : > { %v1285_v5 = vsel %vm580_vm2, %v1284_v0, %v1283_v3 }
 0x27d   : > { %v1484_v4 = vpop.permute.xlu2 %1483 }
 0x27e   : > { %v1486_v6 = vsub.f32 %v2280_v59, %v1484_v4  ;;  %v678_v59 = vmul.f32 1.442695, %v677_v45  ;;  %v1206_v45 = vld [vmem:[#allocation2 + $0x10] sm:$0xff]  ;;  %v1288_v4 = vrot.slane %v1277_v38, 5 }
 0x280   : > { %v1487_v33 = vmul.f32 1.442695, %v1486_v6  ;;  %v1287_v6 = vsel %vm583_vm3, %v1286_v52, %v1285_v5 }
 0x281   : > { %v1289_v11 = vsel %vm586_vm4, %v1288_v4, %v1287_v6 }
 0x282   : > { %1859 = vpow2.f32 %v1487_v33  ;;  %v1292_v33 = vrot.slane %v1279_v54, 3  ;;  %v1291_v12 = vsel %vm589_vm5, %v1290_v2, %v1289_v11 }
 0x283   : > { %1861 = vpow2.f32 %v1479_v39 }
 0x284   : > { %1863 = vpow2.f32 %v678_v59 }
 0x285   : > { %1865 = vpow2.f32 %v945_v53 }
 0x288   : > { %v1860_v34 = vpop.eup %1859 }
 0x289   : > { %v1492_v37 = vsel %vm488_vm7, %v1860_v34, 0.0  ;;  %v1505_v49 = vpack.c.bf16 %v1860_v34, %v1860_v34  ;;  %v1862_v41 = vpop.eup %1861  ;;  %v1293_v34 = vsel %vm592_vm6, %v1292_v33, %v1291_v12 }
 0x28a   : > { %1493 = vadd.xlane.f32.xlu0 %v1492_v37  ;;  %v1864_v50 = vpop.eup %1863  ;;  %v1491_v14 = vmul.f32 %v1862_v41, %v1490_v20  ;;  %v1294_v37 = vpack.c.b16 %v1293_v34, %v1293_v34 }
 0x28b   : > { %1804 = vmatmul.msk.bf16.vlgmr.msrb.gmra.mxu2 %vm488_vm7, %v1505_v49  ;;  %v689_v61 = vmul.f32 %v1864_v50, %v688_v55  ;;  %v1866_v57 = vpop.eup %1865 }
 0x28c   : > { %v957_v43 = vmul.f32 %v1866_v57, %v956_v62  ;;  %v1299_v18 = vsel %vm763_vm10, %v1294_v37, 0 }
 0x28d   : > { %1308 = vmatpush.bf16.msrb.mxu3 %v1299_v18 }
 0x29e   : > { %1501 = vperm.xlu0 %1852, %v1862_v41   ;;  %v696_v41 = vld [vmem:[#allocation4] sm:$0xff] }
 0x2b7   : > { %v960_v1 = vpop.xlane.xlu0 %959 }
 0x2b8   : > { %v961_v7 = vadd.f32 %v960_v1, %v957_v43 }
 0x2ba   : > { %962 = vst.msk [vmem:[#allocation3 + $0x8] sm:$0xff] %vm479_vm9, %v961_v7 }
 0x2bf   : > { %v692_v44 = vpop.xlane.xlu2 %691 }
 0x2c0   : > { %v693_v63 = vadd.f32 %v692_v44, %v689_v61 }
 0x2c1   : > { %v1592_v10 = vld [vmem:[#allocation3 + $0x8] sm:$0xff] }
 0x2c2   : > { %695 = vst.msk [vmem:[#allocation3] sm:$0xff] %vm479_vm9, %v693_v63  ;;  %v964_v63 = vld [vmem:[#allocation4 + $0x8] sm:$0xff] }
 0x2c8   : > { %v2418_v23 = vpop.f32.mrf.mxu3 }
 0x2c9   : > { %v1591_v7 = vld [vmem:[#allocation3] sm:$0xff] }
 0x2d0   : > { %v1045_v42 = vpop.f32.mrf.mxu3 }
 0x2e6   : > { %v1209_v30 = vpop.xlane.xlu1 %1208 }
 0x2e7   : > { %v1210_v8 = vmax.f32 %v1206_v45, %v1209_v30 }
 0x2e9   : > { %v1211_v46 = vsub.f32 %v1206_v45, %v1210_v8  ;;  %1316 = vst.msk [vmem:[#allocation2 + $0x10] sm:$0xff] %vm479_vm9, %v1210_v8  ;;  %1216 = vperm.xlu1 %1854, %v1210_v8  }
 0x2eb   : > { %v1212_v48 = vmul.f32 1.442695, %v1211_v46 }
 0x2ed   : > { %1867 = vpow2.f32 %v1212_v48 }
 0x2ee   : > { %1869 = vrcp.f32 %v1592_v10  ;;  %v1223_v10 = vld [vmem:[#allocation3 + $0x10] sm:$0xff] }
 0x2f1   : > { %699 = vperm.xlu1 %1854, %v1864_v50  }
 0x2f3   : > { %v2421_v47 = vpop.eup %1867 }
 0x2f4   : > { %1234 = vperm.xlu2 %1853, %v2421_v47   ;;  %v1870_v13 = vpop.eup %1869 }
 0x2f9   : > { %967 = vperm.xlu1 %1854, %v1866_v57  }
 0x2fc   : > { %1606 = vperm.xlu2 %1853, %v1870_v13   ;;  %v1224_v13 = vmul.f32 %v2421_v47, %v1223_v10 }
 0x2fd   : > { %v1494_v15 = vpop.xlane.xlu0 %1493 }
 0x2fe   : > { %v1495_v16 = vadd.f32 %v1494_v15, %v1491_v14 }
 0x300   : > { %1496 = vst.msk [vmem:[#allocation3 + $0x18] sm:$0xff] %vm479_vm9, %v1495_v16  ;;  %v1231_v16 = vld [vmem:[#allocation4 + $0x10] sm:$0xff] }
 0x307   : > { %v1594_v27 = vld [vmem:[#allocation3 + $0x18] sm:$0xff] }
 0x308   : > { %1871 = vrcp.f32 %v1594_v27 }
 0x30e   : > { %v1872_v19 = vpop.eup %1871  ;;  %v1577_v31 = vpop.f32.mrf.mxu2 }
 0x30f   : > { %1616 = vperm.xlu0 %1852, %v1872_v19  }
 0x310   : > { %v1502_v51 = vpop.permute.xlu0 %1501 }
 0x311   : > { %v1504_v28 = vmul.f32 %v1502_v51, %v1498_v17 }
 0x313   : > { %v1581_v32 = vadd.f32 %v1577_v31, %v1504_v28 }
 0x315   : > { %1582 = vst.msk [vmem:[#allocation4 + $0x18] sm:$0xff] %vm488_vm7, %v1581_v32 }
 0x316   : > { %v1579_v22 = vpop.f32.mrf.mxu2 }
 0x31c   : > { %v1590_v30 = vld [vmem:[#allocation4 + $0x18] sm:$0xff] }
 0x34e   : > { %v1235_v62 = vpop.permute.xlu2 %1234 }
 0x34f   : > { %v1237_v27 = vmul.f32 %v1235_v62, %v1231_v16 }
 0x35b   : > { %v1217_v49 = vpop.permute.xlu1 %1216 }
 0x35c   : > { %v1219_v21 = vsub.f32 %v2400_v29, %v1217_v49 }
 0x35e   : > { %v1220_v39 = vmul.f32 1.442695, %v1219_v21 }
 0x360   : > { %1873 = vpow2.f32 %v1220_v39 }
 0x361   : > { %1875 = vrcp.f32 %v1591_v7 }
 0x363   : > { %v700_v59 = vpop.permute.xlu1 %699 }
 0x364   : > { %v702_v50 = vmul.f32 %v700_v59, %v696_v41 }
 0x366   : > { %v1874_v53 = vpop.eup %1873  ;;  %v780_v55 = vadd.f32 %v2387_v25, %v702_v50  ;;  %v1607_v25 = vpop.permute.xlu2 %1606 }
 0x367   : > { %v1225_v61 = vsel %vm488_vm7, %v1874_v53, 0.0  ;;  %v1238_v44 = vpack.c.bf16 %v1874_v53, %v1874_v53 }
 0x368   : > { %781 = vst.msk [vmem:[#allocation4] sm:$0xff] %vm488_vm7, %v780_v55  ;;  %1226 = vadd.xlane.f32.xlu1 %v1225_v61 }
 0x369   : > { %1802 = vmatmul.msk.bf16.vlgmr.msrb.gmra.mxu3 %vm488_vm7, %v1238_v44 }
 0x36b   : > { %v968_v29 = vpop.permute.xlu1 %967 }
 0x36c   : > { %v970_v57 = vmul.f32 %v968_v29, %v964_v63 }
 0x36e   : > { %v1047_v43 = vadd.f32 %v2418_v23, %v970_v57  ;;  %v1876_v23 = vpop.eup %1875 }
 0x36f   : > { %v1587_v51 = vld [vmem:[#allocation4] sm:$0xff] }
 0x370   : > { %1048 = vst.msk [vmem:[#allocation4 + $0x8] sm:$0xff] %vm488_vm7, %v1047_v43 }
 0x377   : > { %v1588_v1 = vld [vmem:[#allocation4 + $0x8] sm:$0xff] }
 0x378   : > { %v1620_v42 = vmul.f32 %v1607_v25, %v1588_v1 }
 0x37a   : > { %v1624_v45 = vpack.c.bf16 %v1620_v42, %v1620_v42 }
 0x37c   : > { %1629 = vst.msk [vmem:[%s2454_s30 + $0x4] sm:$0xf] %vm1627_vm11, %v1624_v45 }
 0x381   : > { %1601 = vperm.xlu1 %1854, %v1876_v23   ;;  %v1617_v8 = vpop.permute.xlu0 %1616 }
 0x382   : > { %v1622_v46 = vmul.f32 %v1617_v8, %v1590_v30 }
 0x384   : > { %v1626_v48 = vpack.c.bf16 %v1622_v46, %v1622_v46 }
 0x386   : > { %1631 = vst.msk [vmem:[%s2454_s30 + $0xc] sm:$0xf] %vm1627_vm11, %v1626_v48 }
 0x3db   : > { %v1227_v20 = vpop.xlane.xlu1 %1226 }
 0x3dc   : > { %v1228_v14 = vadd.f32 %v1227_v20, %v1224_v13 }
 0x3de   : > { %1229 = vst.msk [vmem:[#allocation3 + $0x10] sm:$0xff] %vm479_vm9, %v1228_v14 }
 0x3e5   : > { %v1593_v15 = vld [vmem:[#allocation3 + $0x10] sm:$0xff] }
 0x3e6   : > { %1877 = vrcp.f32 %v1593_v15 }
 0x3ec   : > { %v1878_v19 = vpop.eup %1877  ;;  %v1310_v31 = vpop.f32.mrf.mxu3 }
 0x3ed   : > { %v1314_v17 = vadd.f32 %v1310_v31, %v1237_v27  ;;  %1611 = vperm.xlu2 %1853, %v1878_v19  }
 0x3ef   : > { %1315 = vst.msk [vmem:[#allocation4 + $0x10] sm:$0xff] %vm488_vm7, %v1314_v17 }
 0x3f3   : > { %v1602_v28 = vpop.permute.xlu1 %1601 }
 0x3f4   : > { %v1619_v32 = vmul.f32 %v1602_v28, %v1587_v51  ;;  %v1312_v47 = vpop.f32.mrf.mxu3 }
 0x3f6   : > { %v1623_v22 = vpack.c.bf16 %v1619_v32, %v1619_v32  ;;  %v1589_v35 = vld [vmem:[#allocation4 + $0x10] sm:$0xff] }
 0x3f8   : > { %1628 = vst.msk [vmem:[%s2454_s30] sm:$0xf] %vm1627_vm11, %v1623_v22 }
 0x447   : > { %v1612_v24 = vpop.permute.xlu2 %1611 }
 0x448   : > { %v1621_v58 = vmul.f32 %v1612_v24, %v1589_v35 }
 0x44a   : > { %v1625_v36 = vpack.c.bf16 %v1621_v58, %v1621_v58 }
 0x44c   : > { %1630 = vst.msk [vmem:[%s2454_s30 + $0x8] sm:$0xf] %vm1627_vm11, %v1625_v36 }
 0x44d PF: > { %s13_s16 = sadd.s32 1, %s1917_s16   ;;  %s2487_s12 = smov %s1905_s13 }
 0x44e   : > { %p10_p10 = scmp.ge.s32.totalorder %s13_s16, 4   ;;  %s2488_s13 = smov %s1981_s21 }
 0x44f   : > { %s2489_s14 = smov %s1913_s15  ;;  %s2490_s15 = smov %s2492_s17 }
 0x450   :  { %12 = sbr.rel (!%p10_p10) target bundleno = 3 (0x3), region = 235 }

// kernel: block_forward.9
= control target key start
LH: loop header
LB: loop body
LE: loop exit
PB: predicated region body
PF: predicated region fallthrough
CT: control target
= control target key end

     0   :  { %13 = vsyncpa [#allocation5], 0  ;;  %s988_s27 = smov 0   ;;  %s990_s28 = smov 0   ;;  %s1099_s0 = inlined_call_operand.vmem [shape: f32[16,32], index: 0, kind: input, shape index: {}]   ;;  %s1100_s1 = inlined_call_operand.vmem [shape: f32[1,32], index: 1, kind: input, shape index: {}]   ;;  %s1101_s2 = inlined_call_operand.vmem [shape: f32[1,32], index: 2, kind: input, shape index: {}]   ;;  %s1102_s3 = inlined_call_operand.vmem [shape: f32[16,4], index: 3, kind: input, shape index: {}]   ;;  %s1103_s4 = inlined_call_operand.vmem [shape: bf16[4,32,128], index: 4, kind: input, shape index: {}]   ;;  %s1104_s5 = inlined_call_operand.vmem [shape: f32[4,1,128], index: 5, kind: input, shape index: {}]   ;;  %s1105_s6 = inlined_call_operand.vmem [shape: bf16[4,128,32], index: 6, kind: input, shape index: {}]   ;;  %s1106_s7 = inlined_call_operand.vmem [shape: f32[4,1,32], index: 7, kind: input, shape index: {}]   ;;  %s1107_s8 = inlined_call_operand.hbm [shape: f32[16,32], index: 8, kind: output, shape index: {}]  }
   0x1   :  { %s992_s29 = smov 0  }
   0x2 LB: > { %s765_s30 = sadd.s32 4294967295, %s937_s29   ;;  %s28_s9 = sadd.s32 1, %s933_s28  ;;  %s937_s29 = sphi %s992_s29, %s19_s29   ;;  %s933_s28 = sphi %s990_s28, %s1109_s28   ;;  %s929_s27 = sphi %s988_s27, %s1108_s27  }
   0x3   : > { %p29_p0 = scmp.ge.s32.totalorder %s28_s9, 4  ;;  %p770_p1 = scmp.ge.s32.totalorder %s937_s29, 1 }
   0x4   : > { %p323_p2 = scmp.lt.s32.totalorder %s937_s29, 5 }
   0x5   : > { %s1111_s9 = smov (%p29_p0, %s28_s9), 0 }
   0x6   : > { %p324_p3 = pnand %p770_p1, %p323_p2 }
   0x7   : > { %p385_p4 = scmp.lt.s32.totalorder (!%p324_p3), %s929_s27, 3  ;;  %p775_p5 = scmp.ne.s32.totalorder (!%p324_p3), %s929_s27, 0 }
   0x8   : > { %327 = sbr.rel (%p324_p3) target bundleno = 602 (0x25a), region = 52 }
   0xd   : > { %s1011_s10 = scalar_select %p385_p4, %s929_s27, 3 }
   0xe   : > { %406 = sbr.rel (%p775_p5) target bundleno = 299 (0x12b), region = 56 }
   0xf   : > { %s826_s11 = sshll.u32 %s1011_s10, 4  ;;  %s392_s14 = scalar_lea.vmem %s1104_s5, %s1011_s10 }
  0x10   : > { %s1021_s17 = scalar_lea.vmem %s1103_s4, %s826_s11  ;;  %s827_s18 = sshll.u32 %s1011_s10, 6 }
  0x11   : > { %s1027_s21 = scalar_lea.vmem %s1105_s6, %s827_s18  ;;  %s400_s24 = scalar_lea.vmem %s1106_s7, %s1011_s10 }
  0x13   : > { %v407_v0 = vld [vmem:[%s1099_s0] sm:$0xff]  ;;  %vm411_vm0 = vcmask 261120   ;;  %v408_v2 = vld [vmem:[%s1099_s0 + $0x8] sm:$0xff]  ;;  %v939_v4 = vmov 32.0   ;;  %vm475_vm6 = vcmask 257024  }
  0x14   : > { %v412_v1 = vsel %vm411_vm0, %v407_v0, 0.0  ;;  %478 = vst.msk [vmem:[#allocation3] sm:$0xff] %vm411_vm0, %v407_v0  ;;  %v415_v3 = vsel %vm411_vm0, %v408_v2, 0.0  ;;  %875 = vrcp.f32 %v939_v4  ;;  %v873_v35 = vld [vmem:[%s1100_s1] ss:$0 sm:$0xff] }
  0x15   : > { %413 = vadd.xlane.f32.xlu0 %v412_v1  ;;  %479 = vst.msk [vmem:[#allocation3 + $0x8] sm:$0xff] %vm411_vm0, %v408_v2  ;;  %v874_v38 = vld [vmem:[%s1101_s2] ss:$0 sm:$0xff] }
  0x1a   : > { %v876_v5 = vpop.eup %875 }
  0x1b   : > { %v419_v6 = vmul.f32 32.0, %v876_v5  ;;  %vm423_vm1 = vweird.f32 %v876_v5 }
  0x1d   : > { %416 = vadd.xlane.f32.xlu0 %v415_v3  ;;  %v420_v7 = vsub.f32 1.0, %v419_v6 }
  0x1f   : > { %v421_v8 = vmul.f32 %v876_v5, %v420_v7 }
  0x21   : > { %v422_v9 = vadd.f32 %v876_v5, %v421_v8 }
  0x23   : > { %v424_v10 = vsel %vm423_vm1, %v876_v5, %v422_v9 }
  0x88   : > { %v414_v11 = vpop.xlane.xlu0 %413 }
  0x89   : > { %v425_v12 = vmul.f32 %v424_v10, %v414_v11 }
  0x8b   : > { %v427_v13 = vsub.f32 %v407_v0, %v425_v12 }
  0x8d   : > { %v429_v14 = vmul.f32 %v427_v13, %v427_v13 }
  0x8f   : > { %v431_v15 = vsel %vm411_vm0, %v429_v14, 0.0 }
  0x90   : > { %432 = vadd.xlane.f32.xlu1 %v431_v15  ;;  %v417_v16 = vpop.xlane.xlu0 %416 }
  0x91   : > { %v426_v17 = vmul.f32 %v424_v10, %v417_v16 }
  0x93   : > { %v428_v18 = vsub.f32 %v408_v2, %v426_v17 }
  0x95   : > { %v430_v19 = vmul.f32 %v428_v18, %v428_v18 }
  0x97   : > { %v434_v20 = vsel %vm411_vm0, %v430_v19, 0.0 }
  0x98   : > { %435 = vadd.xlane.f32.xlu1 %v434_v20 }
 0x103   : > { %v433_v21 = vpop.xlane.xlu1 %432 }
 0x104   : > { %v437_v22 = vmul.f32 %v433_v21, %v424_v10 }
 0x106   : > { %v439_v23 = vadd.f32 1e-05, %v437_v22 }
 0x108   : > { %877 = vrsqrt.f32 %v439_v23  ;;  %vm447_vm3 = vweird.f32 %v439_v23 }
 0x10b   : > { %v436_v24 = vpop.xlane.xlu1 %435 }
 0x10c   : > { %v438_v25 = vmul.f32 %v436_v24, %v424_v10 }
 0x10e   : > { %v878_v26 = vpop.eup %877  ;;  %v440_v27 = vadd.f32 1e-05, %v438_v25 }
 0x10f   : > { %v442_v28 = vmul.f32 %v878_v26, %v439_v23  ;;  %vm448_vm2 = vweird.f32 %v878_v26 }
 0x110   : > { %879 = vrsqrt.f32 %v440_v27  ;;  %vm449_vm4 = vmor %vm447_vm3, %vm448_vm2  ;;  %vm457_vm7 = vweird.f32 %v440_v27 }
 0x111   : > { %v443_v29 = vmul.f32 %v878_v26, %v442_v28 }
 0x113   : > { %v444_v30 = vmul.f32 0.5, %v443_v29 }
 0x115   : > { %v445_v31 = vsub.f32 1.5, %v444_v30 }
 0x116   : > { %v880_v32 = vpop.eup %879 }
 0x117   : > { %v446_v33 = vmul.f32 %v878_v26, %v445_v31  ;;  %v452_v34 = vmul.f32 %v880_v32, %v440_v27  ;;  %vm458_vm5 = vweird.f32 %v880_v32 }
 0x118   : > { %vm459_vm8 = vmor %vm457_vm7, %vm458_vm5 }
 0x119   : > { %v450_v36 = vsel %vm449_vm4, %v878_v26, %v446_v33  ;;  %v453_v37 = vmul.f32 %v880_v32, %v452_v34 }
 0x11a   : > { %v461_v39 = vmul.f32 %v450_v36, %v427_v13 }
 0x11b   : > { %v454_v40 = vmul.f32 0.5, %v453_v37 }
 0x11c   : > { %v466_v41 = vmul.f32 %v873_v35, %v461_v39 }
 0x11d   : > { %v455_v42 = vsub.f32 1.5, %v454_v40 }
 0x11e   : > { %v471_v43 = vadd.f32 %v874_v38, %v466_v41 }
 0x11f   : > { %v456_v44 = vmul.f32 %v880_v32, %v455_v42 }
 0x120   : > { %v473_v45 = vpack.c.bf16 %v471_v43, %v471_v43 }
 0x121   : > { %v460_v46 = vsel %vm459_vm8, %v880_v32, %v456_v44 }
 0x122   : > { %476 = vst.msk [vmem:[#allocation2] sm:$0xf] %vm475_vm6, %v473_v45  ;;  %v462_v47 = vmul.f32 %v460_v46, %v428_v18 }
 0x124   : > { %v467_v48 = vmul.f32 %v873_v35, %v462_v47 }
 0x126   : > { %v472_v49 = vadd.f32 %v874_v38, %v467_v48 }
 0x128   : > { %v474_v50 = vpack.c.bf16 %v472_v49, %v472_v49 }
 0x12a   : > { %477 = vst.msk [vmem:[#allocation2 + $0x4] sm:$0xf] %vm475_vm6, %v474_v50 }
 0x12b PF: > { %v830_v51 = vld [vmem:[%s1021_s17 + $0x8] sm:$0xff]  ;;  %v838_v52 = vld [vmem:[%s1027_s21 + $0x38] sm:$0xff]  ;;  %v829_v53 = vld [vmem:[%s1021_s17] sm:$0xff]  ;;  %vm507_vm9 = vcmask 261120   ;;  %v612_v62 = vlaneseq  ;;  %v614_v63 = vstv %s929_s27  ;;  %vm618_vm10 = vcmask 31744   ;;  %p821_p6 = scmp.ne.s32.totalorder %s929_s27, 3 }
 0x12c   : > { %517 = vmatpush.bf16.msra.mxu0 %v830_v51  ;;  %596 = vmatpush.bf16.msra.mxu1 %v838_v52  ;;  %v837_v54 = vld [vmem:[%s1027_s21 + $0x30] sm:$0xff]  ;;  %v836_v56 = vld [vmem:[%s1027_s21 + $0x28] sm:$0xff]  ;;  %v835_v57 = vld [vmem:[%s1027_s21 + $0x20] sm:$0xff] }
 0x12d   : > { %v834_v58 = vld [vmem:[%s1027_s21 + $0x18] sm:$0xff]  ;;  %v833_v59 = vld [vmem:[%s1027_s21 + $0x10] sm:$0xff]  ;;  %v832_v60 = vld [vmem:[%s1027_s21 + $0x8] sm:$0xff]  ;;  %v613_v1 = vand.u32 127, %v612_v62 }
 0x12e   : > { %v831_v61 = vld [vmem:[%s1027_s21] sm:$0xff]  ;;  %v611_v4 = vld [vmem:[%s1102_s3 + $0x8] sm:$0xff]  ;;  %v626_v25 = vld [vmem:[#allocation3 + $0x8] sm:$0xff] }
 0x12f   : > { %v610_v0 = vld [vmem:[%s1102_s3] sm:$0xff]  ;;  %vm615_vm11 = vcmp.eq.s32.totalorder %v613_v1, %v614_v63  ;;  %v625_v19 = vld [vmem:[#allocation3] sm:$0xff] }
 0x130   : > { %518 = vmatpush.bf16.msra.mxu0 %v829_v53  ;;  %597 = vmatpush.bf16.msra.mxu1 %v837_v54  ;;  %v616_v2 = vsel %vm615_vm11, %v610_v0, 0.0  ;;  %v617_v5 = vsel %vm615_vm11, %v611_v4, 0.0  ;;  %v881_v8 = vld [vmem:[%s392_s14] ss:$0 sm:$0xff] }
 0x131   : > { %v828_v55 = vld [vmem:[#allocation2] sm:$0xff]  ;;  %v619_v3 = vsel %vm618_vm10, %v616_v2, 0.0  ;;  %v622_v6 = vsel %vm618_vm10, %v617_v5, 0.0 }
 0x132   : > { %620 = vadd.xlane.f32.xlu0 %v619_v3  ;;  %v882_v15 = vld [vmem:[%s400_s24] ss:$0 sm:$0xff] }
 0x133   : > { %788 = vmatmul.msk.bf16.vlgmr.msra.gmra.mxu0 %vm507_vm9, %v828_v55 }
 0x134   : > { %598 = vmatpush.bf16.msra.mxu1 %v836_v56 }
 0x138   : > { %599 = vmatpush.bf16.msra.mxu1 %v835_v57 }
 0x13a   : > { %623 = vadd.xlane.f32.xlu0 %v622_v6 }
 0x13c   : > { %600 = vmatpush.bf16.msra.mxu1 %v834_v58 }
 0x140   : > { %601 = vmatpush.bf16.msra.mxu1 %v833_v59 }
 0x144   : > { %602 = vmatpush.bf16.msra.mxu1 %v832_v60 }
 0x148   : > { %603 = vmatpush.bf16.msra.mxu1 %v831_v61 }
 0x1a5   : > { %v621_v16 = vpop.xlane.xlu0 %620 }
 0x1ad   : > { %v624_v23 = vpop.xlane.xlu0 %623 }
 0x1b0   : > { %v520_v7 = vpop.f32.mrf.mxu0 }
 0x1b1   : > { %v521_v9 = vadd.f32 %v881_v8, %v520_v7 }
 0x1b3   : > { %v525_v12 = vmax.f32 %v521_v9, 0.0 }
 0x1b8   : > { %v522_v10 = vpop.f32.mrf.mxu0 }
 0x1b9   : > { %v523_v11 = vadd.f32 %v881_v8, %v522_v10 }
 0x1bb   : > { %v526_v13 = vmax.f32 %v523_v11, 0.0 }
 0x1bd   : > { %v527_v14 = vpack.c.bf16 %v526_v13, %v525_v12 }
 0x1bf   : > { %604 = vmatmul.bf16.vlgmr.msra.gmra.mxu1 %v527_v14 }
 0x23c   : > { %v605_v17 = vpop.f32.mrf.mxu1 }
 0x23d   : > { %v606_v18 = vadd.f32 %v882_v15, %v605_v17 }
 0x23f   : > { %v627_v20 = vmul.f32 %v621_v16, %v606_v18 }
 0x241   : > { %v629_v21 = vadd.f32 %v627_v20, %v625_v19 }
 0x243   : > { %631 = vst.msk [vmem:[#allocation3] sm:$0xff] %vm507_vm9, %v629_v21 }
 0x244   : > { %v607_v22 = vpop.f32.mrf.mxu1 }
 0x245   : > { %v608_v24 = vadd.f32 %v882_v15, %v607_v22 }
 0x247   : > { %v628_v26 = vmul.f32 %v624_v23, %v608_v24  ;;  %636 = sbr.rel (%p821_p6) target bundleno = 596 (0x254), region = 60 }
 0x249   : > { %v630_v27 = vadd.f32 %v628_v26, %v626_v25 }
 0x24b   : > { %632 = vst.msk [vmem:[#allocation3 + $0x8] sm:$0xff] %vm507_vm9, %v630_v27 }
 0x24c   : > { %v637_v28 = vld [vmem:[#allocation3] sm:$0xff] }
 0x24d   : > { %639 = vst.msk [vmem:[#allocation4] sm:$0xff] %vm507_vm9, %v637_v28 }
 0x252   : > { %v638_v29 = vld [vmem:[#allocation3 + $0x8] sm:$0xff] }
 0x253   : > { %640 = vst.msk [vmem:[#allocation4 + $0x8] sm:$0xff] %vm507_vm9, %v638_v29 }
 0x254 PF: > { %p843_p7 = scmp.eq.s32.totalorder %s765_s30, 3  ;;  %s651_s24 = sshll.u32 %s1107_s8, 4  ;;  %s652_s24 = int_to_ptr.hbm [resolvable:$true] %s651_s24 }
 0x255   : > { %s940_s11 = smov [#allocation4]   ;;  %s941_s27 = smov 128  }
 0x256   : > { %s649_s12 = sshll.u32 %s940_s11, 4  ;;  %s942_s13 = smov 8   ;;  %s650_s12 = int_to_ptr.vmem [resolvable:$true] %s649_s12 }
 0x257   : > { %840 = dma.vmem_to_hbm [thread:$0]  (%p843_p7), %s650_s12, 256, %s652_s24, [#allocation5], %s941_s27, %s941_s27, %s942_s13  }
 0x258   : > { %924 = dma.done.wait (%p843_p7), [#allocation5], 256  }
 0x259   : > { %926 = vsyncadd (%p843_p7), [#allocation5], 4294967040 }
 0x25a PF: > { %s19_s29 = sadd.s32 1, %s937_s29   ;;  %s1108_s27 = smov %s933_s28 }
 0x25b   : > { %p16_p8 = scmp.ge.s32.totalorder %s19_s29, 6   ;;  %s1109_s28 = smov %s1111_s9 }
 0x25d   :  { %18 = sbr.rel (!%p16_p8) target bundleno = 2 (0x2), region = 103 }
 0x262   :  { %668 = vsyncpa [#allocation5], 1 }
 0x263   :  { %670 = vsyncpa [#allocation5 + $0x1], 1 }

</bundles_post_ra>
